<compile_context>
chip_gen: v7x
topology: tpu7x:2x2x1
jax: 0.10.0
libtpu: 0.0.40
codegen_flags: <defaults>
</compile_context>

<pallas_src>
import jax
import jax.numpy as jnp
from jax.experimental import pallas as pl
from jax.experimental.pallas import tpu as pltpu

NEG_SLOPE = 0.01          # torch.nn.LeakyReLU default
F1_COL_TILE = 1024        # lane-dense column tile of the fused layer-1 output
DEFAULT_BATCH_TILE = 256  # batch rows per grid step


def _round_up(x, m):
    return ((x + m - 1) // m) * m


def _leaky(z):
    return jnp.where(z >= 0.0, z, NEG_SLOPE * z)


# ------------------------------- Pallas kernel ------------------------------- #
def _fused_encoder_kernel(obs_ref, w1_ref, b1_ref, w2_ref, b2_ref, out_ref, acc_ref):
    """One grid step = (net n, batch tile i, features1 column tile j).

    Layer 1 (misc/stacks/hexes linears fused as one block-diagonal matmul) is computed for
    column tile j only; its layer-2 contribution is accumulated into acc_ref (VMEM).
    The final [tileB, out] block is written once, at the last column tile.
    """
    j = pl.program_id(2)

    @pl.when(j == 0)
    def _init():
        acc_ref[...] = jnp.zeros_like(acc_ref)

    # Fused layer 1 on this column tile: [tileB, in_total] @ [in_total, f1_tile] (lane-dense).
    f1 = jnp.dot(obs_ref[...], w1_ref[...], preferred_element_type=jnp.float32)
    f1 = _leaky(f1 + b1_ref[...])

    # Partial layer 2: [tileB, f1_tile] @ [f1_tile, out], accumulated in VMEM scratch.
    acc_ref[...] += jnp.dot(f1, w2_ref[...], preferred_element_type=jnp.float32)

    @pl.when(j == pl.num_programs(2) - 1)
    def _finalize():
        out_ref[...] = _leaky(acc_ref[...] + b2_ref[...])


# --------------------------- parameter construction -------------------------- #
def _orthogonal(key, shape, gain):
    """Deterministic orthogonal init (matches torch.nn.init.orthogonal_ semantics)."""
    rows, cols = shape
    big, small = max(rows, cols), min(rows, cols)
    a = jax.random.normal(key, (big, small), dtype=jnp.float32)
    q, r = jnp.linalg.qr(a)
    d = jnp.diagonal(r)
    s = jnp.where(d == 0, 1.0, jnp.sign(d))   # avoid zeroing a column when diag(r)==0
    q = q * s[None, :]
    if q.shape != shape:
        q = q.T
    return gain * q


def init_encoder_params(key, obs_dims, hm=32, hs=16, hh=16, h2=64):
    assert list(obs_dims.keys()) == ["misc", "stacks", "hexes"]
    assert obs_dims["stacks"] % 20 == 0
    assert obs_dims["hexes"] % 165 == 0
    m = obs_dims["misc"]
    s_in = obs_dims["stacks"] // 20
    h_in = obs_dims["hexes"] // 165
    concat_dim = hm + 20 * hs + 165 * hh
    gain = 2.0 ** 0.5
    k0, k1, k2, k3 = jax.random.split(key, 4)
    return {
        "Wm": _orthogonal(k0, (m, hm), gain),          "bm": jnp.zeros((hm,), jnp.float32),
        "Ws": _orthogonal(k1, (s_in, hs), gain),       "bs": jnp.zeros((hs,), jnp.float32),
        "Wh": _orthogonal(k2, (h_in, hh), gain),       "bh": jnp.zeros((hh,), jnp.float32),
        "W2": _orthogonal(k3, (concat_dim, h2), gain), "b2": jnp.zeros((h2,), jnp.float32),
    }


# ------------------------------ weight packing -------------------------------- #
def _pack_single_net(p, obs_dims):
    """Fold the three per-segment layer-1 linears into one block-diagonal weight.

    leaky(obs @ W1 + b1) == cat(leaky(misc@Wm+bm),
                                per-stack leaky(s@Ws+bs) flattened,
                                per-hex   leaky(h@Wh+bh) flattened)
    """
    m, s_tot, h_tot = obs_dims["misc"], obs_dims["stacks"], obs_dims["hexes"]
    Wm, Ws, Wh = p["Wm"], p["Ws"], p["Wh"]
    hm, hs, hh = Wm.shape[1], Ws.shape[1], Wh.shape[1]

    ws_bd = jnp.kron(jnp.eye(20, dtype=jnp.float32), Ws)     # [s_tot, 20*hs]
    wh_bd = jnp.kron(jnp.eye(165, dtype=jnp.float32), Wh)    # [h_tot, 165*hh]

    in_total = m + s_tot + h_tot
    f1_dim = hm + 20 * hs + 165 * hh
    w1 = jnp.zeros((in_total, f1_dim), jnp.float32)
    w1 = w1.at[:m, :hm].set(Wm)
    w1 = w1.at[m:m + s_tot, hm:hm + 20 * hs].set(ws_bd)
    w1 = w1.at[m + s_tot:, hm + 20 * hs:].set(wh_bd)
    b1 = jnp.concatenate([p["bm"], jnp.tile(p["bs"], 20), jnp.tile(p["bh"], 165)])
    return w1, b1, p["W2"], p["b2"]


def _pack_nets(params_list, obs_dims):
    """Stack per-net fused weights along a leading 'net' axis and zero-pad the
    features1 dimension to a multiple of the lane-dense column tile (exact: padded
    columns are leaky(0)=0 and hit zero rows of the padded W2)."""
    w1s, b1s, w2s, b2s = zip(*[_pack_single_net(p, obs_dims) for p in params_list])
    f1_dim = w1s[0].shape[1]
    f1_tile = min(F1_COL_TILE, _round_up(f1_dim, 128))
    f1_pad = _round_up(f1_dim, f1_tile)
    pad = f1_pad - f1_dim
    w1 = jnp.stack([jnp.pad(w, ((0, 0), (0, pad))) for w in w1s])        # [N, in, f1_pad]
    b1 = jnp.stack([jnp.pad(b, (0, pad)).reshape(1, -1) for b in b1s])   # [N, 1,  f1_pad]
    w2 = jnp.stack([jnp.pad(w, ((0, pad), (0, 0))) for w in w2s])        # [N, f1_pad, out]
    b2 = jnp.stack([b.reshape(1, -1) for b in b2s])                      # [N, 1,  out]
    return w1, b1, w2, b2, f1_tile


# -------------------------------- forward pass -------------------------------- #
def _fused_forward(w1, b1, w2, b2, f1_tile, obs, *, batch_tile=DEFAULT_BATCH_TILE):
    n_nets, in_total, f1_pad = w1.shape
    out_dim = w2.shape[-1]
    b = obs.shape[0]

    tb = min(batch_tile, _round_up(max(b, 1), 8))
    b_pad = _round_up(b, tb)
    if b_pad != b:
        obs = jnp.pad(obs, ((0, b_pad - b), (0, 0)))

    grid = (n_nets, b_pad // tb, f1_pad // f1_tile)

    flops = 2 * n_nets * b_pad * (in_total * f1_pad + f1_pad * out_dim)
    bytes_accessed = 4 * (b_pad * in_total
                          + n_nets * (in_total * f1_pad + f1_pad + f1_pad * out_dim + out_dim)
                          + n_nets * b_pad * out_dim)

    out = pl.pallas_call(
        _fused_encoder_kernel,
        out_shape=jax.ShapeDtypeStruct((n_nets, b_pad, out_dim), jnp.float32),
        grid_spec=pltpu.PrefetchScalarGridSpec(
            num_scalar_prefetch=0,
            grid=grid,
            in_specs=[
                # obs block index is independent of (net, col) axes -> DMA'd once per batch tile
                pl.BlockSpec((tb, in_total), lambda n, i, j: (i, 0)),
                pl.BlockSpec((None, in_total, f1_tile), lambda n, i, j: (n, 0, j)),
                pl.BlockSpec((None, 1, f1_tile), lambda n, i, j: (n, 0, j)),
                pl.BlockSpec((None, f1_tile, out_dim), lambda n, i, j: (n, j, 0)),
                pl.BlockSpec((None, 1, out_dim), lambda n, i, j: (n, 0, 0)),
            ],
            out_specs=pl.BlockSpec((None, tb, out_dim), lambda n, i, j: (n, i, 0)),
            scratch_shapes=[pltpu.VMEM((tb, out_dim), jnp.float32)],
        ),
        compiler_params=pltpu.CompilerParams(
            dimension_semantics=("parallel", "parallel", "arbitrary"),
            vmem_limit_bytes=48 << 20,   # ~17 MiB live at tileB=256; safe on v5e/v6e/v7x
        ),
        cost_estimate=pl.CostEstimate(
            flops=flops, transcendentals=0, bytes_accessed=bytes_accessed),
    )(obs, w1, b1, w2, b2)
    return out[:, :b, :]


def encoder_forward_fused(params_list, obs, obs_dims, *, batch_tile=DEFAULT_BATCH_TILE):
    """Run one or more EncoderNN nets (e.g. actor+critic) in a single fused kernel."""
    w1, b1, w2, b2, f1_tile = _pack_nets(params_list, obs_dims)
    return _fused_forward(w1, b1, w2, b2, f1_tile, obs, batch_tile=batch_tile)


def common_encoder_forward(actor_params, critic_params, obs, obs_dims,
                           shared=False, inference_only=False):
    if shared or inference_only:
        outs = encoder_forward_fused([actor_params], obs, obs_dims)
    else:
        # Non-shared: actor + critic fused in ONE kernel (obs DMA'd once per batch tile).
        outs = encoder_forward_fused([actor_params, critic_params], obs, obs_dims)
    result = {"actor": outs[0]}
    if not inference_only:
        result["critic"] = outs[0] if shared else outs[1]
    return {"encoder_out": result}


def compute_value(critic_params, obs, obs_dims):
    return encoder_forward_fused([critic_params], obs, obs_dims)[0]


# ---------------------------- pure-JAX reference ------------------------------ #
def encoder_nn_reference(p, obs, obs_dims):
    m, s, hx = obs_dims["misc"], obs_dims["stacks"], obs_dims["hexes"]
    b = obs.shape[0]
    misc = obs[:, :m]
    stacks = obs[:, m:m + s]
    hexes = obs[:, m + s:m + s + hx]
    fm = _leaky(misc @ p["Wm"] + p["bm"])
    fs = _leaky(stacks.reshape(b * 20, -1) @ p["Ws"] + p["bs"]).reshape(b, -1)
    fh = _leaky(hexes.reshape(b * 165, -1) @ p["Wh"] + p["bh"]).reshape(b, -1)
    f1 = jnp.concatenate([fm, fs, fh], axis=1)
    return _leaky(f1 @ p["W2"] + p["b2"])


# ------------------------------------ main ------------------------------------ #
if __name__ == "__main__":
    obs_dims = {"misc": 16, "stacks": 20 * 8, "hexes": 165 * 8}  # keys/order match module
    batch = 2
    total_obs = sum(obs_dims.values())

    key = jax.random.PRNGKey(0)
    k_obs, k_actor, k_critic = jax.random.split(key, 3)

    obs = jax.random.normal(k_obs, (batch, total_obs), dtype=jnp.float32)
    actor_params = init_encoder_params(k_actor, obs_dims)
    critic_params = init_encoder_params(k_critic, obs_dims)

    # shared=False, inference_only=False -> both ACTOR and CRITIC outputs, one fused kernel.
    out = common_encoder_forward(actor_params, critic_params, obs, obs_dims,
                                 shared=False, inference_only=False)
    out = jax.block_until_ready(out)

    a = out["encoder_out"]["actor"]
    c = out["encoder_out"]["critic"]
    assert a.shape == (batch, 64) and c.shape == (batch, 64)
    assert bool(jnp.all(jnp.isfinite(a))) and bool(jnp.all(jnp.isfinite(c)))

    a_ref = encoder_nn_reference(actor_params, obs, obs_dims)
    c_ref = encoder_nn_reference(critic_params, obs, obs_dims)
    assert bool(jnp.allclose(a, a_ref, rtol=5e-2, atol=5e-2))
    assert bool(jnp.allclose(c, c_ref, rtol=5e-2, atol=5e-2))

    # compute_value path (single-net kernel).
    v = jax.block_until_ready(compute_value(critic_params, obs, obs_dims))
    assert v.shape == (batch, 64)
    assert bool(jnp.allclose(v, c_ref, rtol=5e-2, atol=5e-2))

    print("KERNEL_OK")
</pallas_src>

<mosaic_0001>
module attributes {stable_mosaic.version = 11 : i64} {
  func.func @_fused_encoder_kernel(%arg0: i32, %arg1: i32, %arg2: i32, %arg3: memref<8x1496xf32, #tpu.memory_space<vmem>>, %arg4: memref<1x1496x1024xf32, #tpu.memory_space<vmem>>, %arg5: memref<1x1x1024xf32, #tpu.memory_space<vmem>>, %arg6: memref<1x1024x64xf32, #tpu.memory_space<vmem>>, %arg7: memref<1x1x64xf32, #tpu.memory_space<vmem>>, %arg8: memref<1x8x64xf32, #tpu.memory_space<vmem>>, %arg9: memref<8x64xf32, #tpu.memory_space<vmem>>) attributes {dimension_semantics = [#tpu.dimension_semantics<parallel>, #tpu.dimension_semantics<parallel>, #tpu.dimension_semantics<arbitrary>], iteration_bounds = array<i64: 2, 1, 3>, scalar_prefetch = 0 : i64, scratch_operands = 1 : i64, tpu.core_type = #tpu.core_type<tc>, window_params = [{transform_indices = @transform_0, window_bounds = array<i64: 8, 1496>}, {transform_indices = @transform_1, window_bounds = array<i64: 1, 1496, 1024>}, {transform_indices = @transform_2, window_bounds = array<i64: 1, 1, 1024>}, {transform_indices = @transform_3, window_bounds = array<i64: 1, 1024, 64>}, {transform_indices = @transform_4, window_bounds = array<i64: 1, 1, 64>}, {transform_indices = @transform_5, window_bounds = array<i64: 1, 8, 64>}]} {
    %c0_i32 = arith.constant 0 : i32
    %0 = arith.cmpi eq, %arg2, %c0_i32 : i32
    %1 = arith.extui %0 : i1 to i32
    %c0_i32_0 = arith.constant 0 : i32
    %2 = arith.cmpi ne, %1, %c0_i32_0 : i32
    scf.if %2 {
      %cst_19 = arith.constant 0.000000e+00 : f32
      %25 = vector.broadcast %cst_19 : f32 to vector<8x64xf32>
      %c0_20 = arith.constant 0 : index
      %c0_21 = arith.constant 0 : index
      %26 = vector.load %arg9[%c0_20, %c0_21] : memref<8x64xf32, #tpu.memory_space<vmem>>, vector<8x64xf32>
      tpu.vector_store %arg9[%c0_20, %c0_21], %25 {strides = array<i32>} : memref<8x64xf32, #tpu.memory_space<vmem>>, vector<8x64xf32>,
    } else {
    }
    %c0 = arith.constant 0 : index
    %c0_1 = arith.constant 0 : index
    %3 = vector.load %arg3[%c0, %c0_1] : memref<8x1496xf32, #tpu.memory_space<vmem>>, vector<8x1496xf32>
    %c0_2 = arith.constant 0 : index
    %c0_3 = arith.constant 0 : index
    %c0_4 = arith.constant 0 : index
    %4 = vector.load %arg4[%c0_2, %c0_3, %c0_4] : memref<1x1496x1024xf32, #tpu.memory_space<vmem>>, vector<1x1496x1024xf32>
    %5 = vector.shape_cast %4 : vector<1x1496x1024xf32> to vector<1496x1024xf32>
    %cst = arith.constant dense<0.000000e+00> : vector<8x1024xf32>
    %6 = tpu.matmul %3, %5, %cst {dimension_numbers = #tpu.dot_dimension_numbers<[1], [0], [0], [1], [0, 0, 1, 1], [], []>} : vector<8x1496xf32>, vector<1496x1024xf32>, vector<8x1024xf32> -> vector<8x1024xf32>
    %c0_5 = arith.constant 0 : index
    %c0_6 = arith.constant 0 : index
    %c0_7 = arith.constant 0 : index
    %7 = vector.load %arg5[%c0_5, %c0_6, %c0_7] : memref<1x1x1024xf32, #tpu.memory_space<vmem>>, vector<1x1x1024xf32>
    %8 = vector.shape_cast %7 : vector<1x1x1024xf32> to vector<1x1024xf32>
    %9 = vector.broadcast %8 : vector<1x1024xf32> to vector<8x1024xf32>
    %10 = arith.addf %6, %9 : vector<8x1024xf32>
    %cst_8 = arith.constant 0.000000e+00 : f32
    %11 = vector.broadcast %cst_8 : f32 to vector<8x1024xf32>
    %12 = arith.cmpf oge, %10, %11 : vector<8x1024xf32>
    %cst_9 = arith.constant 0.00999999977 : f32
    %13 = vector.broadcast %cst_9 : f32 to vector<8x1024xf32>
    %14 = arith.mulf %13, %10 : vector<8x1024xf32>
    %15 = arith.select %12, %10, %14 : vector<8x1024xi1>, vector<8x1024xf32>
    %c0_10 = arith.constant 0 : index
    %c0_11 = arith.constant 0 : index
    %16 = vector.load %arg9[%c0_10, %c0_11] : memref<8x64xf32, #tpu.memory_space<vmem>>, vector<8x64xf32>
    %c0_12 = arith.constant 0 : index
    %c0_13 = arith.constant 0 : index
    %c0_14 = arith.constant 0 : index
    %17 = vector.load %arg6[%c0_12, %c0_13, %c0_14] : memref<1x1024x64xf32, #tpu.memory_space<vmem>>, vector<1x1024x64xf32>
    %18 = vector.shape_cast %17 : vector<1x1024x64xf32> to vector<1024x64xf32>
    %cst_15 = arith.constant dense<0.000000e+00> : vector<8x64xf32>
    %19 = tpu.matmul %15, %18, %cst_15 {dimension_numbers = #tpu.dot_dimension_numbers<[1], [0], [0], [1], [0, 0, 1, 1], [], []>} : vector<8x1024xf32>, vector<1024x64xf32>, vector<8x64xf32> -> vector<8x64xf32>
    %20 = arith.addf %16, %19 : vector<8x64xf32>
    %c0_16 = arith.constant 0 : index
    %c0_17 = arith.constant 0 : index
    %21 = vector.load %arg9[%c0_16, %c0_17] : memref<8x64xf32, #tpu.memory_space<vmem>>, vector<8x64xf32>
    tpu.vector_store %arg9[%c0_16, %c0_17], %20 {strides = array<i32>} : memref<8x64xf32, #tpu.memory_space<vmem>>, vector<8x64xf32>,
    %c2_i32 = arith.constant 2 : i32
    %22 = arith.cmpi eq, %arg2, %c2_i32 : i32
    %23 = arith.extui %22 : i1 to i32
    %c0_i32_18 = arith.constant 0 : i32
    %24 = arith.cmpi ne, %23, %c0_i32_18 : i32
    scf.if %24 {
      %c0_19 = arith.constant 0 : index
      %c0_20 = arith.constant 0 : index
      %25 = vector.load %arg9[%c0_19, %c0_20] : memref<8x64xf32, #tpu.memory_space<vmem>>, vector<8x64xf32>
      %c0_21 = arith.constant 0 : index
      %c0_22 = arith.constant 0 : index
      %c0_23 = arith.constant 0 : index
      %26 = vector.load %arg7[%c0_21, %c0_22, %c0_23] : memref<1x1x64xf32, #tpu.memory_space<vmem>>, vector<1x1x64xf32>
      %27 = vector.shape_cast %26 : vector<1x1x64xf32> to vector<1x64xf32>
      %28 = vector.broadcast %27 : vector<1x64xf32> to vector<8x64xf32>
      %29 = arith.addf %25, %28 : vector<8x64xf32>
      %cst_24 = arith.constant 0.000000e+00 : f32
      %30 = vector.broadcast %cst_24 : f32 to vector<8x64xf32>
      %31 = arith.cmpf oge, %29, %30 : vector<8x64xf32>
      %cst_25 = arith.constant 0.00999999977 : f32
      %32 = vector.broadcast %cst_25 : f32 to vector<8x64xf32>
      %33 = arith.mulf %32, %29 : vector<8x64xf32>
      %34 = arith.select %31, %29, %33 : vector<8x64xi1>, vector<8x64xf32>
      %c0_26 = arith.constant 0 : index
      %c0_27 = arith.constant 0 : index
      %c0_28 = arith.constant 0 : index
      %35 = vector.load %arg8[%c0_26, %c0_27, %c0_28] : memref<1x8x64xf32, #tpu.memory_space<vmem>>, vector<1x8x64xf32>
      %36 = vector.shape_cast %35 : vector<1x8x64xf32> to vector<8x64xf32>
      %37 = vector.shape_cast %34 : vector<8x64xf32> to vector<1x8x64xf32>
      tpu.vector_store %arg8[%c0_26, %c0_27, %c0_28], %37 {strides = array<i32>} : memref<1x8x64xf32, #tpu.memory_space<vmem>>, vector<1x8x64xf32>,
    } else {
    }
    return
  }
  func.func @transform_0(%arg0: i32, %arg1: i32, %arg2: i32) -> (i32, i32) {
    %c0_i32 = arith.constant 0 : i32
    %c0_i32_0 = arith.constant 0 : i32
    return %arg1, %c0_i32 : i32, i32
  }
  func.func @transform_1(%arg0: i32, %arg1: i32, %arg2: i32) -> (i32, i32, i32) {
    %c0_i32 = arith.constant 0 : i32
    %c0_i32_0 = arith.constant 0 : i32
    return %arg0, %c0_i32, %arg2 : i32, i32, i32
  }
  func.func @transform_2(%arg0: i32, %arg1: i32, %arg2: i32) -> (i32, i32, i32) {
    %c0_i32 = arith.constant 0 : i32
    %c0_i32_0 = arith.constant 0 : i32
    return %arg0, %c0_i32, %arg2 : i32, i32, i32
  }
  func.func @transform_3(%arg0: i32, %arg1: i32, %arg2: i32) -> (i32, i32, i32) {
    %c0_i32 = arith.constant 0 : i32
    %c0_i32_0 = arith.constant 0 : i32
    return %arg0, %arg2, %c0_i32 : i32, i32, i32
  }
  func.func @transform_4(%arg0: i32, %arg1: i32, %arg2: i32) -> (i32, i32, i32) {
    %c0_i32 = arith.constant 0 : i32
    %c0_i32_0 = arith.constant 0 : i32
    %c0_i32_1 = arith.constant 0 : i32
    return %arg0, %c0_i32, %c0_i32_0 : i32, i32, i32
  }
  func.func @transform_5(%arg0: i32, %arg1: i32, %arg2: i32) -> (i32, i32, i32) {
    %c0_i32 = arith.constant 0 : i32
    %c0_i32_0 = arith.constant 0 : i32
    return %arg0, %arg1, %c0_i32 : i32, i32, i32
  }
}

</mosaic_0001>

<bundles_post_ra>
// kernel: tpu_custom_call.1
= control target key start
LH: loop header
LB: loop body
LE: loop exit
PB: predicated region body
PF: predicated region fallthrough
CT: control target
= control target key end

     0   :  { %s8385_s0 = inlined_call_operand.vmem [shape: f32[8,1496], index: 0, kind: input, shape index: {}]   ;;  %s8386_s1 = inlined_call_operand.hbm [shape: f32[2,1496,3072], index: 1, kind: input, shape index: {}]   ;;  %s8387_s2 = inlined_call_operand.vmem [shape: f32[2,1,3072], index: 2, kind: input, shape index: {}]   ;;  %s8388_s3 = inlined_call_operand.vmem [shape: f32[2,3072,64], index: 3, kind: input, shape index: {}]   ;;  %s8389_s4 = inlined_call_operand.vmem [shape: f32[2,1,64], index: 4, kind: input, shape index: {}]   ;;  %s8390_s5 = inlined_call_operand.hbm [shape: f32[2,8,64], index: 5, kind: output, shape index: {}]  }
   0x1   :  { %8401 = sst [smem:[#allocation19_spill]] %s8386_s1 }
   0x2   :  { %10 = vsyncpa [#allocation4], 0 }
   0x3   :  { %12 = vsyncpa [#allocation4 + $0x1], 0 }
   0x4   :  { %13 = vsyncpa [#allocation5], 0 }
   0x5   :  { %15 = vsyncpa [#allocation5 + $0x1], 0  ;;  %s6389_s18 = smov 0   ;;  %s6391_s19 = smov 0  }
   0x6   :  { %s6393_s20 = smov 0   ;;  %s6395_s21 = smov 0  }
   0x7   :  { %s6397_s22 = smov 0   ;;  %s6399_s23 = smov 0  }
   0x8   :  { %s6401_s24 = smov 0   ;;  %s6403_s25 = smov 0  }
   0x9   :  { %s6405_s26 = smov 0   ;;  %s6407_s27 = smov 0  }
   0xa   :  { %s6409_s28 = smov 0  }
   0xb LB: > { %8402 = sst [smem:[#allocation9_spill]] %s6319_s20  ;;  %s4249_s29 = sadd.s32 4294967295, %s6351_s28   ;;  %s6351_s28 = sphi %s6409_s28, %s21_s28   ;;  %s6347_s27 = sphi %s6407_s27, %s8431_s27   ;;  %s6343_s26 = sphi %s6405_s26, %s8430_s26   ;;  %s6339_s25 = sphi %s6403_s25, %s8429_s25   ;;  %s6335_s24 = sphi %s6401_s24, %s8428_s24   ;;  %s6331_s23 = sphi %s6399_s23, %s8427_s23   ;;  %s6327_s22 = sphi %s6397_s22, %s8426_s22   ;;  %s6323_s21 = sphi %s6395_s21, %s8425_s21   ;;  %s6319_s20 = sphi %s6393_s20, %s8434_s20   ;;  %s6315_s19 = sphi %s6391_s19, %s8433_s19   ;;  %s6311_s18 = sphi %s6389_s18, %s8432_s18  }
   0xc   : > { %8403 = sst [smem:[#allocation10_spill]] %s6327_s22  ;;  %s4250_s30 = sadd.s32 4294967294, %s6351_s28  }
   0xd   : > { %8404 = sst [smem:[#allocation11_spill]] %s6331_s23  ;;  %s33_s6 = sadd.s32 1, %s6343_s26 }
   0xe   : > { %8405 = sst [smem:[#allocation12_spill]] %s6343_s26  ;;  %s40_s7 = sadd.s32 1, %s6347_s27 }
   0xf   : > { %8406 = sst [smem:[#allocation13_spill]] %s6347_s27  ;;  %p34_p0 = scmp.ge.s32.totalorder %s33_s6, 3 }
  0x10   : > { %s75_s8 = sadd.s32 1, %s6331_s23  ;;  %p82_p1 = scmp.ne.s32.totalorder %s6331_s23, %s6327_s22 }
  0x11   : > { %p83_p2 = scmp.eq.s32.totalorder %s6351_s28, 0  ;;  %s8436_s6 = smov (%p34_p0, %s33_s6), 0 }
  0x12   : > { %8407 = sst [smem:[#allocation14_spill]] %s8436_s6  ;;  %s8438_s7 = smov (!%p34_p0, %s40_s7), %s6347_s27 }
  0x13   : > { %s71_s9 = ssub.s32 %s6343_s26, %s8436_s6  ;;  %p6455_p3 = por %p83_p2, %p82_p1 }
  0x14   : > { %p42_p4 = scmp.ge.s32.totalorder %s8438_s7, 2  ;;  %p88_p5 = scmp.ne.s32.totalorder %s6327_s22, %s6323_s21 }
  0x15   : > { %p89_p6 = scmp.eq.s32.totalorder %s4249_s29, 0  ;;  %s185_s11 = sadd.s32 1, %s6319_s20 }
  0x16   : > { %s8440_s7 = smov (%p42_p4, %s8438_s7), 0  ;;  %p195_p8 = scmp.ne.s32.totalorder %s6319_s20, %s6315_s19 }
  0x17   : > { %8409 = sst [smem:[#allocation15_spill]] %s8440_s7  ;;  %p6463_p7 = por %p89_p6, %p88_p5 }
  0x18   : > { %s70_s13 = ssub.s32 %s6347_s27, %s8440_s7  ;;  %p196_p9 = scmp.eq.s32.totalorder %s4249_s29, 5 }
  0x19   : > { %s72_s14 = sor.u32 %s71_s9, %s70_s13  ;;  %p183_p10 = scmp.eq.s32.totalorder %s70_s13, 0 }
  0x1a   : > { %p73_p11 = scmp.eq.s32.totalorder %s72_s14, 0  ;;  %p6471_p12 = por %p196_p9, %p195_p8 }
  0x1b   : > { %s6476_s16 = scalar_select %p183_p10, %s6319_s20, %s185_s11  }
  0x1c   : > { %s8411_s15 = scalar_select %p6471_p12, 1, 0 }
  0x1d   : > { %8412 = sst [smem:[#allocation16_spill]] %s6476_s16  ;;  %p201_p13 = scmp.ne.s32.totalorder %s6315_s19, %s6311_s18 }
  0x1e   : > { %s6479_s17 = scalar_select %p73_p11, %s6331_s23, %s75_s8  }
  0x1f   : > { %p202_p0 = scmp.eq.s32.totalorder %s4250_s30, 5  ;;  %p6093_p1 = scmp.lt.s32.totalorder %s6351_s28, 6 }
  0x20   : > { %8413 = sst [smem:[#allocation17_spill]] %s6479_s17  ;;  %s230_s29 = sand.u32 1, %s6331_s23  }
  0x21   : > { %p6484_p2 = por %p202_p0, %p201_p13  ;;  %s6076_s9 = smul.u32 11968, %s230_s29 }
  0x22   : > { %s4254_s13 = sshll.u32 %s6343_s26, 3  ;;  %s6077_s14 = smul.u32 4488, %s6347_s27 }
  0x23   : > { %s8414_s21 = scalar_select %p6484_p2, 1, 0 }
  0x24   : > { %p6493_p4 = pnand %p6093_p1, %p6455_p3  ;;  %s240_s8 = sadd.s32 %s6077_s14, %s4254_s13 }
  0x25   : > { %8415 = sst [smem:[#allocation18_spill]] %s8414_s21  ;;  %s234_s11 = scalar_lea.vmem [#allocation3], %s6076_s9 }
  0x26   : > { %s243_s6 = sshll.u32 %s234_s11, 4  ;;  %s4255_s30 = sshll.u32 %s240_s8, 7  ;;  %s6497_s6 = int_to_ptr.vmem [resolvable:$true] %s243_s6 }
  0x27   : > { %s8417_s1 = sld [smem:[#allocation19_spill]]  ;;  %s6505_s10 = scalar_lea.sflag [#allocation4], %s230_s29 }
  0x28   : > { %p6201_p6 = pneg %p6493_p4 }
  0x2d   : > { %s6502_s23 = scalar_lea.hbm %s8417_s1, %s4255_s30  ;;  %s6204_s16 = scalar_lea.hbm %s8417_s1, 1148928 }
  0x2e   : > { %s6199_s27 = scalar_lea.hbm %s6502_s23, 191488  ;;  %p6205_p10 = scmp.lt.u32.totalorder %s6502_s23, %s8417_s1 }
  0x2f   : > { %p6200_p5 = scmp.ne.s32.totalorder %s6502_s23, %s6199_s27  ;;  %p6206_p11 = scmp.lt.u32.totalorder %s6204_s16, %s6199_s27 }
  0x30   : > { %p6208_p0 = scmp.lt.u32.totalorder %s6199_s27, %s6502_s23 }
  0x31   : > { %p6202_p8 = pnand %p6201_p6, %p6200_p5  ;;  %p6207_p13 = por %p6206_p11, %p6205_p10 }
  0x33   : > { %p6203_p9 = pneg %p6202_p8  ;;  %p6209_p1 = por %p6208_p0, %p6207_p13 }
  0x35   : > { %p6210_p3 = pnand %p6209_p1, %p6203_p9 }
  0x37   : > { %6213 = shalt.err (!%p6210_p3)
}
  0x38   : > { %s6214_s29 = scalar_lea.vmem %s6497_s6, 191488  ;;  %s6353_s8 = smov [#allocation3]  }
  0x39   : > { %p6215_p5 = scmp.ne.s32.totalorder %s6497_s6, %s6214_s29  ;;  %s6219_s11 = sshll.u32 %s6353_s8, 4  ;;  %s6220_s11 = int_to_ptr.vmem [resolvable:$false] %s6219_s11 }
  0x3a   : > { %s6221_s30 = scalar_lea.vmem %s6220_s11, 382976  ;;  %p6222_p12 = scmp.lt.s32.totalorder %s6497_s6, %s6220_s11 }
  0x3b   : > { %p6217_p8 = pnand %p6215_p5, %p6201_p6  ;;  %p6223_p10 = scmp.lt.s32.totalorder %s6221_s30, %s6214_s29 }
  0x3d   : > { %p6218_p2 = pneg %p6217_p8  ;;  %p6224_p11 = por %p6223_p10, %p6222_p12 }
  0x3f   : > { %p6225_p13 = pnand %p6224_p11, %p6218_p2 }
  0x41   : > { %6228 = shalt.err (!%p6225_p13)
}
  0x42   : > { %s6354_s27 = smov 3072   ;;  %s6355_s9 = smov 1024  }
  0x43   : > { %s6356_s13 = smov 64   ;;  %p282_p3 = scmp.lt.s32.totalorder %s6351_s28, 7 }
  0x44   : > { %6088 = dma.hbm_to_vmem [thread:$0]  (!%p6493_p4), %s6502_s23, 191488, %s6497_s6, %s6505_s10, %s6354_s27, %s6355_s9, %s6356_s13  }
  0x45   : > { %p8418_p6 = scmp.ge.s32.totalorder %s6351_s28, 1 }
  0x47   : > { %p283_p9 = pnand %p8418_p6, %p282_p3 }
  0x48   : > { %s288_s16 = sand.u32 (!%p283_p9), 1, %s6327_s22  }
  0x49   : > { %286 = sbr.rel (%p283_p9) target bundleno = 1332 (0x534), region = 40  ;;  %s289_s14 = scalar_lea.sflag (!%p283_p9), [#allocation4], %s288_s16 }
  0x4a   : > { %s6078_s17 = smul.u32 (!%p283_p9), 11968, %s288_s16 }
  0x4c   : > { %s6537_s29 = scalar_lea.vmem (!%p283_p9), [#allocation3], %s6078_s17 }
  0x50   : > { %6302 = dma.done.wait (%p6463_p7), %s289_s14, 191488  }
  0x51   : > { %6304 = vsyncadd (%p6463_p7), %s289_s14, 4294775808  ;;  %s8396_s23 = sand.u32 1, %s6315_s19   ;;  %s4258_s6 = sshll.u32 %s6335_s24, 3 }
  0x52   : > { %s6547_s7 = sshll.u32 %s8396_s23, 3  ;;  %p351_p12 = scmp.lt.s32.totalorder %s6339_s25, 1 }
  0x53   : > { %p353_p2 = scmp.lt.s32.totalorder %s4258_s6, 23  ;;  %s4259_s8 = sshll.u32 %s6335_s24, 7 }
  0x54   : > { %s6551_s10 = scalar_select %p351_p12, %s6339_s25, 1 }
  0x55   : > { %s8442_s6 = smov (!%p353_p2, %s4258_s6), 23  ;;  %p362_p7 = scmp.lt.s32.totalorder %s4259_s8, 383 }
  0x56   : > { %s6079_s12 = smul.u32 24, %s6551_s10  ;;  %s371_s13 = scalar_lea.vmem %s8389_s4, %s6551_s10 }
  0x57   : > { %s6080_s11 = smul.u32 384, %s6551_s10  ;;  %s8444_s8 = smov (!%p362_p7, %s4259_s8), 383 }
  0x58   : > { %s6556_s30 = sadd.s32 %s6079_s12, %s8442_s6  ;;  %s343_s21 = scalar_lea.vmem [#allocation6], %s6547_s7 }
  0x59   : > { %s357_s14 = scalar_lea.vmem %s8387_s2, %s6556_s30  ;;  %s365_s23 = sadd.s32 %s6080_s11, %s8444_s8 }
  0x5a   : > { %s4260_s1 = sshll.u32 %s365_s23, 3  ;;  %p4261_p4 = scmp.ne.s32.totalorder %s6335_s24, 0 }
  0x5b   : > { %s6569_s20 = scalar_lea.vmem %s8388_s3, %s4260_s1  ;;  %vm376_vm0 = vcmask (!%p4261_p4), 523264   ;;  %v6357_v0 = vmov (!%p4261_p4), 0.0  }
  0x5c   : > { %375 = sbr.rel (%p4261_p4) target bundleno = 99 (0x63), region = 48  ;;  %377 = vst.msk [vmem:[#allocation2] sm:$0xff] (!%p4261_p4), %vm376_vm0, %v6357_v0 }
  0x63 PF: > { %v391_v1 = vld [vmem:[%s6537_s29 + $0x8] sm:$0xff]  ;;  %v393_v3 = vld [vmem:[%s6537_s29 + $0x18] sm:$0xff]  ;;  %v390_v6 = vld [vmem:[%s6537_s29] sm:$0xff]  ;;  %vm1928_vm1 = vcmask 719872   ;;  %vm4070_vm10 = vcmask 523264   ;;  %p4266_p0 = scmp.ne.s32.totalorder %s6335_s24, 2 }
  0x64   : > { %v399_v2 = vld [vmem:[%s6537_s29 + $0x48] sm:$0xff]  ;;  %v401_v5 = vld [vmem:[%s6537_s29 + $0x58] sm:$0xff]  ;;  %v398_v7 = vld [vmem:[%s6537_s29 + $0x40] sm:$0xff] }
  0x65   : > { %v4412_v4 = vpack.c.bf16 %v399_v2, %v391_v1  ;;  %v4784_v8 = vpack.c.bf16 %v401_v5, %v393_v3  ;;  %v4414_v9 = vpack.c.bf16 %v398_v7, %v390_v6  ;;  %v392_v10 = vld [vmem:[%s6537_s29 + $0x10] sm:$0xff]  ;;  %v407_v12 = vld [vmem:[%s6537_s29 + $0x88] sm:$0xff]  ;;  %v409_v15 = vld [vmem:[%s6537_s29 + $0x98] sm:$0xff] }
  0x66   : > { %v400_v11 = vld [vmem:[%s6537_s29 + $0x50] sm:$0xff]  ;;  %v415_v14 = vld [vmem:[%s6537_s29 + $0xc8] sm:$0xff]  ;;  %v417_v16 = vld [vmem:[%s6537_s29 + $0xd8] sm:$0xff] }
  0x67   : > { %4413 = vmatprep.subr.bf16.mxu0 %v4412_v4  ;;  %v4786_v13 = vpack.c.bf16 %v400_v11, %v392_v10  ;;  %4785 = vmatprep.subr.bf16.mxu1 %v4784_v8  ;;  %v4416_v17 = vpack.c.bf16 %v415_v14, %v407_v12  ;;  %v4788_v18 = vpack.c.bf16 %v417_v16, %v409_v15  ;;  %v406_v19 = vld [vmem:[%s6537_s29 + $0x80] sm:$0xff]  ;;  %v408_v21 = vld [vmem:[%s6537_s29 + $0x90] sm:$0xff]  ;;  %v423_v24 = vld [vmem:[%s6537_s29 + $0x108] sm:$0xff] }
  0x68   : > { %4415 = vmatpush1.bf16.msra.mxu0 %v4414_v9  ;;  %v414_v20 = vld [vmem:[%s6537_s29 + $0xc0] sm:$0xff]  ;;  %v416_v23 = vld [vmem:[%s6537_s29 + $0xd0] sm:$0xff]  ;;  %v431_v25 = vld [vmem:[%s6537_s29 + $0x148] sm:$0xff] }
  0x69   : > { %4787 = vmatpush1.bf16.msra.mxu1 %v4786_v13  ;;  %v4418_v22 = vpack.c.bf16 %v414_v20, %v406_v19  ;;  %4417 = vmatprep.subr.bf16.mxu0 %v4416_v17  ;;  %v4790_v26 = vpack.c.bf16 %v416_v23, %v408_v21  ;;  %v4420_v27 = vpack.c.bf16 %v431_v25, %v423_v24  ;;  %v425_v28 = vld [vmem:[%s6537_s29 + $0x118] sm:$0xff]  ;;  %v422_v30 = vld [vmem:[%s6537_s29 + $0x100] sm:$0xff]  ;;  %v424_v33 = vld [vmem:[%s6537_s29 + $0x110] sm:$0xff] }
  0x6a   : > { %4789 = vmatprep.subr.bf16.mxu1 %v4788_v18  ;;  %v433_v29 = vld [vmem:[%s6537_s29 + $0x158] sm:$0xff]  ;;  %v430_v32 = vld [vmem:[%s6537_s29 + $0x140] sm:$0xff]  ;;  %v432_v34 = vld [vmem:[%s6537_s29 + $0x150] sm:$0xff] }
  0x6b   : > { %v4792_v31 = vpack.c.bf16 %v433_v29, %v425_v28  ;;  %v4422_v35 = vpack.c.bf16 %v430_v32, %v422_v30  ;;  %v439_v36 = vld [vmem:[%s6537_s29 + $0x188] sm:$0xff]  ;;  %v441_v38 = vld [vmem:[%s6537_s29 + $0x198] sm:$0xff]  ;;  %v4794_v39 = vpack.c.bf16 %v432_v34, %v424_v33  ;;  %v438_v42 = vld [vmem:[%s6537_s29 + $0x180] sm:$0xff] }
  0x6c   : > { %4419 = vmatpush1.bf16.msra.mxu0 %v4418_v22  ;;  %v447_v37 = vld [vmem:[%s6537_s29 + $0x1c8] sm:$0xff]  ;;  %v449_v41 = vld [vmem:[%s6537_s29 + $0x1d8] sm:$0xff]  ;;  %v446_v43 = vld [vmem:[%s6537_s29 + $0x1c0] sm:$0xff] }
  0x6d   : > { %4791 = vmatpush1.bf16.msra.mxu1 %v4790_v26  ;;  %4421 = vmatprep.subr.bf16.mxu0 %v4420_v27  ;;  %v4424_v40 = vpack.c.bf16 %v447_v37, %v439_v36  ;;  %v4796_v44 = vpack.c.bf16 %v449_v41, %v441_v38  ;;  %v440_v45 = vld [vmem:[%s6537_s29 + $0x190] sm:$0xff]  ;;  %v455_v47 = vld [vmem:[%s6537_s29 + $0x208] sm:$0xff]  ;;  %v457_v49 = vld [vmem:[%s6537_s29 + $0x218] sm:$0xff]  ;;  %v4426_v51 = vpack.c.bf16 %v446_v43, %v438_v42 }
  0x6e   : > { %4793 = vmatprep.subr.bf16.mxu1 %v4792_v31  ;;  %v448_v46 = vld [vmem:[%s6537_s29 + $0x1d0] sm:$0xff]  ;;  %v463_v48 = vld [vmem:[%s6537_s29 + $0x248] sm:$0xff]  ;;  %v465_v50 = vld [vmem:[%s6537_s29 + $0x258] sm:$0xff] }
  0x6f   : > { %v4798_v52 = vpack.c.bf16 %v448_v46, %v440_v45  ;;  %v4428_v53 = vpack.c.bf16 %v463_v48, %v455_v47  ;;  %v454_v54 = vld [vmem:[%s6537_s29 + $0x200] sm:$0xff]  ;;  %v456_v56 = vld [vmem:[%s6537_s29 + $0x210] sm:$0xff]  ;;  %v4800_v57 = vpack.c.bf16 %v465_v50, %v457_v49  ;;  %v471_v59 = vld [vmem:[%s6537_s29 + $0x288] sm:$0xff] }
  0x70   : > { %4423 = vmatpush1.bf16.msra.mxu0 %v4422_v35  ;;  %v462_v55 = vld [vmem:[%s6537_s29 + $0x240] sm:$0xff]  ;;  %v464_v58 = vld [vmem:[%s6537_s29 + $0x250] sm:$0xff]  ;;  %v479_v60 = vld [vmem:[%s6537_s29 + $0x2c8] sm:$0xff] }
  0x71   : > { %4795 = vmatpush1.bf16.msra.mxu1 %v4794_v39  ;;  %4425 = vmatprep.subr.bf16.mxu0 %v4424_v40  ;;  %v473_v61 = vld [vmem:[%s6537_s29 + $0x298] sm:$0xff]  ;;  %v4430_v63 = vpack.c.bf16 %v462_v55, %v454_v54  ;;  %v4802_v0 = vpack.c.bf16 %v464_v58, %v456_v56  ;;  %v4432_v1 = vpack.c.bf16 %v479_v60, %v471_v59  ;;  %v470_v2 = vld [vmem:[%s6537_s29 + $0x280] sm:$0xff]  ;;  %v472_v4 = vld [vmem:[%s6537_s29 + $0x290] sm:$0xff] }
  0x72   : > { %4797 = vmatprep.subr.bf16.mxu1 %v4796_v44  ;;  %v481_v62 = vld [vmem:[%s6537_s29 + $0x2d8] sm:$0xff]  ;;  %v478_v3 = vld [vmem:[%s6537_s29 + $0x2c0] sm:$0xff]  ;;  %v480_v6 = vld [vmem:[%s6537_s29 + $0x2d0] sm:$0xff] }
  0x73   : > { %v4804_v5 = vpack.c.bf16 %v481_v62, %v473_v61  ;;  %v487_v7 = vld [vmem:[%s6537_s29 + $0x308] sm:$0xff]  ;;  %v489_v9 = vld [vmem:[%s6537_s29 + $0x318] sm:$0xff]  ;;  %v4434_v11 = vpack.c.bf16 %v478_v3, %v470_v2  ;;  %v4806_v12 = vpack.c.bf16 %v480_v6, %v472_v4  ;;  %v486_v14 = vld [vmem:[%s6537_s29 + $0x300] sm:$0xff] }
  0x74   : > { %4427 = vmatpush1.bf16.msra.mxu0 %v4426_v51  ;;  %v495_v8 = vld [vmem:[%s6537_s29 + $0x348] sm:$0xff]  ;;  %v497_v10 = vld [vmem:[%s6537_s29 + $0x358] sm:$0xff]  ;;  %v494_v15 = vld [vmem:[%s6537_s29 + $0x340] sm:$0xff] }
  0x75   : > { %4799 = vmatpush1.bf16.msra.mxu1 %v4798_v52  ;;  %4429 = vmatprep.subr.bf16.mxu0 %v4428_v53  ;;  %v4436_v13 = vpack.c.bf16 %v495_v8, %v487_v7  ;;  %v488_v16 = vld [vmem:[%s6537_s29 + $0x310] sm:$0xff]  ;;  %v4808_v17 = vpack.c.bf16 %v497_v10, %v489_v9  ;;  %v503_v19 = vld [vmem:[%s6537_s29 + $0x388] sm:$0xff]  ;;  %v505_v21 = vld [vmem:[%s6537_s29 + $0x398] sm:$0xff]  ;;  %v4438_v23 = vpack.c.bf16 %v494_v15, %v486_v14 }
  0x76   : > { %4801 = vmatprep.subr.bf16.mxu1 %v4800_v57  ;;  %v496_v18 = vld [vmem:[%s6537_s29 + $0x350] sm:$0xff]  ;;  %v511_v20 = vld [vmem:[%s6537_s29 + $0x3c8] sm:$0xff]  ;;  %v513_v22 = vld [vmem:[%s6537_s29 + $0x3d8] sm:$0xff] }
  0x77   : > { %v4810_v24 = vpack.c.bf16 %v496_v18, %v488_v16  ;;  %v4440_v25 = vpack.c.bf16 %v511_v20, %v503_v19  ;;  %v502_v26 = vld [vmem:[%s6537_s29 + $0x380] sm:$0xff]  ;;  %v504_v28 = vld [vmem:[%s6537_s29 + $0x390] sm:$0xff]  ;;  %v4812_v29 = vpack.c.bf16 %v513_v22, %v505_v21  ;;  %v519_v31 = vld [vmem:[%s6537_s29 + $0x408] sm:$0xff] }
  0x78   : > { %4431 = vmatpush1.bf16.msra.mxu0 %v4430_v63  ;;  %v510_v27 = vld [vmem:[%s6537_s29 + $0x3c0] sm:$0xff]  ;;  %v512_v30 = vld [vmem:[%s6537_s29 + $0x3d0] sm:$0xff]  ;;  %v527_v32 = vld [vmem:[%s6537_s29 + $0x448] sm:$0xff] }
  0x79   : > { %4803 = vmatpush1.bf16.msra.mxu1 %v4802_v0  ;;  %4433 = vmatprep.subr.bf16.mxu0 %v4432_v1  ;;  %v521_v33 = vld [vmem:[%s6537_s29 + $0x418] sm:$0xff]  ;;  %v4442_v35 = vpack.c.bf16 %v510_v27, %v502_v26  ;;  %v4814_v36 = vpack.c.bf16 %v512_v30, %v504_v28  ;;  %v4444_v37 = vpack.c.bf16 %v527_v32, %v519_v31  ;;  %v518_v38 = vld [vmem:[%s6537_s29 + $0x400] sm:$0xff]  ;;  %v520_v40 = vld [vmem:[%s6537_s29 + $0x410] sm:$0xff] }
  0x7a   : > { %4805 = vmatprep.subr.bf16.mxu1 %v4804_v5  ;;  %v529_v34 = vld [vmem:[%s6537_s29 + $0x458] sm:$0xff]  ;;  %v526_v39 = vld [vmem:[%s6537_s29 + $0x440] sm:$0xff]  ;;  %v528_v42 = vld [vmem:[%s6537_s29 + $0x450] sm:$0xff] }
  0x7b   : > { %v4816_v41 = vpack.c.bf16 %v529_v34, %v521_v33  ;;  %v535_v43 = vld [vmem:[%s6537_s29 + $0x488] sm:$0xff]  ;;  %v537_v45 = vld [vmem:[%s6537_s29 + $0x498] sm:$0xff]  ;;  %v4446_v47 = vpack.c.bf16 %v526_v39, %v518_v38  ;;  %v4818_v48 = vpack.c.bf16 %v528_v42, %v520_v40  ;;  %v534_v50 = vld [vmem:[%s6537_s29 + $0x480] sm:$0xff] }
  0x7c   : > { %4435 = vmatpush1.bf16.msra.mxu0 %v4434_v11  ;;  %v543_v44 = vld [vmem:[%s6537_s29 + $0x4c8] sm:$0xff]  ;;  %v545_v46 = vld [vmem:[%s6537_s29 + $0x4d8] sm:$0xff]  ;;  %v542_v51 = vld [vmem:[%s6537_s29 + $0x4c0] sm:$0xff] }
  0x7d   : > { %4807 = vmatpush1.bf16.msra.mxu1 %v4806_v12  ;;  %4437 = vmatprep.subr.bf16.mxu0 %v4436_v13  ;;  %v4448_v49 = vpack.c.bf16 %v543_v44, %v535_v43  ;;  %v536_v52 = vld [vmem:[%s6537_s29 + $0x490] sm:$0xff]  ;;  %v4820_v53 = vpack.c.bf16 %v545_v46, %v537_v45  ;;  %v551_v55 = vld [vmem:[%s6537_s29 + $0x508] sm:$0xff]  ;;  %v553_v57 = vld [vmem:[%s6537_s29 + $0x518] sm:$0xff]  ;;  %v4450_v59 = vpack.c.bf16 %v542_v51, %v534_v50 }
  0x7e   : > { %4809 = vmatprep.subr.bf16.mxu1 %v4808_v17  ;;  %v544_v54 = vld [vmem:[%s6537_s29 + $0x4d0] sm:$0xff]  ;;  %v559_v56 = vld [vmem:[%s6537_s29 + $0x548] sm:$0xff]  ;;  %v561_v58 = vld [vmem:[%s6537_s29 + $0x558] sm:$0xff] }
  0x7f   : > { %v4822_v60 = vpack.c.bf16 %v544_v54, %v536_v52  ;;  %v4452_v61 = vpack.c.bf16 %v559_v56, %v551_v55  ;;  %v550_v62 = vld [vmem:[%s6537_s29 + $0x500] sm:$0xff]  ;;  %v552_v0 = vld [vmem:[%s6537_s29 + $0x510] sm:$0xff]  ;;  %v4824_v1 = vpack.c.bf16 %v561_v58, %v553_v57  ;;  %v567_v3 = vld [vmem:[%s6537_s29 + $0x588] sm:$0xff] }
  0x80   : > { %4439 = vmatpush1.bf16.msra.mxu0 %v4438_v23  ;;  %v558_v63 = vld [vmem:[%s6537_s29 + $0x540] sm:$0xff]  ;;  %v560_v2 = vld [vmem:[%s6537_s29 + $0x550] sm:$0xff]  ;;  %v575_v4 = vld [vmem:[%s6537_s29 + $0x5c8] sm:$0xff] }
  0x81   : > { %4811 = vmatpush1.bf16.msra.mxu1 %v4810_v24  ;;  %4441 = vmatprep.subr.bf16.mxu0 %v4440_v25  ;;  %v569_v5 = vld [vmem:[%s6537_s29 + $0x598] sm:$0xff]  ;;  %v4454_v7 = vpack.c.bf16 %v558_v63, %v550_v62  ;;  %v566_v8 = vld [vmem:[%s6537_s29 + $0x580] sm:$0xff]  ;;  %v4826_v9 = vpack.c.bf16 %v560_v2, %v552_v0  ;;  %v4456_v10 = vpack.c.bf16 %v575_v4, %v567_v3  ;;  %v568_v12 = vld [vmem:[%s6537_s29 + $0x590] sm:$0xff] }
  0x82   : > { %4813 = vmatprep.subr.bf16.mxu1 %v4812_v29  ;;  %v577_v6 = vld [vmem:[%s6537_s29 + $0x5d8] sm:$0xff]  ;;  %v574_v11 = vld [vmem:[%s6537_s29 + $0x5c0] sm:$0xff]  ;;  %v576_v13 = vld [vmem:[%s6537_s29 + $0x5d0] sm:$0xff] }
  0x83   : > { %v4828_v14 = vpack.c.bf16 %v577_v6, %v569_v5  ;;  %v583_v15 = vld [vmem:[%s6537_s29 + $0x608] sm:$0xff]  ;;  %v379_v17 = vld [vmem:[%s8385_s0 + $0x8] sm:$0xff]  ;;  %v585_v18 = vld [vmem:[%s6537_s29 + $0x618] sm:$0xff]  ;;  %v4458_v20 = vpack.c.bf16 %v574_v11, %v566_v8  ;;  %v4830_v21 = vpack.c.bf16 %v576_v13, %v568_v12 }
  0x84   : > { %4443 = vmatpush1.bf16.msra.mxu0 %v4442_v35  ;;  %v591_v16 = vld [vmem:[%s6537_s29 + $0x648] sm:$0xff]  ;;  %v593_v19 = vld [vmem:[%s6537_s29 + $0x658] sm:$0xff]  ;;  %1996 = vmatprep.mubr.f32.mxu0 %v379_v17  ;;  %v582_v23 = vld [vmem:[%s6537_s29 + $0x600] sm:$0xff] }
  0x85   : > { %4815 = vmatpush1.bf16.msra.mxu1 %v4814_v36  ;;  %4445 = vmatprep.subr.bf16.mxu0 %v4444_v37  ;;  %v4460_v22 = vpack.c.bf16 %v591_v16, %v583_v15  ;;  %v590_v24 = vld [vmem:[%s6537_s29 + $0x640] sm:$0xff]  ;;  %v584_v25 = vld [vmem:[%s6537_s29 + $0x610] sm:$0xff]  ;;  %v4832_v26 = vpack.c.bf16 %v593_v19, %v585_v18  ;;  %v599_v28 = vld [vmem:[%s6537_s29 + $0x688] sm:$0xff] }
  0x86   : > { %4817 = vmatprep.subr.bf16.mxu1 %v4816_v41  ;;  %2422 = vmatprep.mubr.f32.mxu1 %v379_v17  ;;  %v592_v27 = vld [vmem:[%s6537_s29 + $0x650] sm:$0xff]  ;;  %v607_v29 = vld [vmem:[%s6537_s29 + $0x6c8] sm:$0xff]  ;;  %v601_v30 = vld [vmem:[%s6537_s29 + $0x698] sm:$0xff]  ;;  %v4462_v32 = vpack.c.bf16 %v590_v24, %v582_v23 }
  0x87   : > { %v609_v31 = vld [vmem:[%s6537_s29 + $0x6d8] sm:$0xff]  ;;  %v4834_v33 = vpack.c.bf16 %v592_v27, %v584_v25  ;;  %v4464_v34 = vpack.c.bf16 %v607_v29, %v599_v28  ;;  %v598_v35 = vld [vmem:[%s6537_s29 + $0x680] sm:$0xff]  ;;  %v600_v37 = vld [vmem:[%s6537_s29 + $0x690] sm:$0xff] }
  0x88   : > { %4447 = vmatpush1.bf16.msra.mxu0 %v4446_v47  ;;  %v606_v36 = vld [vmem:[%s6537_s29 + $0x6c0] sm:$0xff]  ;;  %v4836_v38 = vpack.c.bf16 %v609_v31, %v601_v30  ;;  %v608_v39 = vld [vmem:[%s6537_s29 + $0x6d0] sm:$0xff]  ;;  %v615_v40 = vld [vmem:[%s6537_s29 + $0x708] sm:$0xff] }
  0x89   : > { %4819 = vmatpush1.bf16.msra.mxu1 %v4818_v48  ;;  %4449 = vmatprep.subr.bf16.mxu0 %v4448_v49  ;;  %v623_v41 = vld [vmem:[%s6537_s29 + $0x748] sm:$0xff]  ;;  %v617_v42 = vld [vmem:[%s6537_s29 + $0x718] sm:$0xff]  ;;  %v4466_v44 = vpack.c.bf16 %v606_v36, %v598_v35  ;;  %v4838_v45 = vpack.c.bf16 %v608_v39, %v600_v37  ;;  %v614_v47 = vld [vmem:[%s6537_s29 + $0x700] sm:$0xff] }
  0x8a   : > { %4821 = vmatprep.subr.bf16.mxu1 %v4820_v53  ;;  %v625_v43 = vld [vmem:[%s6537_s29 + $0x758] sm:$0xff]  ;;  %v4468_v46 = vpack.c.bf16 %v623_v41, %v615_v40  ;;  %v622_v48 = vld [vmem:[%s6537_s29 + $0x740] sm:$0xff]  ;;  %v616_v49 = vld [vmem:[%s6537_s29 + $0x710] sm:$0xff] }
  0x8b   : > { %v4840_v50 = vpack.c.bf16 %v625_v43, %v617_v42  ;;  %v624_v51 = vld [vmem:[%s6537_s29 + $0x750] sm:$0xff]  ;;  %v631_v52 = vld [vmem:[%s6537_s29 + $0x788] sm:$0xff]  ;;  %v633_v54 = vld [vmem:[%s6537_s29 + $0x798] sm:$0xff]  ;;  %v4470_v56 = vpack.c.bf16 %v622_v48, %v614_v47 }
  0x8c   : > { %4451 = vmatpush1.bf16.msra.mxu0 %v4450_v59  ;;  %v639_v53 = vld [vmem:[%s6537_s29 + $0x7c8] sm:$0xff]  ;;  %v641_v55 = vld [vmem:[%s6537_s29 + $0x7d8] sm:$0xff]  ;;  %v4842_v57 = vpack.c.bf16 %v624_v51, %v616_v49  ;;  %v630_v59 = vld [vmem:[%s6537_s29 + $0x780] sm:$0xff] }
  0x8d   : > { %4823 = vmatpush1.bf16.msra.mxu1 %v4822_v60  ;;  %4453 = vmatprep.subr.bf16.mxu0 %v4452_v61  ;;  %v4472_v58 = vpack.c.bf16 %v639_v53, %v631_v52  ;;  %v638_v60 = vld [vmem:[%s6537_s29 + $0x7c0] sm:$0xff]  ;;  %v632_v61 = vld [vmem:[%s6537_s29 + $0x790] sm:$0xff]  ;;  %v4844_v62 = vpack.c.bf16 %v641_v55, %v633_v54  ;;  %v647_v0 = vld [vmem:[%s6537_s29 + $0x808] sm:$0xff] }
  0x8e   : > { %4825 = vmatprep.subr.bf16.mxu1 %v4824_v1  ;;  %v640_v63 = vld [vmem:[%s6537_s29 + $0x7d0] sm:$0xff]  ;;  %v655_v1 = vld [vmem:[%s6537_s29 + $0x848] sm:$0xff]  ;;  %v649_v2 = vld [vmem:[%s6537_s29 + $0x818] sm:$0xff]  ;;  %v4474_v4 = vpack.c.bf16 %v638_v60, %v630_v59 }
  0x8f   : > { %v657_v3 = vld [vmem:[%s6537_s29 + $0x858] sm:$0xff]  ;;  %v4846_v5 = vpack.c.bf16 %v640_v63, %v632_v61  ;;  %v4476_v6 = vpack.c.bf16 %v655_v1, %v647_v0  ;;  %v654_v8 = vld [vmem:[%s6537_s29 + $0x840] sm:$0xff]  ;;  %v656_v11 = vld [vmem:[%s6537_s29 + $0x850] sm:$0xff] }
  0x90   : > { %4455 = vmatpush1.bf16.msra.mxu0 %v4454_v7  ;;  %v646_v7 = vld [vmem:[%s6537_s29 + $0x800] sm:$0xff]  ;;  %v663_v12 = vld [vmem:[%s6537_s29 + $0x888] sm:$0xff]  ;;  %v673_v15 = vld [vmem:[%s6537_s29 + $0x8d8] sm:$0xff] }
  0x91   : > { %4827 = vmatpush1.bf16.msra.mxu1 %v4826_v9  ;;  %4457 = vmatprep.subr.bf16.mxu0 %v4456_v10  ;;  %v648_v9 = vld [vmem:[%s6537_s29 + $0x810] sm:$0xff]  ;;  %v4848_v10 = vpack.c.bf16 %v657_v3, %v649_v2  ;;  %v671_v13 = vld [vmem:[%s6537_s29 + $0x8c8] sm:$0xff]  ;;  %v378_v16 = vld [vmem:[%s8385_s0] sm:$0xff]  ;;  %v4478_v17 = vpack.c.bf16 %v654_v8, %v646_v7 }
  0x92   : > { %4829 = vmatprep.subr.bf16.mxu1 %v4828_v14  ;;  %v665_v14 = vld [vmem:[%s6537_s29 + $0x898] sm:$0xff]  ;;  %v4850_v18 = vpack.c.bf16 %v656_v11, %v648_v9  ;;  %v4480_v19 = vpack.c.bf16 %v671_v13, %v663_v12  ;;  %v672_v24 = vld [vmem:[%s6537_s29 + $0x8d0] sm:$0xff]  ;;  %v679_v25 = vld [vmem:[%s6537_s29 + $0x908] sm:$0xff] }
  0x93   : > { %v4852_v23 = vpack.c.bf16 %v673_v15, %v665_v14  ;;  %v681_v27 = vld [vmem:[%s6537_s29 + $0x918] sm:$0xff]  ;;  %v688_v36 = vld [vmem:[%s6537_s29 + $0x950] sm:$0xff]  ;;  %v695_v37 = vld [vmem:[%s6537_s29 + $0x988] sm:$0xff] }
  0x94   : > { %4459 = vmatpush1.bf16.msra.mxu0 %v4458_v20  ;;  %v662_v20 = vld [vmem:[%s6537_s29 + $0x880] sm:$0xff]  ;;  %v689_v28 = vld [vmem:[%s6537_s29 + $0x958] sm:$0xff]  ;;  %v704_v48 = vld [vmem:[%s6537_s29 + $0x9d0] sm:$0xff] }
  0x95   : > { %4831 = vmatpush1.bf16.msra.mxu1 %v4830_v21  ;;  %4461 = vmatprep.subr.bf16.mxu0 %v4460_v22  ;;  %v670_v21 = vld [vmem:[%s6537_s29 + $0x8c0] sm:$0xff]  ;;  %v664_v22 = vld [vmem:[%s6537_s29 + $0x890] sm:$0xff]  ;;  %v4856_v35 = vpack.c.bf16 %v689_v28, %v681_v27  ;;  %v697_v39 = vld [vmem:[%s6537_s29 + $0x998] sm:$0xff] }
  0x96   : > { %4833 = vmatprep.subr.bf16.mxu1 %v4832_v26  ;;  %v687_v26 = vld [vmem:[%s6537_s29 + $0x948] sm:$0xff]  ;;  %v4482_v29 = vpack.c.bf16 %v670_v21, %v662_v20  ;;  %v4854_v30 = vpack.c.bf16 %v672_v24, %v664_v22  ;;  %v705_v40 = vld [vmem:[%s6537_s29 + $0x9d8] sm:$0xff]  ;;  %v720_v60 = vld [vmem:[%s6537_s29 + $0xa50] sm:$0xff] }
  0x97   : > { %v4484_v31 = vpack.c.bf16 %v687_v26, %v679_v25  ;;  %v4860_v47 = vpack.c.bf16 %v705_v40, %v697_v39  ;;  %v711_v49 = vld [vmem:[%s6537_s29 + $0xa08] sm:$0xff]  ;;  %v713_v51 = vld [vmem:[%s6537_s29 + $0xa18] sm:$0xff]  ;;  %v736_v8 = vld [vmem:[%s6537_s29 + $0xad0] sm:$0xff] }
  0x98   : > { %4463 = vmatpush1.bf16.msra.mxu0 %v4462_v32  ;;  %v678_v32 = vld [vmem:[%s6537_s29 + $0x900] sm:$0xff]  ;;  %v721_v52 = vld [vmem:[%s6537_s29 + $0xa58] sm:$0xff]  ;;  %v727_v61 = vld [vmem:[%s6537_s29 + $0xa88] sm:$0xff] }
  0x99   : > { %4835 = vmatpush1.bf16.msra.mxu1 %v4834_v33  ;;  %4465 = vmatprep.subr.bf16.mxu0 %v4464_v34  ;;  %v686_v33 = vld [vmem:[%s6537_s29 + $0x940] sm:$0xff]  ;;  %v680_v34 = vld [vmem:[%s6537_s29 + $0x910] sm:$0xff]  ;;  %v4864_v59 = vpack.c.bf16 %v721_v52, %v713_v51  ;;  %v729_v63 = vld [vmem:[%s6537_s29 + $0xa98] sm:$0xff] }
  0x9a   : > { %4837 = vmatprep.subr.bf16.mxu1 %v4836_v38  ;;  %v703_v38 = vld [vmem:[%s6537_s29 + $0x9c8] sm:$0xff]  ;;  %v4486_v41 = vpack.c.bf16 %v686_v33, %v678_v32  ;;  %v4858_v42 = vpack.c.bf16 %v688_v36, %v680_v34  ;;  %v737_v0 = vld [vmem:[%s6537_s29 + $0xad8] sm:$0xff]  ;;  %v742_v14 = vld [vmem:[%s6537_s29 + $0xb00] sm:$0xff] }
  0x9b   : > { %v4488_v43 = vpack.c.bf16 %v703_v38, %v695_v37  ;;  %v4868_v7 = vpack.c.bf16 %v737_v0, %v729_v63  ;;  %v743_v9 = vld [vmem:[%s6537_s29 + $0xb08] sm:$0xff]  ;;  %v745_v11 = vld [vmem:[%s6537_s29 + $0xb18] sm:$0xff]  ;;  %v768_v33 = vld [vmem:[%s6537_s29 + $0xbd0] sm:$0xff] }
  0x9c   : > { %4467 = vmatpush1.bf16.msra.mxu0 %v4466_v44  ;;  %v694_v44 = vld [vmem:[%s6537_s29 + $0x980] sm:$0xff]  ;;  %v753_v12 = vld [vmem:[%s6537_s29 + $0xb58] sm:$0xff]  ;;  %v759_v21 = vld [vmem:[%s6537_s29 + $0xb88] sm:$0xff] }
  0x9d   : > { %4839 = vmatpush1.bf16.msra.mxu1 %v4838_v45  ;;  %4469 = vmatprep.subr.bf16.mxu0 %v4468_v46  ;;  %v702_v45 = vld [vmem:[%s6537_s29 + $0x9c0] sm:$0xff]  ;;  %v696_v46 = vld [vmem:[%s6537_s29 + $0x990] sm:$0xff]  ;;  %v4872_v20 = vpack.c.bf16 %v753_v12, %v745_v11  ;;  %v767_v22 = vld [vmem:[%s6537_s29 + $0xbc8] sm:$0xff] }
  0x9e   : > { %4841 = vmatprep.subr.bf16.mxu1 %v4840_v50  ;;  %v719_v50 = vld [vmem:[%s6537_s29 + $0xa48] sm:$0xff]  ;;  %v4490_v53 = vpack.c.bf16 %v702_v45, %v694_v44  ;;  %v4862_v54 = vpack.c.bf16 %v704_v48, %v696_v46  ;;  %v761_v24 = vld [vmem:[%s6537_s29 + $0xb98] sm:$0xff]  ;;  %v4504_v28 = vpack.c.bf16 %v767_v22, %v759_v21  ;;  %v784_v45 = vld [vmem:[%s6537_s29 + $0xc50] sm:$0xff] }
  0x9f   : > { %v4492_v55 = vpack.c.bf16 %v719_v50, %v711_v49  ;;  %v769_v25 = vld [vmem:[%s6537_s29 + $0xbd8] sm:$0xff]  ;;  %v775_v34 = vld [vmem:[%s6537_s29 + $0xc08] sm:$0xff] }
  0xa0   : > { %4471 = vmatpush1.bf16.msra.mxu0 %v4470_v56  ;;  %v710_v56 = vld [vmem:[%s6537_s29 + $0xa00] sm:$0xff]  ;;  %v4876_v32 = vpack.c.bf16 %v769_v25, %v761_v24  ;;  %v777_v36 = vld [vmem:[%s6537_s29 + $0xc18] sm:$0xff]  ;;  %v791_v46 = vld [vmem:[%s6537_s29 + $0xc88] sm:$0xff] }
  0xa1   : > { %4843 = vmatpush1.bf16.msra.mxu1 %v4842_v57  ;;  %4473 = vmatprep.subr.bf16.mxu0 %v4472_v58  ;;  %v718_v57 = vld [vmem:[%s6537_s29 + $0xa40] sm:$0xff]  ;;  %v712_v58 = vld [vmem:[%s6537_s29 + $0xa10] sm:$0xff]  ;;  %v785_v37 = vld [vmem:[%s6537_s29 + $0xc58] sm:$0xff] }
  0xa2   : > { %4845 = vmatprep.subr.bf16.mxu1 %v4844_v62  ;;  %v735_v62 = vld [vmem:[%s6537_s29 + $0xac8] sm:$0xff]  ;;  %v4494_v1 = vpack.c.bf16 %v718_v57, %v710_v56  ;;  %v4866_v2 = vpack.c.bf16 %v720_v60, %v712_v58  ;;  %v4880_v44 = vpack.c.bf16 %v785_v37, %v777_v36  ;;  %v793_v48 = vld [vmem:[%s6537_s29 + $0xc98] sm:$0xff]  ;;  %v800_v57 = vld [vmem:[%s6537_s29 + $0xcd0] sm:$0xff] }
  0xa3   : > { %v4496_v3 = vpack.c.bf16 %v735_v62, %v727_v61  ;;  %v801_v49 = vld [vmem:[%s6537_s29 + $0xcd8] sm:$0xff]  ;;  %v807_v58 = vld [vmem:[%s6537_s29 + $0xd08] sm:$0xff]  ;;  %v838_v25 = vld [vmem:[%s6537_s29 + $0xe00] sm:$0xff] }
  0xa4   : > { %4475 = vmatpush1.bf16.msra.mxu0 %v4474_v4  ;;  %v726_v4 = vld [vmem:[%s6537_s29 + $0xa80] sm:$0xff]  ;;  %v4884_v56 = vpack.c.bf16 %v801_v49, %v793_v48  ;;  %v809_v60 = vld [vmem:[%s6537_s29 + $0xd18] sm:$0xff] }
  0xa5   : > { %4847 = vmatpush1.bf16.msra.mxu1 %v4846_v5  ;;  %4477 = vmatprep.subr.bf16.mxu0 %v4476_v6  ;;  %v734_v5 = vld [vmem:[%s6537_s29 + $0xac0] sm:$0xff]  ;;  %v728_v6 = vld [vmem:[%s6537_s29 + $0xa90] sm:$0xff]  ;;  %v817_v61 = vld [vmem:[%s6537_s29 + $0xd58] sm:$0xff] }
  0xa6   : > { %4849 = vmatprep.subr.bf16.mxu1 %v4848_v10  ;;  %v751_v10 = vld [vmem:[%s6537_s29 + $0xb48] sm:$0xff]  ;;  %v4498_v13 = vpack.c.bf16 %v734_v5, %v726_v4  ;;  %v4870_v15 = vpack.c.bf16 %v736_v8, %v728_v6  ;;  %v4888_v4 = vpack.c.bf16 %v817_v61, %v809_v60  ;;  %v816_v5 = vld [vmem:[%s6537_s29 + $0xd50] sm:$0xff]  ;;  %v825_v8 = vld [vmem:[%s6537_s29 + $0xd98] sm:$0xff] }
  0xa7   : > { %1997 = vmatmul.mubr.f32.vlgmr.msra.gmra.mrb[0].mxu0 %v378_v16  ;;  %v823_v6 = vld [vmem:[%s6537_s29 + $0xd88] sm:$0xff]  ;;  %v849_v21 = vld [vmem:[%s6537_s29 + $0xe58] sm:$0xff]  ;;  %v854_v37 = vld [vmem:[%s6537_s29 + $0xe80] sm:$0xff] }
  0xa8   : > { %4479 = vmatpush1.bf16.msra.mxu0 %v4478_v17  ;;  %2423 = vmatmul.mubr.f32.vlgmr.msra.gmra.mrb[0].mxu1 %v378_v16  ;;  %v4500_v16 = vpack.c.bf16 %v751_v10, %v743_v9  ;;  %v750_v17 = vld [vmem:[%s6537_s29 + $0xb40] sm:$0xff]  ;;  %v833_v9 = vld [vmem:[%s6537_s29 + $0xdd8] sm:$0xff] }
  0xa9   : > { %4851 = vmatpush1.bf16.msra.mxu1 %v4850_v18  ;;  %4481 = vmatprep.subr.bf16.mxu0 %v4480_v19  ;;  %v744_v18 = vld [vmem:[%s6537_s29 + $0xb10] sm:$0xff]  ;;  %v4502_v26 = vpack.c.bf16 %v750_v17, %v742_v14  ;;  %v830_v14 = vld [vmem:[%s6537_s29 + $0xdc0] sm:$0xff] }
  0xaa   : > { %4853 = vmatprep.subr.bf16.mxu1 %v4852_v23  ;;  %v752_v19 = vld [vmem:[%s6537_s29 + $0xb50] sm:$0xff]  ;;  %v870_v49 = vld [vmem:[%s6537_s29 + $0xf00] sm:$0xff] }
  0xab   : > { %v381_v23 = vld [vmem:[%s8385_s0 + $0x18] sm:$0xff]  ;;  %v4874_v27 = vpack.c.bf16 %v752_v19, %v744_v18  ;;  %v839_v18 = vld [vmem:[%s6537_s29 + $0xe08] sm:$0xff]  ;;  %v886_v61 = vld [vmem:[%s6537_s29 + $0xf80] sm:$0xff] }
  0xac   : > { %4483 = vmatpush1.bf16.msra.mxu0 %v4482_v29  ;;  %2067 = vmatprep.mubr.f32.mxu0 %v381_v23  ;;  %v758_v29 = vld [vmem:[%s6537_s29 + $0xb80] sm:$0xff]  ;;  %v832_v17 = vld [vmem:[%s6537_s29 + $0xdd0] sm:$0xff]  ;;  %v847_v19 = vld [vmem:[%s6537_s29 + $0xe48] sm:$0xff] }
  0xad   : > { %4855 = vmatpush1.bf16.msra.mxu1 %v4854_v30  ;;  %4485 = vmatprep.subr.bf16.mxu0 %v4484_v31  ;;  %v766_v30 = vld [vmem:[%s6537_s29 + $0xbc0] sm:$0xff]  ;;  %v760_v31 = vld [vmem:[%s6537_s29 + $0xb90] sm:$0xff]  ;;  %v4524_v24 = vpack.c.bf16 %v847_v19, %v839_v18  ;;  %v380_v18 = vld [vmem:[%s8385_s0 + $0x10] sm:$0xff] }
  0xae   : > { %4857 = vmatprep.subr.bf16.mxu1 %v4856_v35  ;;  %2493 = vmatprep.mubr.f32.mxu1 %v381_v23  ;;  %v783_v35 = vld [vmem:[%s6537_s29 + $0xc48] sm:$0xff]  ;;  %v4506_v38 = vpack.c.bf16 %v766_v30, %v758_v29  ;;  %v4878_v39 = vpack.c.bf16 %v768_v33, %v760_v31  ;;  %v848_v29 = vld [vmem:[%s6537_s29 + $0xe50] sm:$0xff]  ;;  %v865_v33 = vld [vmem:[%s6537_s29 + $0xed8] sm:$0xff] }
  0xaf   : > { %v4508_v40 = vpack.c.bf16 %v783_v35, %v775_v34  ;;  %v855_v30 = vld [vmem:[%s6537_s29 + $0xe88] sm:$0xff] }
  0xb0   : > { %4487 = vmatpush1.bf16.msra.mxu0 %v4486_v41  ;;  %v774_v41 = vld [vmem:[%s6537_s29 + $0xc00] sm:$0xff]  ;;  %v863_v31 = vld [vmem:[%s6537_s29 + $0xec8] sm:$0xff] }
  0xb1   : > { %4859 = vmatpush1.bf16.msra.mxu1 %v4858_v42  ;;  %4489 = vmatprep.subr.bf16.mxu0 %v4488_v43  ;;  %v782_v42 = vld [vmem:[%s6537_s29 + $0xc40] sm:$0xff]  ;;  %v776_v43 = vld [vmem:[%s6537_s29 + $0xc10] sm:$0xff]  ;;  %v4528_v36 = vpack.c.bf16 %v863_v31, %v855_v30  ;;  %v945_v30 = vld [vmem:[%s6537_s29 + $0x1158] sm:$0xff] }
  0xb2   : > { %4861 = vmatprep.subr.bf16.mxu1 %v4860_v47  ;;  %v799_v47 = vld [vmem:[%s6537_s29 + $0xcc8] sm:$0xff]  ;;  %v4510_v50 = vpack.c.bf16 %v782_v42, %v774_v41  ;;  %v4882_v51 = vpack.c.bf16 %v784_v45, %v776_v43  ;;  %v864_v41 = vld [vmem:[%s6537_s29 + $0xed0] sm:$0xff]  ;;  %v881_v45 = vld [vmem:[%s6537_s29 + $0xf58] sm:$0xff] }
  0xb3   : > { %v4512_v52 = vpack.c.bf16 %v799_v47, %v791_v46  ;;  %v871_v42 = vld [vmem:[%s6537_s29 + $0xf08] sm:$0xff]  ;;  %v383_v31 = vld [vmem:[%s8385_s0 + $0x28] sm:$0xff] }
  0xb4   : > { %4491 = vmatpush1.bf16.msra.mxu0 %v4490_v53  ;;  %v790_v53 = vld [vmem:[%s6537_s29 + $0xc80] sm:$0xff]  ;;  %v879_v43 = vld [vmem:[%s6537_s29 + $0xf48] sm:$0xff] }
  0xb5   : > { %4863 = vmatpush1.bf16.msra.mxu1 %v4862_v54  ;;  %4493 = vmatprep.subr.bf16.mxu0 %v4492_v55  ;;  %v798_v54 = vld [vmem:[%s6537_s29 + $0xcc0] sm:$0xff]  ;;  %v792_v55 = vld [vmem:[%s6537_s29 + $0xc90] sm:$0xff]  ;;  %v4532_v48 = vpack.c.bf16 %v879_v43, %v871_v42  ;;  %v953_v42 = vld [vmem:[%s6537_s29 + $0x1198] sm:$0xff] }
  0xb6   : > { %4865 = vmatprep.subr.bf16.mxu1 %v4864_v59  ;;  %v815_v59 = vld [vmem:[%s6537_s29 + $0xd48] sm:$0xff]  ;;  %v4514_v62 = vpack.c.bf16 %v798_v54, %v790_v53  ;;  %v4886_v63 = vpack.c.bf16 %v800_v57, %v792_v55  ;;  %v880_v53 = vld [vmem:[%s6537_s29 + $0xf50] sm:$0xff]  ;;  %v897_v57 = vld [vmem:[%s6537_s29 + $0xfd8] sm:$0xff] }
  0xb7   : > { %v4516_v0 = vpack.c.bf16 %v815_v59, %v807_v58  ;;  %v887_v54 = vld [vmem:[%s6537_s29 + $0xf88] sm:$0xff]  ;;  %v961_v43 = vld [vmem:[%s6537_s29 + $0x11d8] sm:$0xff] }
  0xb8   : > { %4495 = vmatpush1.bf16.msra.mxu0 %v4494_v1  ;;  %v806_v1 = vld [vmem:[%s6537_s29 + $0xd00] sm:$0xff]  ;;  %v895_v55 = vld [vmem:[%s6537_s29 + $0xfc8] sm:$0xff] }
  0xb9   : > { %4867 = vmatpush1.bf16.msra.mxu1 %v4866_v2  ;;  %4497 = vmatprep.subr.bf16.mxu0 %v4496_v3  ;;  %v814_v2 = vld [vmem:[%s6537_s29 + $0xd40] sm:$0xff]  ;;  %v808_v3 = vld [vmem:[%s6537_s29 + $0xd10] sm:$0xff]  ;;  %v4536_v60 = vpack.c.bf16 %v895_v55, %v887_v54  ;;  %v969_v54 = vld [vmem:[%s6537_s29 + $0x1218] sm:$0xff] }
  0xba   : > { %4869 = vmatprep.subr.bf16.mxu1 %v4868_v7  ;;  %v831_v7 = vld [vmem:[%s6537_s29 + $0xdc8] sm:$0xff]  ;;  %v4518_v10 = vpack.c.bf16 %v814_v2, %v806_v1  ;;  %v4890_v11 = vpack.c.bf16 %v816_v5, %v808_v3  ;;  %v896_v1 = vld [vmem:[%s6537_s29 + $0xfd0] sm:$0xff]  ;;  %v913_v5 = vld [vmem:[%s6537_s29 + $0x1058] sm:$0xff] }
  0xbb   : > { %v4520_v12 = vpack.c.bf16 %v831_v7, %v823_v6  ;;  %v903_v2 = vld [vmem:[%s6537_s29 + $0x1008] sm:$0xff]  ;;  %v977_v55 = vld [vmem:[%s6537_s29 + $0x1258] sm:$0xff] }
  0xbc   : > { %4499 = vmatpush1.bf16.msra.mxu0 %v4498_v13  ;;  %v822_v13 = vld [vmem:[%s6537_s29 + $0xd80] sm:$0xff]  ;;  %v911_v3 = vld [vmem:[%s6537_s29 + $0x1048] sm:$0xff] }
  0xbd   : > { %4871 = vmatpush1.bf16.msra.mxu1 %v4870_v15  ;;  %4501 = vmatprep.subr.bf16.mxu0 %v4500_v16  ;;  %v824_v15 = vld [vmem:[%s6537_s29 + $0xd90] sm:$0xff]  ;;  %v4892_v16 = vpack.c.bf16 %v833_v9, %v825_v8  ;;  %v4522_v22 = vpack.c.bf16 %v830_v14, %v822_v13  ;;  %v4540_v8 = vpack.c.bf16 %v911_v3, %v903_v2  ;;  %v902_v9 = vld [vmem:[%s6537_s29 + $0x1000] sm:$0xff]  ;;  %v919_v14 = vld [vmem:[%s6537_s29 + $0x1088] sm:$0xff] }
  0xbe   : > { %4873 = vmatprep.subr.bf16.mxu1 %v4872_v20  ;;  %v841_v20 = vld [vmem:[%s6537_s29 + $0xe18] sm:$0xff]  ;;  %v4894_v23 = vpack.c.bf16 %v832_v17, %v824_v15  ;;  %v912_v13 = vld [vmem:[%s6537_s29 + $0x1050] sm:$0xff]  ;;  %v927_v15 = vld [vmem:[%s6537_s29 + $0x10c8] sm:$0xff] }
  0xbf   : > { %v929_v17 = vld [vmem:[%s6537_s29 + $0x10d8] sm:$0xff] }
  0xc0   : > { %4503 = vmatpush1.bf16.msra.mxu0 %v4502_v26  ;;  %v846_v26 = vld [vmem:[%s6537_s29 + $0xe40] sm:$0xff]  ;;  %v985_v2 = vld [vmem:[%s6537_s29 + $0x1298] sm:$0xff] }
  0xc1   : > { %4875 = vmatpush1.bf16.msra.mxu1 %v4874_v27  ;;  %4505 = vmatprep.subr.bf16.mxu0 %v4504_v28  ;;  %v840_v27 = vld [vmem:[%s6537_s29 + $0xe10] sm:$0xff]  ;;  %v4896_v28 = vpack.c.bf16 %v849_v21, %v841_v20  ;;  %v4526_v34 = vpack.c.bf16 %v846_v26, %v838_v25  ;;  %v4544_v21 = vpack.c.bf16 %v927_v15, %v919_v14  ;;  %v993_v3 = vld [vmem:[%s6537_s29 + $0x12d8] sm:$0xff] }
  0xc2   : > { %4877 = vmatprep.subr.bf16.mxu1 %v4876_v32  ;;  %v857_v32 = vld [vmem:[%s6537_s29 + $0xe98] sm:$0xff]  ;;  %v4898_v35 = vpack.c.bf16 %v848_v29, %v840_v27  ;;  %v928_v26 = vld [vmem:[%s6537_s29 + $0x10d0] sm:$0xff]  ;;  %v935_v27 = vld [vmem:[%s6537_s29 + $0x1108] sm:$0xff] }
  0xc3   : > { %v937_v29 = vld [vmem:[%s6537_s29 + $0x1118] sm:$0xff] }
  0xc4   : > { %4507 = vmatpush1.bf16.msra.mxu0 %v4506_v38  ;;  %v862_v38 = vld [vmem:[%s6537_s29 + $0xec0] sm:$0xff]  ;;  %v1001_v14 = vld [vmem:[%s6537_s29 + $0x1318] sm:$0xff] }
  0xc5   : > { %4879 = vmatpush1.bf16.msra.mxu1 %v4878_v39  ;;  %4509 = vmatprep.subr.bf16.mxu0 %v4508_v40  ;;  %v856_v39 = vld [vmem:[%s6537_s29 + $0xe90] sm:$0xff]  ;;  %v4900_v40 = vpack.c.bf16 %v865_v33, %v857_v32  ;;  %v4530_v46 = vpack.c.bf16 %v862_v38, %v854_v37  ;;  %v4920_v38 = vpack.c.bf16 %v945_v30, %v937_v29  ;;  %v1009_v15 = vld [vmem:[%s6537_s29 + $0x1358] sm:$0xff] }
  0xc6   : > { %4881 = vmatprep.subr.bf16.mxu1 %v4880_v44  ;;  %v873_v44 = vld [vmem:[%s6537_s29 + $0xf18] sm:$0xff]  ;;  %v4902_v47 = vpack.c.bf16 %v864_v41, %v856_v39  ;;  %v936_v37 = vld [vmem:[%s6537_s29 + $0x1110] sm:$0xff]  ;;  %v959_v41 = vld [vmem:[%s6537_s29 + $0x11c8] sm:$0xff] }
  0xc7   : > { %v944_v39 = vld [vmem:[%s6537_s29 + $0x1150] sm:$0xff] }
  0xc8   : > { %4511 = vmatpush1.bf16.msra.mxu0 %v4510_v50  ;;  %v878_v50 = vld [vmem:[%s6537_s29 + $0xf40] sm:$0xff] }
  0xc9   : > { %4883 = vmatpush1.bf16.msra.mxu1 %v4882_v51  ;;  %4513 = vmatprep.subr.bf16.mxu0 %v4512_v52  ;;  %v872_v51 = vld [vmem:[%s6537_s29 + $0xf10] sm:$0xff]  ;;  %v4904_v52 = vpack.c.bf16 %v881_v45, %v873_v44  ;;  %v4534_v58 = vpack.c.bf16 %v878_v50, %v870_v49  ;;  %v4922_v45 = vpack.c.bf16 %v944_v39, %v936_v37  ;;  %v1039_v37 = vld [vmem:[%s6537_s29 + $0x1448] sm:$0xff]  ;;  %v1041_v39 = vld [vmem:[%s6537_s29 + $0x1458] sm:$0xff] }
  0xca   : > { %4885 = vmatprep.subr.bf16.mxu1 %v4884_v56  ;;  %v889_v56 = vld [vmem:[%s6537_s29 + $0xf98] sm:$0xff]  ;;  %v4906_v59 = vpack.c.bf16 %v880_v53, %v872_v51  ;;  %v952_v49 = vld [vmem:[%s6537_s29 + $0x1190] sm:$0xff]  ;;  %v4924_v50 = vpack.c.bf16 %v961_v43, %v953_v42  ;;  %v975_v53 = vld [vmem:[%s6537_s29 + $0x1248] sm:$0xff] }
  0xcb   : > { %v960_v51 = vld [vmem:[%s6537_s29 + $0x11d0] sm:$0xff]  ;;  %v1030_v43 = vld [vmem:[%s6537_s29 + $0x1400] sm:$0xff] }
  0xcc   : > { %4515 = vmatpush1.bf16.msra.mxu0 %v4514_v62  ;;  %v894_v62 = vld [vmem:[%s6537_s29 + $0xfc0] sm:$0xff] }
  0xcd   : > { %4887 = vmatpush1.bf16.msra.mxu1 %v4886_v63  ;;  %4517 = vmatprep.subr.bf16.mxu0 %v4516_v0  ;;  %v888_v63 = vld [vmem:[%s6537_s29 + $0xf90] sm:$0xff]  ;;  %v4908_v0 = vpack.c.bf16 %v897_v57, %v889_v56  ;;  %v4538_v6 = vpack.c.bf16 %v894_v62, %v886_v61  ;;  %v4926_v57 = vpack.c.bf16 %v960_v51, %v952_v49  ;;  %v1055_v49 = vld [vmem:[%s6537_s29 + $0x14c8] sm:$0xff]  ;;  %v1057_v51 = vld [vmem:[%s6537_s29 + $0x14d8] sm:$0xff] }
  0xce   : > { %4889 = vmatprep.subr.bf16.mxu1 %v4888_v4  ;;  %v905_v4 = vld [vmem:[%s6537_s29 + $0x1018] sm:$0xff]  ;;  %v4910_v7 = vpack.c.bf16 %v896_v1, %v888_v63  ;;  %v968_v61 = vld [vmem:[%s6537_s29 + $0x1210] sm:$0xff]  ;;  %v4928_v62 = vpack.c.bf16 %v977_v55, %v969_v54  ;;  %v991_v1 = vld [vmem:[%s6537_s29 + $0x12c8] sm:$0xff] }
  0xcf   : > { %v976_v63 = vld [vmem:[%s6537_s29 + $0x1250] sm:$0xff]  ;;  %v1046_v55 = vld [vmem:[%s6537_s29 + $0x1480] sm:$0xff] }
  0xd0   : > { %4519 = vmatpush1.bf16.msra.mxu0 %v4518_v10  ;;  %v910_v10 = vld [vmem:[%s6537_s29 + $0x1040] sm:$0xff] }
  0xd1   : > { %4891 = vmatpush1.bf16.msra.mxu1 %v4890_v11  ;;  %4521 = vmatprep.subr.bf16.mxu0 %v4520_v12  ;;  %v904_v11 = vld [vmem:[%s6537_s29 + $0x1010] sm:$0xff]  ;;  %v4912_v12 = vpack.c.bf16 %v913_v5, %v905_v4  ;;  %v4542_v19 = vpack.c.bf16 %v910_v10, %v902_v9  ;;  %v4930_v5 = vpack.c.bf16 %v976_v63, %v968_v61  ;;  %v1071_v61 = vld [vmem:[%s6537_s29 + $0x1548] sm:$0xff]  ;;  %v1073_v63 = vld [vmem:[%s6537_s29 + $0x1558] sm:$0xff] }
  0xd2   : > { %4893 = vmatprep.subr.bf16.mxu1 %v4892_v16  ;;  %v921_v16 = vld [vmem:[%s6537_s29 + $0x1098] sm:$0xff]  ;;  %v4914_v20 = vpack.c.bf16 %v912_v13, %v904_v11  ;;  %v984_v9 = vld [vmem:[%s6537_s29 + $0x1290] sm:$0xff]  ;;  %v4932_v10 = vpack.c.bf16 %v993_v3, %v985_v2  ;;  %v1007_v13 = vld [vmem:[%s6537_s29 + $0x1348] sm:$0xff] }
  0xd3   : > { %v4916_v25 = vpack.c.bf16 %v929_v17, %v921_v16  ;;  %v992_v11 = vld [vmem:[%s6537_s29 + $0x12d0] sm:$0xff]  ;;  %v1062_v3 = vld [vmem:[%s6537_s29 + $0x1500] sm:$0xff] }
  0xd4   : > { %4523 = vmatpush1.bf16.msra.mxu0 %v4522_v22  ;;  %v918_v22 = vld [vmem:[%s6537_s29 + $0x1080] sm:$0xff]  ;;  %v4934_v17 = vpack.c.bf16 %v992_v11, %v984_v9  ;;  %v1087_v9 = vld [vmem:[%s6537_s29 + $0x15c8] sm:$0xff]  ;;  %v1089_v11 = vld [vmem:[%s6537_s29 + $0x15d8] sm:$0xff] }
  0xd5   : > { %4895 = vmatpush1.bf16.msra.mxu1 %v4894_v23  ;;  %4525 = vmatprep.subr.bf16.mxu0 %v4524_v24  ;;  %v926_v23 = vld [vmem:[%s6537_s29 + $0x10c0] sm:$0xff]  ;;  %v920_v24 = vld [vmem:[%s6537_s29 + $0x1090] sm:$0xff] }
  0xd6   : > { %4897 = vmatprep.subr.bf16.mxu1 %v4896_v28  ;;  %v943_v28 = vld [vmem:[%s6537_s29 + $0x1148] sm:$0xff]  ;;  %v4546_v32 = vpack.c.bf16 %v926_v23, %v918_v22  ;;  %v4918_v33 = vpack.c.bf16 %v928_v26, %v920_v24  ;;  %v4936_v22 = vpack.c.bf16 %v1009_v15, %v1001_v14  ;;  %v1008_v23 = vld [vmem:[%s6537_s29 + $0x1350] sm:$0xff]  ;;  %v1017_v26 = vld [vmem:[%s6537_s29 + $0x1398] sm:$0xff] }
  0xd7   : > { %v1015_v24 = vld [vmem:[%s6537_s29 + $0x1388] sm:$0xff]  ;;  %v1078_v15 = vld [vmem:[%s6537_s29 + $0x1580] sm:$0xff] }
  0xd8   : > { %4527 = vmatpush1.bf16.msra.mxu0 %v4526_v34  ;;  %v4548_v34 = vpack.c.bf16 %v943_v28, %v935_v27  ;;  %v1025_v27 = vld [vmem:[%s6537_s29 + $0x13d8] sm:$0xff] }
  0xd9   : > { %4899 = vmatpush1.bf16.msra.mxu1 %v4898_v35  ;;  %4529 = vmatprep.subr.bf16.mxu0 %v4528_v36  ;;  %v934_v35 = vld [vmem:[%s6537_s29 + $0x1100] sm:$0xff] }
  0xda   : > { %4901 = vmatprep.subr.bf16.mxu1 %v4900_v40  ;;  %v942_v36 = vld [vmem:[%s6537_s29 + $0x1140] sm:$0xff]  ;;  %v951_v40 = vld [vmem:[%s6537_s29 + $0x1188] sm:$0xff] }
  0xdb   : > { %v4550_v44 = vpack.c.bf16 %v942_v36, %v934_v35  ;;  %v1024_v35 = vld [vmem:[%s6537_s29 + $0x13d0] sm:$0xff]  ;;  %v1031_v36 = vld [vmem:[%s6537_s29 + $0x1408] sm:$0xff] }
  0xdc   : > { %4531 = vmatpush1.bf16.msra.mxu0 %v4530_v46  ;;  %v4552_v46 = vpack.c.bf16 %v959_v41, %v951_v40  ;;  %v4572_v42 = vpack.c.bf16 %v1039_v37, %v1031_v36 }
  0xdd   : > { %4903 = vmatpush1.bf16.msra.mxu1 %v4902_v47  ;;  %4533 = vmatprep.subr.bf16.mxu0 %v4532_v48  ;;  %v950_v47 = vld [vmem:[%s6537_s29 + $0x1180] sm:$0xff] }
  0xde   : > { %4905 = vmatprep.subr.bf16.mxu1 %v4904_v52  ;;  %v958_v48 = vld [vmem:[%s6537_s29 + $0x11c0] sm:$0xff]  ;;  %v967_v52 = vld [vmem:[%s6537_s29 + $0x1208] sm:$0xff] }
  0xdf   : > { %v4554_v56 = vpack.c.bf16 %v958_v48, %v950_v47  ;;  %v1040_v47 = vld [vmem:[%s6537_s29 + $0x1450] sm:$0xff]  ;;  %v1047_v48 = vld [vmem:[%s6537_s29 + $0x1488] sm:$0xff] }
  0xe0   : > { %4535 = vmatpush1.bf16.msra.mxu0 %v4534_v58  ;;  %v4556_v58 = vpack.c.bf16 %v975_v53, %v967_v52  ;;  %v4576_v54 = vpack.c.bf16 %v1055_v49, %v1047_v48 }
  0xe1   : > { %4907 = vmatpush1.bf16.msra.mxu1 %v4906_v59  ;;  %4537 = vmatprep.subr.bf16.mxu0 %v4536_v60  ;;  %v966_v59 = vld [vmem:[%s6537_s29 + $0x1200] sm:$0xff] }
  0xe2   : > { %4909 = vmatprep.subr.bf16.mxu1 %v4908_v0  ;;  %v974_v60 = vld [vmem:[%s6537_s29 + $0x1240] sm:$0xff]  ;;  %v983_v0 = vld [vmem:[%s6537_s29 + $0x1288] sm:$0xff] }
  0xe3   : > { %v4558_v4 = vpack.c.bf16 %v974_v60, %v966_v59  ;;  %v1056_v59 = vld [vmem:[%s6537_s29 + $0x14d0] sm:$0xff]  ;;  %v1063_v60 = vld [vmem:[%s6537_s29 + $0x1508] sm:$0xff] }
  0xe4   : > { %4539 = vmatpush1.bf16.msra.mxu0 %v4538_v6  ;;  %v4560_v6 = vpack.c.bf16 %v991_v1, %v983_v0  ;;  %v4580_v2 = vpack.c.bf16 %v1071_v61, %v1063_v60 }
  0xe5   : > { %4911 = vmatpush1.bf16.msra.mxu1 %v4910_v7  ;;  %4541 = vmatprep.subr.bf16.mxu0 %v4540_v8  ;;  %v982_v7 = vld [vmem:[%s6537_s29 + $0x1280] sm:$0xff] }
  0xe6   : > { %4913 = vmatprep.subr.bf16.mxu1 %v4912_v12  ;;  %v990_v8 = vld [vmem:[%s6537_s29 + $0x12c0] sm:$0xff]  ;;  %v999_v12 = vld [vmem:[%s6537_s29 + $0x1308] sm:$0xff] }
  0xe7   : > { %2068 = vmatmul.mubr.f32.vlgmr.msra.gmra.mrb[0].mxu0 %v380_v18  ;;  %v4562_v16 = vpack.c.bf16 %v990_v8, %v982_v7  ;;  %v1072_v7 = vld [vmem:[%s6537_s29 + $0x1550] sm:$0xff]  ;;  %v1079_v8 = vld [vmem:[%s6537_s29 + $0x1588] sm:$0xff] }
  0xe8   : > { %4543 = vmatpush1.bf16.msra.mxu0 %v4542_v19  ;;  %2494 = vmatmul.mubr.f32.vlgmr.msra.gmra.mrb[0].mxu1 %v380_v18  ;;  %v4564_v18 = vpack.c.bf16 %v1007_v13, %v999_v12  ;;  %v998_v19 = vld [vmem:[%s6537_s29 + $0x1300] sm:$0xff]  ;;  %v4584_v14 = vpack.c.bf16 %v1087_v9, %v1079_v8 }
  0xe9   : > { %4915 = vmatpush1.bf16.msra.mxu1 %v4914_v20  ;;  %4545 = vmatprep.subr.bf16.mxu0 %v4544_v21  ;;  %v1006_v20 = vld [vmem:[%s6537_s29 + $0x1340] sm:$0xff]  ;;  %v1000_v21 = vld [vmem:[%s6537_s29 + $0x1310] sm:$0xff] }
  0xea   : > { %4917 = vmatprep.subr.bf16.mxu1 %v4916_v25  ;;  %2138 = vmatprep.mubr.f32.mxu0 %v383_v31  ;;  %v1023_v25 = vld [vmem:[%s6537_s29 + $0x13c8] sm:$0xff]  ;;  %v4566_v28 = vpack.c.bf16 %v1006_v20, %v998_v19  ;;  %v4938_v29 = vpack.c.bf16 %v1008_v23, %v1000_v21  ;;  %v1088_v19 = vld [vmem:[%s6537_s29 + $0x15d0] sm:$0xff]  ;;  %v1105_v23 = vld [vmem:[%s6537_s29 + $0x1658] sm:$0xff] }
  0xeb   : > { %2564 = vmatprep.mubr.f32.mxu1 %v383_v31  ;;  %v4568_v30 = vpack.c.bf16 %v1023_v25, %v1015_v24  ;;  %v1014_v31 = vld [vmem:[%s6537_s29 + $0x1380] sm:$0xff]  ;;  %v1095_v20 = vld [vmem:[%s6537_s29 + $0x1608] sm:$0xff] }
  0xec   : > { %4547 = vmatpush1.bf16.msra.mxu0 %v4546_v32  ;;  %v1022_v32 = vld [vmem:[%s6537_s29 + $0x13c0] sm:$0xff]  ;;  %v1103_v21 = vld [vmem:[%s6537_s29 + $0x1648] sm:$0xff] }
  0xed   : > { %4919 = vmatpush1.bf16.msra.mxu1 %v4918_v33  ;;  %4549 = vmatprep.subr.bf16.mxu0 %v4548_v34  ;;  %v1016_v33 = vld [vmem:[%s6537_s29 + $0x1390] sm:$0xff]  ;;  %v4940_v34 = vpack.c.bf16 %v1025_v27, %v1017_v26  ;;  %v4570_v40 = vpack.c.bf16 %v1022_v32, %v1014_v31  ;;  %v4588_v26 = vpack.c.bf16 %v1103_v21, %v1095_v20  ;;  %v1094_v27 = vld [vmem:[%s6537_s29 + $0x1600] sm:$0xff]  ;;  %v1111_v32 = vld [vmem:[%s6537_s29 + $0x1688] sm:$0xff] }
  0xee   : > { %4921 = vmatprep.subr.bf16.mxu1 %v4920_v38  ;;  %v1033_v38 = vld [vmem:[%s6537_s29 + $0x1418] sm:$0xff]  ;;  %v4942_v41 = vpack.c.bf16 %v1024_v35, %v1016_v33  ;;  %v1104_v31 = vld [vmem:[%s6537_s29 + $0x1650] sm:$0xff]  ;;  %v1119_v33 = vld [vmem:[%s6537_s29 + $0x16c8] sm:$0xff] }
  0xef   : > { %v1121_v35 = vld [vmem:[%s6537_s29 + $0x16d8] sm:$0xff] }
  0xf0   : > { %4551 = vmatpush1.bf16.msra.mxu0 %v4550_v44  ;;  %v1038_v44 = vld [vmem:[%s6537_s29 + $0x1440] sm:$0xff]  ;;  %v382_v20 = vld [vmem:[%s8385_s0 + $0x20] sm:$0xff] }
  0xf1   : > { %4923 = vmatpush1.bf16.msra.mxu1 %v4922_v45  ;;  %4553 = vmatprep.subr.bf16.mxu0 %v4552_v46  ;;  %v1032_v45 = vld [vmem:[%s6537_s29 + $0x1410] sm:$0xff]  ;;  %v4944_v46 = vpack.c.bf16 %v1041_v39, %v1033_v38  ;;  %v4574_v52 = vpack.c.bf16 %v1038_v44, %v1030_v43  ;;  %v4592_v38 = vpack.c.bf16 %v1119_v33, %v1111_v32  ;;  %v1110_v39 = vld [vmem:[%s6537_s29 + $0x1680] sm:$0xff]  ;;  %v1127_v44 = vld [vmem:[%s6537_s29 + $0x1708] sm:$0xff] }
  0xf2   : > { %4925 = vmatprep.subr.bf16.mxu1 %v4924_v50  ;;  %v1049_v50 = vld [vmem:[%s6537_s29 + $0x1498] sm:$0xff]  ;;  %v4946_v53 = vpack.c.bf16 %v1040_v47, %v1032_v45  ;;  %v1120_v43 = vld [vmem:[%s6537_s29 + $0x16d0] sm:$0xff]  ;;  %v1135_v45 = vld [vmem:[%s6537_s29 + $0x1748] sm:$0xff] }
  0xf3   : > { %v1137_v47 = vld [vmem:[%s6537_s29 + $0x1758] sm:$0xff]  ;;  %v385_v33 = vld [vmem:[%s8385_s0 + $0x38] sm:$0xff] }
  0xf4   : > { %4555 = vmatpush1.bf16.msra.mxu0 %v4554_v56  ;;  %v1054_v56 = vld [vmem:[%s6537_s29 + $0x14c0] sm:$0xff]  ;;  %v1201_v32 = vld [vmem:[%s6537_s29 + $0x1958] sm:$0xff] }
  0xf5   : > { %4927 = vmatpush1.bf16.msra.mxu1 %v4926_v57  ;;  %4557 = vmatprep.subr.bf16.mxu0 %v4556_v58  ;;  %v1048_v57 = vld [vmem:[%s6537_s29 + $0x1490] sm:$0xff]  ;;  %v4948_v58 = vpack.c.bf16 %v1057_v51, %v1049_v50  ;;  %v4578_v0 = vpack.c.bf16 %v1054_v56, %v1046_v55  ;;  %v4596_v50 = vpack.c.bf16 %v1135_v45, %v1127_v44  ;;  %v1126_v51 = vld [vmem:[%s6537_s29 + $0x1700] sm:$0xff]  ;;  %v1143_v56 = vld [vmem:[%s6537_s29 + $0x1788] sm:$0xff] }
  0xf6   : > { %4929 = vmatprep.subr.bf16.mxu1 %v4928_v62  ;;  %v1065_v62 = vld [vmem:[%s6537_s29 + $0x1518] sm:$0xff]  ;;  %v4950_v1 = vpack.c.bf16 %v1056_v59, %v1048_v57  ;;  %v1136_v55 = vld [vmem:[%s6537_s29 + $0x1750] sm:$0xff]  ;;  %v1151_v57 = vld [vmem:[%s6537_s29 + $0x17c8] sm:$0xff] }
  0xf7   : > { %v1153_v59 = vld [vmem:[%s6537_s29 + $0x17d8] sm:$0xff] }
  0xf8   : > { %4559 = vmatpush1.bf16.msra.mxu0 %v4558_v4  ;;  %v1070_v4 = vld [vmem:[%s6537_s29 + $0x1540] sm:$0xff]  ;;  %v1209_v44 = vld [vmem:[%s6537_s29 + $0x1998] sm:$0xff] }
  0xf9   : > { %4931 = vmatpush1.bf16.msra.mxu1 %v4930_v5  ;;  %4561 = vmatprep.subr.bf16.mxu0 %v4560_v6  ;;  %v1064_v5 = vld [vmem:[%s6537_s29 + $0x1510] sm:$0xff]  ;;  %v4952_v6 = vpack.c.bf16 %v1073_v63, %v1065_v62  ;;  %v4582_v12 = vpack.c.bf16 %v1070_v4, %v1062_v3  ;;  %v4600_v62 = vpack.c.bf16 %v1151_v57, %v1143_v56  ;;  %v1142_v63 = vld [vmem:[%s6537_s29 + $0x1780] sm:$0xff]  ;;  %v1159_v4 = vld [vmem:[%s6537_s29 + $0x1808] sm:$0xff] }
  0xfa   : > { %4933 = vmatprep.subr.bf16.mxu1 %v4932_v10  ;;  %v1081_v10 = vld [vmem:[%s6537_s29 + $0x1598] sm:$0xff]  ;;  %v4954_v13 = vpack.c.bf16 %v1072_v7, %v1064_v5  ;;  %v1152_v3 = vld [vmem:[%s6537_s29 + $0x17d0] sm:$0xff]  ;;  %v1167_v5 = vld [vmem:[%s6537_s29 + $0x1848] sm:$0xff] }
  0xfb   : > { %v1169_v7 = vld [vmem:[%s6537_s29 + $0x1858] sm:$0xff] }
  0xfc   : > { %4563 = vmatpush1.bf16.msra.mxu0 %v4562_v16  ;;  %v1086_v16 = vld [vmem:[%s6537_s29 + $0x15c0] sm:$0xff]  ;;  %v1217_v45 = vld [vmem:[%s6537_s29 + $0x19d8] sm:$0xff] }
  0xfd   : > { %4935 = vmatpush1.bf16.msra.mxu1 %v4934_v17  ;;  %4565 = vmatprep.subr.bf16.mxu0 %v4564_v18  ;;  %v1080_v17 = vld [vmem:[%s6537_s29 + $0x1590] sm:$0xff]  ;;  %v4956_v18 = vpack.c.bf16 %v1089_v11, %v1081_v10  ;;  %v4586_v24 = vpack.c.bf16 %v1086_v16, %v1078_v15  ;;  %v4604_v10 = vpack.c.bf16 %v1167_v5, %v1159_v4  ;;  %v1158_v11 = vld [vmem:[%s6537_s29 + $0x1800] sm:$0xff]  ;;  %v1175_v16 = vld [vmem:[%s6537_s29 + $0x1888] sm:$0xff] }
  0xfe   : > { %4937 = vmatprep.subr.bf16.mxu1 %v4936_v22  ;;  %v1097_v22 = vld [vmem:[%s6537_s29 + $0x1618] sm:$0xff]  ;;  %v4958_v25 = vpack.c.bf16 %v1088_v19, %v1080_v17  ;;  %v1168_v15 = vld [vmem:[%s6537_s29 + $0x1850] sm:$0xff]  ;;  %v1183_v17 = vld [vmem:[%s6537_s29 + $0x18c8] sm:$0xff] }
  0xff   : > { %v1185_v19 = vld [vmem:[%s6537_s29 + $0x18d8] sm:$0xff] }
 0x100   : > { %4567 = vmatpush1.bf16.msra.mxu0 %v4566_v28  ;;  %v1102_v28 = vld [vmem:[%s6537_s29 + $0x1640] sm:$0xff]  ;;  %v1225_v56 = vld [vmem:[%s6537_s29 + $0x1a18] sm:$0xff] }
 0x101   : > { %4939 = vmatpush1.bf16.msra.mxu1 %v4938_v29  ;;  %4569 = vmatprep.subr.bf16.mxu0 %v4568_v30  ;;  %v1096_v29 = vld [vmem:[%s6537_s29 + $0x1610] sm:$0xff]  ;;  %v4960_v30 = vpack.c.bf16 %v1105_v23, %v1097_v22  ;;  %v4590_v36 = vpack.c.bf16 %v1102_v28, %v1094_v27  ;;  %v4608_v23 = vpack.c.bf16 %v1183_v17, %v1175_v16  ;;  %v1233_v57 = vld [vmem:[%s6537_s29 + $0x1a58] sm:$0xff] }
 0x102   : > { %4941 = vmatprep.subr.bf16.mxu1 %v4940_v34  ;;  %v1113_v34 = vld [vmem:[%s6537_s29 + $0x1698] sm:$0xff]  ;;  %v4962_v37 = vpack.c.bf16 %v1104_v31, %v1096_v29  ;;  %v1184_v28 = vld [vmem:[%s6537_s29 + $0x18d0] sm:$0xff]  ;;  %v1191_v29 = vld [vmem:[%s6537_s29 + $0x1908] sm:$0xff] }
 0x103   : > { %v1193_v31 = vld [vmem:[%s6537_s29 + $0x1918] sm:$0xff] }
 0x104   : > { %4571 = vmatpush1.bf16.msra.mxu0 %v4570_v40  ;;  %v1118_v40 = vld [vmem:[%s6537_s29 + $0x16c0] sm:$0xff]  ;;  %v1241_v4 = vld [vmem:[%s6537_s29 + $0x1a98] sm:$0xff] }
 0x105   : > { %4943 = vmatpush1.bf16.msra.mxu1 %v4942_v41  ;;  %4573 = vmatprep.subr.bf16.mxu0 %v4572_v42  ;;  %v1112_v41 = vld [vmem:[%s6537_s29 + $0x1690] sm:$0xff]  ;;  %v4964_v42 = vpack.c.bf16 %v1121_v35, %v1113_v34  ;;  %v4594_v48 = vpack.c.bf16 %v1118_v40, %v1110_v39  ;;  %v4984_v40 = vpack.c.bf16 %v1201_v32, %v1193_v31  ;;  %v1249_v5 = vld [vmem:[%s6537_s29 + $0x1ad8] sm:$0xff] }
 0x106   : > { %4945 = vmatprep.subr.bf16.mxu1 %v4944_v46  ;;  %v1129_v46 = vld [vmem:[%s6537_s29 + $0x1718] sm:$0xff]  ;;  %v4966_v49 = vpack.c.bf16 %v1120_v43, %v1112_v41  ;;  %v1192_v39 = vld [vmem:[%s6537_s29 + $0x1910] sm:$0xff]  ;;  %v1215_v43 = vld [vmem:[%s6537_s29 + $0x19c8] sm:$0xff] }
 0x107   : > { %v1200_v41 = vld [vmem:[%s6537_s29 + $0x1950] sm:$0xff]  ;;  %v1257_v16 = vld [vmem:[%s6537_s29 + $0x1b18] sm:$0xff] }
 0x108   : > { %4575 = vmatpush1.bf16.msra.mxu0 %v4574_v52  ;;  %v1134_v52 = vld [vmem:[%s6537_s29 + $0x1740] sm:$0xff]  ;;  %v1265_v17 = vld [vmem:[%s6537_s29 + $0x1b58] sm:$0xff] }
 0x109   : > { %4947 = vmatpush1.bf16.msra.mxu1 %v4946_v53  ;;  %4577 = vmatprep.subr.bf16.mxu0 %v4576_v54  ;;  %v1128_v53 = vld [vmem:[%s6537_s29 + $0x1710] sm:$0xff]  ;;  %v4968_v54 = vpack.c.bf16 %v1137_v47, %v1129_v46  ;;  %v4598_v60 = vpack.c.bf16 %v1134_v52, %v1126_v51  ;;  %v4986_v47 = vpack.c.bf16 %v1200_v41, %v1192_v39  ;;  %v1295_v39 = vld [vmem:[%s6537_s29 + $0x1c48] sm:$0xff]  ;;  %v1297_v41 = vld [vmem:[%s6537_s29 + $0x1c58] sm:$0xff] }
 0x10a   : > { %4949 = vmatprep.subr.bf16.mxu1 %v4948_v58  ;;  %v1145_v58 = vld [vmem:[%s6537_s29 + $0x1798] sm:$0xff]  ;;  %v4970_v61 = vpack.c.bf16 %v1136_v55, %v1128_v53  ;;  %v1208_v51 = vld [vmem:[%s6537_s29 + $0x1990] sm:$0xff]  ;;  %v4988_v52 = vpack.c.bf16 %v1217_v45, %v1209_v44  ;;  %v1231_v55 = vld [vmem:[%s6537_s29 + $0x1a48] sm:$0xff] }
 0x10b   : > { %v1216_v53 = vld [vmem:[%s6537_s29 + $0x19d0] sm:$0xff]  ;;  %v1286_v45 = vld [vmem:[%s6537_s29 + $0x1c00] sm:$0xff] }
 0x10c   : > { %4579 = vmatpush1.bf16.msra.mxu0 %v4578_v0  ;;  %v1150_v0 = vld [vmem:[%s6537_s29 + $0x17c0] sm:$0xff] }
 0x10d   : > { %4951 = vmatpush1.bf16.msra.mxu1 %v4950_v1  ;;  %4581 = vmatprep.subr.bf16.mxu0 %v4580_v2  ;;  %v1144_v1 = vld [vmem:[%s6537_s29 + $0x1790] sm:$0xff]  ;;  %v4972_v2 = vpack.c.bf16 %v1153_v59, %v1145_v58  ;;  %v4602_v8 = vpack.c.bf16 %v1150_v0, %v1142_v63  ;;  %v4990_v59 = vpack.c.bf16 %v1216_v53, %v1208_v51  ;;  %v1311_v51 = vld [vmem:[%s6537_s29 + $0x1cc8] sm:$0xff]  ;;  %v1313_v53 = vld [vmem:[%s6537_s29 + $0x1cd8] sm:$0xff] }
 0x10e   : > { %4953 = vmatprep.subr.bf16.mxu1 %v4952_v6  ;;  %v1161_v6 = vld [vmem:[%s6537_s29 + $0x1818] sm:$0xff]  ;;  %v4974_v9 = vpack.c.bf16 %v1152_v3, %v1144_v1  ;;  %v1224_v63 = vld [vmem:[%s6537_s29 + $0x1a10] sm:$0xff]  ;;  %v4992_v0 = vpack.c.bf16 %v1233_v57, %v1225_v56  ;;  %v1247_v3 = vld [vmem:[%s6537_s29 + $0x1ac8] sm:$0xff] }
 0x10f   : > { %v1232_v1 = vld [vmem:[%s6537_s29 + $0x1a50] sm:$0xff]  ;;  %v1302_v57 = vld [vmem:[%s6537_s29 + $0x1c80] sm:$0xff] }
 0x110   : > { %4583 = vmatpush1.bf16.msra.mxu0 %v4582_v12  ;;  %v1166_v12 = vld [vmem:[%s6537_s29 + $0x1840] sm:$0xff] }
 0x111   : > { %4955 = vmatpush1.bf16.msra.mxu1 %v4954_v13  ;;  %4585 = vmatprep.subr.bf16.mxu0 %v4584_v14  ;;  %v1160_v13 = vld [vmem:[%s6537_s29 + $0x1810] sm:$0xff]  ;;  %v4976_v14 = vpack.c.bf16 %v1169_v7, %v1161_v6  ;;  %v4606_v21 = vpack.c.bf16 %v1166_v12, %v1158_v11  ;;  %v4994_v7 = vpack.c.bf16 %v1232_v1, %v1224_v63  ;;  %v1327_v63 = vld [vmem:[%s6537_s29 + $0x1d48] sm:$0xff]  ;;  %v1329_v1 = vld [vmem:[%s6537_s29 + $0x1d58] sm:$0xff] }
 0x112   : > { %4957 = vmatprep.subr.bf16.mxu1 %v4956_v18  ;;  %v1177_v18 = vld [vmem:[%s6537_s29 + $0x1898] sm:$0xff]  ;;  %v4978_v22 = vpack.c.bf16 %v1168_v15, %v1160_v13  ;;  %v1240_v11 = vld [vmem:[%s6537_s29 + $0x1a90] sm:$0xff]  ;;  %v4996_v12 = vpack.c.bf16 %v1249_v5, %v1241_v4  ;;  %v1263_v15 = vld [vmem:[%s6537_s29 + $0x1b48] sm:$0xff] }
 0x113   : > { %v4980_v27 = vpack.c.bf16 %v1185_v19, %v1177_v18  ;;  %v1248_v13 = vld [vmem:[%s6537_s29 + $0x1ad0] sm:$0xff]  ;;  %v1318_v5 = vld [vmem:[%s6537_s29 + $0x1d00] sm:$0xff] }
 0x114   : > { %4587 = vmatpush1.bf16.msra.mxu0 %v4586_v24  ;;  %v1174_v24 = vld [vmem:[%s6537_s29 + $0x1880] sm:$0xff]  ;;  %v4998_v19 = vpack.c.bf16 %v1248_v13, %v1240_v11  ;;  %v1343_v11 = vld [vmem:[%s6537_s29 + $0x1dc8] sm:$0xff]  ;;  %v1345_v13 = vld [vmem:[%s6537_s29 + $0x1dd8] sm:$0xff] }
 0x115   : > { %4959 = vmatpush1.bf16.msra.mxu1 %v4958_v25  ;;  %4589 = vmatprep.subr.bf16.mxu0 %v4588_v26  ;;  %v1182_v25 = vld [vmem:[%s6537_s29 + $0x18c0] sm:$0xff]  ;;  %v1176_v26 = vld [vmem:[%s6537_s29 + $0x1890] sm:$0xff] }
 0x116   : > { %4961 = vmatprep.subr.bf16.mxu1 %v4960_v30  ;;  %v1199_v30 = vld [vmem:[%s6537_s29 + $0x1948] sm:$0xff]  ;;  %v4610_v34 = vpack.c.bf16 %v1182_v25, %v1174_v24  ;;  %v4982_v35 = vpack.c.bf16 %v1184_v28, %v1176_v26  ;;  %v5000_v24 = vpack.c.bf16 %v1265_v17, %v1257_v16  ;;  %v1264_v25 = vld [vmem:[%s6537_s29 + $0x1b50] sm:$0xff]  ;;  %v1273_v28 = vld [vmem:[%s6537_s29 + $0x1b98] sm:$0xff] }
 0x117   : > { %v1271_v26 = vld [vmem:[%s6537_s29 + $0x1b88] sm:$0xff]  ;;  %v1334_v17 = vld [vmem:[%s6537_s29 + $0x1d80] sm:$0xff] }
 0x118   : > { %4591 = vmatpush1.bf16.msra.mxu0 %v4590_v36  ;;  %v4612_v36 = vpack.c.bf16 %v1199_v30, %v1191_v29  ;;  %v1281_v29 = vld [vmem:[%s6537_s29 + $0x1bd8] sm:$0xff] }
 0x119   : > { %4963 = vmatpush1.bf16.msra.mxu1 %v4962_v37  ;;  %4593 = vmatprep.subr.bf16.mxu0 %v4592_v38  ;;  %v1190_v37 = vld [vmem:[%s6537_s29 + $0x1900] sm:$0xff] }
 0x11a   : > { %4965 = vmatprep.subr.bf16.mxu1 %v4964_v42  ;;  %v1198_v38 = vld [vmem:[%s6537_s29 + $0x1940] sm:$0xff]  ;;  %v1207_v42 = vld [vmem:[%s6537_s29 + $0x1988] sm:$0xff] }
 0x11b   : > { %v4614_v46 = vpack.c.bf16 %v1198_v38, %v1190_v37  ;;  %v1280_v37 = vld [vmem:[%s6537_s29 + $0x1bd0] sm:$0xff]  ;;  %v1287_v38 = vld [vmem:[%s6537_s29 + $0x1c08] sm:$0xff] }
 0x11c   : > { %4595 = vmatpush1.bf16.msra.mxu0 %v4594_v48  ;;  %v4616_v48 = vpack.c.bf16 %v1215_v43, %v1207_v42  ;;  %v4636_v44 = vpack.c.bf16 %v1295_v39, %v1287_v38 }
 0x11d   : > { %4967 = vmatpush1.bf16.msra.mxu1 %v4966_v49  ;;  %4597 = vmatprep.subr.bf16.mxu0 %v4596_v50  ;;  %v1206_v49 = vld [vmem:[%s6537_s29 + $0x1980] sm:$0xff] }
 0x11e   : > { %4969 = vmatprep.subr.bf16.mxu1 %v4968_v54  ;;  %v1214_v50 = vld [vmem:[%s6537_s29 + $0x19c0] sm:$0xff]  ;;  %v1223_v54 = vld [vmem:[%s6537_s29 + $0x1a08] sm:$0xff] }
 0x11f   : > { %v4618_v58 = vpack.c.bf16 %v1214_v50, %v1206_v49  ;;  %v1296_v49 = vld [vmem:[%s6537_s29 + $0x1c50] sm:$0xff]  ;;  %v1303_v50 = vld [vmem:[%s6537_s29 + $0x1c88] sm:$0xff] }
 0x120   : > { %4599 = vmatpush1.bf16.msra.mxu0 %v4598_v60  ;;  %v4620_v60 = vpack.c.bf16 %v1231_v55, %v1223_v54  ;;  %v4640_v56 = vpack.c.bf16 %v1311_v51, %v1303_v50 }
 0x121   : > { %4971 = vmatpush1.bf16.msra.mxu1 %v4970_v61  ;;  %4601 = vmatprep.subr.bf16.mxu0 %v4600_v62  ;;  %v1222_v61 = vld [vmem:[%s6537_s29 + $0x1a00] sm:$0xff] }
 0x122   : > { %4973 = vmatprep.subr.bf16.mxu1 %v4972_v2  ;;  %v1230_v62 = vld [vmem:[%s6537_s29 + $0x1a40] sm:$0xff]  ;;  %v1239_v2 = vld [vmem:[%s6537_s29 + $0x1a88] sm:$0xff] }
 0x123   : > { %v4622_v6 = vpack.c.bf16 %v1230_v62, %v1222_v61  ;;  %v1312_v61 = vld [vmem:[%s6537_s29 + $0x1cd0] sm:$0xff]  ;;  %v1319_v62 = vld [vmem:[%s6537_s29 + $0x1d08] sm:$0xff] }
 0x124   : > { %4603 = vmatpush1.bf16.msra.mxu0 %v4602_v8  ;;  %v4624_v8 = vpack.c.bf16 %v1247_v3, %v1239_v2  ;;  %v4644_v4 = vpack.c.bf16 %v1327_v63, %v1319_v62 }
 0x125   : > { %4975 = vmatpush1.bf16.msra.mxu1 %v4974_v9  ;;  %4605 = vmatprep.subr.bf16.mxu0 %v4604_v10  ;;  %v1238_v9 = vld [vmem:[%s6537_s29 + $0x1a80] sm:$0xff] }
 0x126   : > { %4977 = vmatprep.subr.bf16.mxu1 %v4976_v14  ;;  %v1246_v10 = vld [vmem:[%s6537_s29 + $0x1ac0] sm:$0xff]  ;;  %v1255_v14 = vld [vmem:[%s6537_s29 + $0x1b08] sm:$0xff] }
 0x127   : > { %2139 = vmatmul.mubr.f32.vlgmr.msra.gmra.mrb[0].mxu0 %v382_v20  ;;  %v4626_v18 = vpack.c.bf16 %v1246_v10, %v1238_v9  ;;  %v1328_v9 = vld [vmem:[%s6537_s29 + $0x1d50] sm:$0xff]  ;;  %v1335_v10 = vld [vmem:[%s6537_s29 + $0x1d88] sm:$0xff] }
 0x128   : > { %4607 = vmatpush1.bf16.msra.mxu0 %v4606_v21  ;;  %2565 = vmatmul.mubr.f32.vlgmr.msra.gmra.mrb[0].mxu1 %v382_v20  ;;  %v4628_v20 = vpack.c.bf16 %v1263_v15, %v1255_v14  ;;  %v1254_v21 = vld [vmem:[%s6537_s29 + $0x1b00] sm:$0xff]  ;;  %v4648_v16 = vpack.c.bf16 %v1343_v11, %v1335_v10 }
 0x129   : > { %4979 = vmatpush1.bf16.msra.mxu1 %v4978_v22  ;;  %4609 = vmatprep.subr.bf16.mxu0 %v4608_v23  ;;  %v1262_v22 = vld [vmem:[%s6537_s29 + $0x1b40] sm:$0xff]  ;;  %v1256_v23 = vld [vmem:[%s6537_s29 + $0x1b10] sm:$0xff] }
 0x12a   : > { %4981 = vmatprep.subr.bf16.mxu1 %v4980_v27  ;;  %2209 = vmatprep.mubr.f32.mxu0 %v385_v33  ;;  %v1279_v27 = vld [vmem:[%s6537_s29 + $0x1bc8] sm:$0xff]  ;;  %v4630_v30 = vpack.c.bf16 %v1262_v22, %v1254_v21  ;;  %v5002_v31 = vpack.c.bf16 %v1264_v25, %v1256_v23  ;;  %v1344_v21 = vld [vmem:[%s6537_s29 + $0x1dd0] sm:$0xff]  ;;  %v1361_v25 = vld [vmem:[%s6537_s29 + $0x1e58] sm:$0xff] }
 0x12b   : > { %2635 = vmatprep.mubr.f32.mxu1 %v385_v33  ;;  %v4632_v32 = vpack.c.bf16 %v1279_v27, %v1271_v26  ;;  %v1270_v33 = vld [vmem:[%s6537_s29 + $0x1b80] sm:$0xff]  ;;  %v1351_v22 = vld [vmem:[%s6537_s29 + $0x1e08] sm:$0xff] }
 0x12c   : > { %4611 = vmatpush1.bf16.msra.mxu0 %v4610_v34  ;;  %v1278_v34 = vld [vmem:[%s6537_s29 + $0x1bc0] sm:$0xff]  ;;  %v1359_v23 = vld [vmem:[%s6537_s29 + $0x1e48] sm:$0xff] }
 0x12d   : > { %4983 = vmatpush1.bf16.msra.mxu1 %v4982_v35  ;;  %4613 = vmatprep.subr.bf16.mxu0 %v4612_v36  ;;  %v1272_v35 = vld [vmem:[%s6537_s29 + $0x1b90] sm:$0xff]  ;;  %v5004_v36 = vpack.c.bf16 %v1281_v29, %v1273_v28  ;;  %v4634_v42 = vpack.c.bf16 %v1278_v34, %v1270_v33  ;;  %v4652_v28 = vpack.c.bf16 %v1359_v23, %v1351_v22  ;;  %v1350_v29 = vld [vmem:[%s6537_s29 + $0x1e00] sm:$0xff]  ;;  %v1367_v34 = vld [vmem:[%s6537_s29 + $0x1e88] sm:$0xff] }
 0x12e   : > { %4985 = vmatprep.subr.bf16.mxu1 %v4984_v40  ;;  %v1289_v40 = vld [vmem:[%s6537_s29 + $0x1c18] sm:$0xff]  ;;  %v5006_v43 = vpack.c.bf16 %v1280_v37, %v1272_v35  ;;  %v1360_v33 = vld [vmem:[%s6537_s29 + $0x1e50] sm:$0xff]  ;;  %v1375_v35 = vld [vmem:[%s6537_s29 + $0x1ec8] sm:$0xff] }
 0x12f   : > { %v1377_v37 = vld [vmem:[%s6537_s29 + $0x1ed8] sm:$0xff]  ;;  %v384_v22 = vld [vmem:[%s8385_s0 + $0x30] sm:$0xff] }
 0x130   : > { %4615 = vmatpush1.bf16.msra.mxu0 %v4614_v46  ;;  %v1294_v46 = vld [vmem:[%s6537_s29 + $0x1c40] sm:$0xff] }
 0x131   : > { %4987 = vmatpush1.bf16.msra.mxu1 %v4986_v47  ;;  %4617 = vmatprep.subr.bf16.mxu0 %v4616_v48  ;;  %v1288_v47 = vld [vmem:[%s6537_s29 + $0x1c10] sm:$0xff]  ;;  %v5008_v48 = vpack.c.bf16 %v1297_v41, %v1289_v40  ;;  %v4638_v54 = vpack.c.bf16 %v1294_v46, %v1286_v45  ;;  %v4656_v40 = vpack.c.bf16 %v1375_v35, %v1367_v34  ;;  %v1366_v41 = vld [vmem:[%s6537_s29 + $0x1e80] sm:$0xff]  ;;  %v1383_v46 = vld [vmem:[%s6537_s29 + $0x1f08] sm:$0xff] }
 0x132   : > { %4989 = vmatprep.subr.bf16.mxu1 %v4988_v52  ;;  %v1305_v52 = vld [vmem:[%s6537_s29 + $0x1c98] sm:$0xff]  ;;  %v5010_v55 = vpack.c.bf16 %v1296_v49, %v1288_v47  ;;  %v1376_v45 = vld [vmem:[%s6537_s29 + $0x1ed0] sm:$0xff]  ;;  %v1391_v47 = vld [vmem:[%s6537_s29 + $0x1f48] sm:$0xff] }
 0x133   : > { %v1393_v49 = vld [vmem:[%s6537_s29 + $0x1f58] sm:$0xff]  ;;  %v387_v35 = vld [vmem:[%s8385_s0 + $0x48] sm:$0xff] }
 0x134   : > { %4619 = vmatpush1.bf16.msra.mxu0 %v4618_v58  ;;  %v1310_v58 = vld [vmem:[%s6537_s29 + $0x1cc0] sm:$0xff]  ;;  %v1457_v34 = vld [vmem:[%s6537_s29 + $0x2158] sm:$0xff] }
 0x135   : > { %4991 = vmatpush1.bf16.msra.mxu1 %v4990_v59  ;;  %4621 = vmatprep.subr.bf16.mxu0 %v4620_v60  ;;  %v1304_v59 = vld [vmem:[%s6537_s29 + $0x1c90] sm:$0xff]  ;;  %v5012_v60 = vpack.c.bf16 %v1313_v53, %v1305_v52  ;;  %v4642_v2 = vpack.c.bf16 %v1310_v58, %v1302_v57  ;;  %v4660_v52 = vpack.c.bf16 %v1391_v47, %v1383_v46  ;;  %v1382_v53 = vld [vmem:[%s6537_s29 + $0x1f00] sm:$0xff]  ;;  %v1399_v58 = vld [vmem:[%s6537_s29 + $0x1f88] sm:$0xff] }
 0x136   : > { %4993 = vmatprep.subr.bf16.mxu1 %v4992_v0  ;;  %v1321_v0 = vld [vmem:[%s6537_s29 + $0x1d18] sm:$0xff]  ;;  %v5014_v3 = vpack.c.bf16 %v1312_v61, %v1304_v59  ;;  %v1392_v57 = vld [vmem:[%s6537_s29 + $0x1f50] sm:$0xff]  ;;  %v1407_v59 = vld [vmem:[%s6537_s29 + $0x1fc8] sm:$0xff] }
 0x137   : > { %v1409_v61 = vld [vmem:[%s6537_s29 + $0x1fd8] sm:$0xff] }
 0x138   : > { %4623 = vmatpush1.bf16.msra.mxu0 %v4622_v6  ;;  %v1326_v6 = vld [vmem:[%s6537_s29 + $0x1d40] sm:$0xff]  ;;  %v1465_v46 = vld [vmem:[%s6537_s29 + $0x2198] sm:$0xff] }
 0x139   : > { %4995 = vmatpush1.bf16.msra.mxu1 %v4994_v7  ;;  %4625 = vmatprep.subr.bf16.mxu0 %v4624_v8  ;;  %v1320_v7 = vld [vmem:[%s6537_s29 + $0x1d10] sm:$0xff]  ;;  %v5016_v8 = vpack.c.bf16 %v1329_v1, %v1321_v0  ;;  %v4646_v14 = vpack.c.bf16 %v1326_v6, %v1318_v5  ;;  %v4664_v0 = vpack.c.bf16 %v1407_v59, %v1399_v58  ;;  %v1398_v1 = vld [vmem:[%s6537_s29 + $0x1f80] sm:$0xff]  ;;  %v1415_v6 = vld [vmem:[%s6537_s29 + $0x2008] sm:$0xff] }
 0x13a   : > { %4997 = vmatprep.subr.bf16.mxu1 %v4996_v12  ;;  %v1337_v12 = vld [vmem:[%s6537_s29 + $0x1d98] sm:$0xff]  ;;  %v5018_v15 = vpack.c.bf16 %v1328_v9, %v1320_v7  ;;  %v1408_v5 = vld [vmem:[%s6537_s29 + $0x1fd0] sm:$0xff]  ;;  %v1423_v7 = vld [vmem:[%s6537_s29 + $0x2048] sm:$0xff] }
 0x13b   : > { %v1425_v9 = vld [vmem:[%s6537_s29 + $0x2058] sm:$0xff] }
 0x13c   : > { %4627 = vmatpush1.bf16.msra.mxu0 %v4626_v18  ;;  %v1342_v18 = vld [vmem:[%s6537_s29 + $0x1dc0] sm:$0xff]  ;;  %v1473_v47 = vld [vmem:[%s6537_s29 + $0x21d8] sm:$0xff] }
 0x13d   : > { %4999 = vmatpush1.bf16.msra.mxu1 %v4998_v19  ;;  %4629 = vmatprep.subr.bf16.mxu0 %v4628_v20  ;;  %v1336_v19 = vld [vmem:[%s6537_s29 + $0x1d90] sm:$0xff]  ;;  %v5020_v20 = vpack.c.bf16 %v1345_v13, %v1337_v12  ;;  %v4650_v26 = vpack.c.bf16 %v1342_v18, %v1334_v17  ;;  %v4668_v12 = vpack.c.bf16 %v1423_v7, %v1415_v6  ;;  %v1414_v13 = vld [vmem:[%s6537_s29 + $0x2000] sm:$0xff]  ;;  %v1431_v18 = vld [vmem:[%s6537_s29 + $0x2088] sm:$0xff] }
 0x13e   : > { %5001 = vmatprep.subr.bf16.mxu1 %v5000_v24  ;;  %v1353_v24 = vld [vmem:[%s6537_s29 + $0x1e18] sm:$0xff]  ;;  %v5022_v27 = vpack.c.bf16 %v1344_v21, %v1336_v19  ;;  %v1424_v17 = vld [vmem:[%s6537_s29 + $0x2050] sm:$0xff]  ;;  %v1439_v19 = vld [vmem:[%s6537_s29 + $0x20c8] sm:$0xff] }
 0x13f   : > { %v1441_v21 = vld [vmem:[%s6537_s29 + $0x20d8] sm:$0xff] }
 0x140   : > { %4631 = vmatpush1.bf16.msra.mxu0 %v4630_v30  ;;  %v1358_v30 = vld [vmem:[%s6537_s29 + $0x1e40] sm:$0xff]  ;;  %v1481_v58 = vld [vmem:[%s6537_s29 + $0x2218] sm:$0xff] }
 0x141   : > { %5003 = vmatpush1.bf16.msra.mxu1 %v5002_v31  ;;  %4633 = vmatprep.subr.bf16.mxu0 %v4632_v32  ;;  %v1352_v31 = vld [vmem:[%s6537_s29 + $0x1e10] sm:$0xff]  ;;  %v5024_v32 = vpack.c.bf16 %v1361_v25, %v1353_v24  ;;  %v4654_v38 = vpack.c.bf16 %v1358_v30, %v1350_v29  ;;  %v4672_v25 = vpack.c.bf16 %v1439_v19, %v1431_v18  ;;  %v1489_v59 = vld [vmem:[%s6537_s29 + $0x2258] sm:$0xff] }
 0x142   : > { %5005 = vmatprep.subr.bf16.mxu1 %v5004_v36  ;;  %v1369_v36 = vld [vmem:[%s6537_s29 + $0x1e98] sm:$0xff]  ;;  %v5026_v39 = vpack.c.bf16 %v1360_v33, %v1352_v31  ;;  %v1440_v30 = vld [vmem:[%s6537_s29 + $0x20d0] sm:$0xff]  ;;  %v1447_v31 = vld [vmem:[%s6537_s29 + $0x2108] sm:$0xff] }
 0x143   : > { %v1449_v33 = vld [vmem:[%s6537_s29 + $0x2118] sm:$0xff] }
 0x144   : > { %4635 = vmatpush1.bf16.msra.mxu0 %v4634_v42  ;;  %v1374_v42 = vld [vmem:[%s6537_s29 + $0x1ec0] sm:$0xff]  ;;  %v1497_v6 = vld [vmem:[%s6537_s29 + $0x2298] sm:$0xff] }
 0x145   : > { %5007 = vmatpush1.bf16.msra.mxu1 %v5006_v43  ;;  %4637 = vmatprep.subr.bf16.mxu0 %v4636_v44  ;;  %v1368_v43 = vld [vmem:[%s6537_s29 + $0x1e90] sm:$0xff]  ;;  %v5028_v44 = vpack.c.bf16 %v1377_v37, %v1369_v36  ;;  %v4658_v50 = vpack.c.bf16 %v1374_v42, %v1366_v41  ;;  %v5048_v42 = vpack.c.bf16 %v1457_v34, %v1449_v33  ;;  %v1505_v7 = vld [vmem:[%s6537_s29 + $0x22d8] sm:$0xff] }
 0x146   : > { %5009 = vmatprep.subr.bf16.mxu1 %v5008_v48  ;;  %v1385_v48 = vld [vmem:[%s6537_s29 + $0x1f18] sm:$0xff]  ;;  %v5030_v51 = vpack.c.bf16 %v1376_v45, %v1368_v43  ;;  %v1448_v41 = vld [vmem:[%s6537_s29 + $0x2110] sm:$0xff]  ;;  %v1471_v45 = vld [vmem:[%s6537_s29 + $0x21c8] sm:$0xff] }
 0x147   : > { %v1456_v43 = vld [vmem:[%s6537_s29 + $0x2150] sm:$0xff]  ;;  %v1513_v18 = vld [vmem:[%s6537_s29 + $0x2318] sm:$0xff] }
 0x148   : > { %4639 = vmatpush1.bf16.msra.mxu0 %v4638_v54  ;;  %v1390_v54 = vld [vmem:[%s6537_s29 + $0x1f40] sm:$0xff]  ;;  %v1521_v19 = vld [vmem:[%s6537_s29 + $0x2358] sm:$0xff] }
 0x149   : > { %5011 = vmatpush1.bf16.msra.mxu1 %v5010_v55  ;;  %4641 = vmatprep.subr.bf16.mxu0 %v4640_v56  ;;  %v1384_v55 = vld [vmem:[%s6537_s29 + $0x1f10] sm:$0xff]  ;;  %v5032_v56 = vpack.c.bf16 %v1393_v49, %v1385_v48  ;;  %v4662_v62 = vpack.c.bf16 %v1390_v54, %v1382_v53  ;;  %v5050_v49 = vpack.c.bf16 %v1456_v43, %v1448_v41  ;;  %v1551_v41 = vld [vmem:[%s6537_s29 + $0x2448] sm:$0xff]  ;;  %v1553_v43 = vld [vmem:[%s6537_s29 + $0x2458] sm:$0xff] }
 0x14a   : > { %5013 = vmatprep.subr.bf16.mxu1 %v5012_v60  ;;  %v1401_v60 = vld [vmem:[%s6537_s29 + $0x1f98] sm:$0xff]  ;;  %v5034_v63 = vpack.c.bf16 %v1392_v57, %v1384_v55  ;;  %v1464_v53 = vld [vmem:[%s6537_s29 + $0x2190] sm:$0xff]  ;;  %v5052_v54 = vpack.c.bf16 %v1473_v47, %v1465_v46  ;;  %v1487_v57 = vld [vmem:[%s6537_s29 + $0x2248] sm:$0xff] }
 0x14b   : > { %v1472_v55 = vld [vmem:[%s6537_s29 + $0x21d0] sm:$0xff]  ;;  %v1542_v47 = vld [vmem:[%s6537_s29 + $0x2400] sm:$0xff] }
 0x14c   : > { %4643 = vmatpush1.bf16.msra.mxu0 %v4642_v2  ;;  %v1406_v2 = vld [vmem:[%s6537_s29 + $0x1fc0] sm:$0xff] }
 0x14d   : > { %5015 = vmatpush1.bf16.msra.mxu1 %v5014_v3  ;;  %4645 = vmatprep.subr.bf16.mxu0 %v4644_v4  ;;  %v1400_v3 = vld [vmem:[%s6537_s29 + $0x1f90] sm:$0xff]  ;;  %v5036_v4 = vpack.c.bf16 %v1409_v61, %v1401_v60  ;;  %v4666_v10 = vpack.c.bf16 %v1406_v2, %v1398_v1  ;;  %v5054_v61 = vpack.c.bf16 %v1472_v55, %v1464_v53  ;;  %v1567_v53 = vld [vmem:[%s6537_s29 + $0x24c8] sm:$0xff]  ;;  %v1569_v55 = vld [vmem:[%s6537_s29 + $0x24d8] sm:$0xff] }
 0x14e   : > { %5017 = vmatprep.subr.bf16.mxu1 %v5016_v8  ;;  %v1417_v8 = vld [vmem:[%s6537_s29 + $0x2018] sm:$0xff]  ;;  %v5038_v11 = vpack.c.bf16 %v1408_v5, %v1400_v3  ;;  %v1480_v1 = vld [vmem:[%s6537_s29 + $0x2210] sm:$0xff]  ;;  %v5056_v2 = vpack.c.bf16 %v1489_v59, %v1481_v58  ;;  %v1503_v5 = vld [vmem:[%s6537_s29 + $0x22c8] sm:$0xff] }
 0x14f   : > { %v1488_v3 = vld [vmem:[%s6537_s29 + $0x2250] sm:$0xff]  ;;  %v1558_v59 = vld [vmem:[%s6537_s29 + $0x2480] sm:$0xff] }
 0x150   : > { %4647 = vmatpush1.bf16.msra.mxu0 %v4646_v14  ;;  %v1422_v14 = vld [vmem:[%s6537_s29 + $0x2040] sm:$0xff] }
 0x151   : > { %5019 = vmatpush1.bf16.msra.mxu1 %v5018_v15  ;;  %4649 = vmatprep.subr.bf16.mxu0 %v4648_v16  ;;  %v1416_v15 = vld [vmem:[%s6537_s29 + $0x2010] sm:$0xff]  ;;  %v5040_v16 = vpack.c.bf16 %v1425_v9, %v1417_v8  ;;  %v4670_v23 = vpack.c.bf16 %v1422_v14, %v1414_v13  ;;  %v5058_v9 = vpack.c.bf16 %v1488_v3, %v1480_v1  ;;  %v1583_v1 = vld [vmem:[%s6537_s29 + $0x2548] sm:$0xff]  ;;  %v1585_v3 = vld [vmem:[%s6537_s29 + $0x2558] sm:$0xff] }
 0x152   : > { %5021 = vmatprep.subr.bf16.mxu1 %v5020_v20  ;;  %v1433_v20 = vld [vmem:[%s6537_s29 + $0x2098] sm:$0xff]  ;;  %v5042_v24 = vpack.c.bf16 %v1424_v17, %v1416_v15  ;;  %v1496_v13 = vld [vmem:[%s6537_s29 + $0x2290] sm:$0xff]  ;;  %v5060_v14 = vpack.c.bf16 %v1505_v7, %v1497_v6  ;;  %v1519_v17 = vld [vmem:[%s6537_s29 + $0x2348] sm:$0xff] }
 0x153   : > { %v5044_v29 = vpack.c.bf16 %v1441_v21, %v1433_v20  ;;  %v1504_v15 = vld [vmem:[%s6537_s29 + $0x22d0] sm:$0xff]  ;;  %v1574_v7 = vld [vmem:[%s6537_s29 + $0x2500] sm:$0xff] }
 0x154   : > { %4651 = vmatpush1.bf16.msra.mxu0 %v4650_v26  ;;  %v1430_v26 = vld [vmem:[%s6537_s29 + $0x2080] sm:$0xff]  ;;  %v5062_v21 = vpack.c.bf16 %v1504_v15, %v1496_v13  ;;  %v1599_v13 = vld [vmem:[%s6537_s29 + $0x25c8] sm:$0xff]  ;;  %v1601_v15 = vld [vmem:[%s6537_s29 + $0x25d8] sm:$0xff] }
 0x155   : > { %5023 = vmatpush1.bf16.msra.mxu1 %v5022_v27  ;;  %4653 = vmatprep.subr.bf16.mxu0 %v4652_v28  ;;  %v1438_v27 = vld [vmem:[%s6537_s29 + $0x20c0] sm:$0xff]  ;;  %v1432_v28 = vld [vmem:[%s6537_s29 + $0x2090] sm:$0xff] }
 0x156   : > { %5025 = vmatprep.subr.bf16.mxu1 %v5024_v32  ;;  %v1455_v32 = vld [vmem:[%s6537_s29 + $0x2148] sm:$0xff]  ;;  %v4674_v36 = vpack.c.bf16 %v1438_v27, %v1430_v26  ;;  %v5046_v37 = vpack.c.bf16 %v1440_v30, %v1432_v28  ;;  %v5064_v26 = vpack.c.bf16 %v1521_v19, %v1513_v18  ;;  %v1520_v27 = vld [vmem:[%s6537_s29 + $0x2350] sm:$0xff]  ;;  %v1529_v30 = vld [vmem:[%s6537_s29 + $0x2398] sm:$0xff] }
 0x157   : > { %v1527_v28 = vld [vmem:[%s6537_s29 + $0x2388] sm:$0xff]  ;;  %v1590_v19 = vld [vmem:[%s6537_s29 + $0x2580] sm:$0xff] }
 0x158   : > { %4655 = vmatpush1.bf16.msra.mxu0 %v4654_v38  ;;  %v4676_v38 = vpack.c.bf16 %v1455_v32, %v1447_v31  ;;  %v1537_v31 = vld [vmem:[%s6537_s29 + $0x23d8] sm:$0xff] }
 0x159   : > { %5027 = vmatpush1.bf16.msra.mxu1 %v5026_v39  ;;  %4657 = vmatprep.subr.bf16.mxu0 %v4656_v40  ;;  %v1446_v39 = vld [vmem:[%s6537_s29 + $0x2100] sm:$0xff] }
 0x15a   : > { %5029 = vmatprep.subr.bf16.mxu1 %v5028_v44  ;;  %v1454_v40 = vld [vmem:[%s6537_s29 + $0x2140] sm:$0xff]  ;;  %v1463_v44 = vld [vmem:[%s6537_s29 + $0x2188] sm:$0xff] }
 0x15b   : > { %v4678_v48 = vpack.c.bf16 %v1454_v40, %v1446_v39  ;;  %v1536_v39 = vld [vmem:[%s6537_s29 + $0x23d0] sm:$0xff]  ;;  %v1543_v40 = vld [vmem:[%s6537_s29 + $0x2408] sm:$0xff] }
 0x15c   : > { %4659 = vmatpush1.bf16.msra.mxu0 %v4658_v50  ;;  %v4680_v50 = vpack.c.bf16 %v1471_v45, %v1463_v44  ;;  %v4700_v46 = vpack.c.bf16 %v1551_v41, %v1543_v40 }
 0x15d   : > { %5031 = vmatpush1.bf16.msra.mxu1 %v5030_v51  ;;  %4661 = vmatprep.subr.bf16.mxu0 %v4660_v52  ;;  %v1462_v51 = vld [vmem:[%s6537_s29 + $0x2180] sm:$0xff] }
 0x15e   : > { %5033 = vmatprep.subr.bf16.mxu1 %v5032_v56  ;;  %v1470_v52 = vld [vmem:[%s6537_s29 + $0x21c0] sm:$0xff]  ;;  %v1479_v56 = vld [vmem:[%s6537_s29 + $0x2208] sm:$0xff] }
 0x15f   : > { %v4682_v60 = vpack.c.bf16 %v1470_v52, %v1462_v51  ;;  %v1552_v51 = vld [vmem:[%s6537_s29 + $0x2450] sm:$0xff]  ;;  %v1559_v52 = vld [vmem:[%s6537_s29 + $0x2488] sm:$0xff] }
 0x160   : > { %4663 = vmatpush1.bf16.msra.mxu0 %v4662_v62  ;;  %v4684_v62 = vpack.c.bf16 %v1487_v57, %v1479_v56  ;;  %v4704_v58 = vpack.c.bf16 %v1567_v53, %v1559_v52 }
 0x161   : > { %5035 = vmatpush1.bf16.msra.mxu1 %v5034_v63  ;;  %4665 = vmatprep.subr.bf16.mxu0 %v4664_v0  ;;  %v1478_v63 = vld [vmem:[%s6537_s29 + $0x2200] sm:$0xff] }
 0x162   : > { %5037 = vmatprep.subr.bf16.mxu1 %v5036_v4  ;;  %v1486_v0 = vld [vmem:[%s6537_s29 + $0x2240] sm:$0xff]  ;;  %v1495_v4 = vld [vmem:[%s6537_s29 + $0x2288] sm:$0xff] }
 0x163   : > { %v4686_v8 = vpack.c.bf16 %v1486_v0, %v1478_v63  ;;  %v1568_v63 = vld [vmem:[%s6537_s29 + $0x24d0] sm:$0xff]  ;;  %v1575_v0 = vld [vmem:[%s6537_s29 + $0x2508] sm:$0xff] }
 0x164   : > { %4667 = vmatpush1.bf16.msra.mxu0 %v4666_v10  ;;  %v4688_v10 = vpack.c.bf16 %v1503_v5, %v1495_v4  ;;  %v4708_v6 = vpack.c.bf16 %v1583_v1, %v1575_v0 }
 0x165   : > { %5039 = vmatpush1.bf16.msra.mxu1 %v5038_v11  ;;  %4669 = vmatprep.subr.bf16.mxu0 %v4668_v12  ;;  %v1494_v11 = vld [vmem:[%s6537_s29 + $0x2280] sm:$0xff] }
 0x166   : > { %5041 = vmatprep.subr.bf16.mxu1 %v5040_v16  ;;  %v1502_v12 = vld [vmem:[%s6537_s29 + $0x22c0] sm:$0xff]  ;;  %v1511_v16 = vld [vmem:[%s6537_s29 + $0x2308] sm:$0xff] }
 0x167   : > { %2210 = vmatmul.mubr.f32.vlgmr.msra.gmra.mrb[0].mxu0 %v384_v22  ;;  %v4690_v20 = vpack.c.bf16 %v1502_v12, %v1494_v11  ;;  %v1584_v11 = vld [vmem:[%s6537_s29 + $0x2550] sm:$0xff]  ;;  %v1591_v12 = vld [vmem:[%s6537_s29 + $0x2588] sm:$0xff] }
 0x168   : > { %4671 = vmatpush1.bf16.msra.mxu0 %v4670_v23  ;;  %2636 = vmatmul.mubr.f32.vlgmr.msra.gmra.mrb[0].mxu1 %v384_v22  ;;  %v4692_v22 = vpack.c.bf16 %v1519_v17, %v1511_v16  ;;  %v1510_v23 = vld [vmem:[%s6537_s29 + $0x2300] sm:$0xff]  ;;  %v4712_v18 = vpack.c.bf16 %v1599_v13, %v1591_v12 }
 0x169   : > { %5043 = vmatpush1.bf16.msra.mxu1 %v5042_v24  ;;  %4673 = vmatprep.subr.bf16.mxu0 %v4672_v25  ;;  %v1518_v24 = vld [vmem:[%s6537_s29 + $0x2340] sm:$0xff]  ;;  %v1512_v25 = vld [vmem:[%s6537_s29 + $0x2310] sm:$0xff] }
 0x16a   : > { %5045 = vmatprep.subr.bf16.mxu1 %v5044_v29  ;;  %2280 = vmatprep.mubr.f32.mxu0 %v387_v35  ;;  %v1535_v29 = vld [vmem:[%s6537_s29 + $0x23c8] sm:$0xff]  ;;  %v4694_v32 = vpack.c.bf16 %v1518_v24, %v1510_v23  ;;  %v5066_v33 = vpack.c.bf16 %v1520_v27, %v1512_v25  ;;  %v1600_v23 = vld [vmem:[%s6537_s29 + $0x25d0] sm:$0xff]  ;;  %v1617_v27 = vld [vmem:[%s6537_s29 + $0x2658] sm:$0xff] }
 0x16b   : > { %2706 = vmatprep.mubr.f32.mxu1 %v387_v35  ;;  %v4696_v34 = vpack.c.bf16 %v1535_v29, %v1527_v28  ;;  %v1526_v35 = vld [vmem:[%s6537_s29 + $0x2380] sm:$0xff]  ;;  %v1607_v24 = vld [vmem:[%s6537_s29 + $0x2608] sm:$0xff] }
 0x16c   : > { %4675 = vmatpush1.bf16.msra.mxu0 %v4674_v36  ;;  %v1534_v36 = vld [vmem:[%s6537_s29 + $0x23c0] sm:$0xff]  ;;  %v1615_v25 = vld [vmem:[%s6537_s29 + $0x2648] sm:$0xff] }
 0x16d   : > { %5047 = vmatpush1.bf16.msra.mxu1 %v5046_v37  ;;  %4677 = vmatprep.subr.bf16.mxu0 %v4676_v38  ;;  %v1528_v37 = vld [vmem:[%s6537_s29 + $0x2390] sm:$0xff]  ;;  %v5068_v38 = vpack.c.bf16 %v1537_v31, %v1529_v30  ;;  %v4698_v44 = vpack.c.bf16 %v1534_v36, %v1526_v35  ;;  %v4716_v30 = vpack.c.bf16 %v1615_v25, %v1607_v24  ;;  %v1606_v31 = vld [vmem:[%s6537_s29 + $0x2600] sm:$0xff]  ;;  %v1623_v36 = vld [vmem:[%s6537_s29 + $0x2688] sm:$0xff] }
 0x16e   : > { %5049 = vmatprep.subr.bf16.mxu1 %v5048_v42  ;;  %v1545_v42 = vld [vmem:[%s6537_s29 + $0x2418] sm:$0xff]  ;;  %v5070_v45 = vpack.c.bf16 %v1536_v39, %v1528_v37  ;;  %v1616_v35 = vld [vmem:[%s6537_s29 + $0x2650] sm:$0xff]  ;;  %v1631_v37 = vld [vmem:[%s6537_s29 + $0x26c8] sm:$0xff] }
 0x16f   : > { %v1633_v39 = vld [vmem:[%s6537_s29 + $0x26d8] sm:$0xff] }
 0x170   : > { %4679 = vmatpush1.bf16.msra.mxu0 %v4678_v48  ;;  %v1550_v48 = vld [vmem:[%s6537_s29 + $0x2440] sm:$0xff]  ;;  %v386_v24 = vld [vmem:[%s8385_s0 + $0x40] sm:$0xff] }
 0x171   : > { %5051 = vmatpush1.bf16.msra.mxu1 %v5050_v49  ;;  %4681 = vmatprep.subr.bf16.mxu0 %v4680_v50  ;;  %v1544_v49 = vld [vmem:[%s6537_s29 + $0x2410] sm:$0xff]  ;;  %v5072_v50 = vpack.c.bf16 %v1553_v43, %v1545_v42  ;;  %v4702_v56 = vpack.c.bf16 %v1550_v48, %v1542_v47  ;;  %v4720_v42 = vpack.c.bf16 %v1631_v37, %v1623_v36  ;;  %v1622_v43 = vld [vmem:[%s6537_s29 + $0x2680] sm:$0xff]  ;;  %v1639_v48 = vld [vmem:[%s6537_s29 + $0x2708] sm:$0xff] }
 0x172   : > { %5053 = vmatprep.subr.bf16.mxu1 %v5052_v54  ;;  %v1561_v54 = vld [vmem:[%s6537_s29 + $0x2498] sm:$0xff]  ;;  %v5074_v57 = vpack.c.bf16 %v1552_v51, %v1544_v49  ;;  %v1632_v47 = vld [vmem:[%s6537_s29 + $0x26d0] sm:$0xff]  ;;  %v1647_v49 = vld [vmem:[%s6537_s29 + $0x2748] sm:$0xff] }
 0x173   : > { %v1649_v51 = vld [vmem:[%s6537_s29 + $0x2758] sm:$0xff]  ;;  %v389_v37 = vld [vmem:[%s8385_s0 + $0x58] sm:$0xff] }
 0x174   : > { %4683 = vmatpush1.bf16.msra.mxu0 %v4682_v60  ;;  %v1566_v60 = vld [vmem:[%s6537_s29 + $0x24c0] sm:$0xff]  ;;  %v1713_v36 = vld [vmem:[%s6537_s29 + $0x2958] sm:$0xff] }
 0x175   : > { %5055 = vmatpush1.bf16.msra.mxu1 %v5054_v61  ;;  %4685 = vmatprep.subr.bf16.mxu0 %v4684_v62  ;;  %v1560_v61 = vld [vmem:[%s6537_s29 + $0x2490] sm:$0xff]  ;;  %v5076_v62 = vpack.c.bf16 %v1569_v55, %v1561_v54  ;;  %v4706_v4 = vpack.c.bf16 %v1566_v60, %v1558_v59  ;;  %v4724_v54 = vpack.c.bf16 %v1647_v49, %v1639_v48  ;;  %v1638_v55 = vld [vmem:[%s6537_s29 + $0x2700] sm:$0xff]  ;;  %v1655_v60 = vld [vmem:[%s6537_s29 + $0x2788] sm:$0xff] }
 0x176   : > { %5057 = vmatprep.subr.bf16.mxu1 %v5056_v2  ;;  %v1577_v2 = vld [vmem:[%s6537_s29 + $0x2518] sm:$0xff]  ;;  %v5078_v5 = vpack.c.bf16 %v1568_v63, %v1560_v61  ;;  %v1648_v59 = vld [vmem:[%s6537_s29 + $0x2750] sm:$0xff]  ;;  %v1663_v61 = vld [vmem:[%s6537_s29 + $0x27c8] sm:$0xff] }
 0x177   : > { %v1665_v63 = vld [vmem:[%s6537_s29 + $0x27d8] sm:$0xff] }
 0x178   : > { %4687 = vmatpush1.bf16.msra.mxu0 %v4686_v8  ;;  %v1582_v8 = vld [vmem:[%s6537_s29 + $0x2540] sm:$0xff]  ;;  %v1721_v48 = vld [vmem:[%s6537_s29 + $0x2998] sm:$0xff] }
 0x179   : > { %5059 = vmatpush1.bf16.msra.mxu1 %v5058_v9  ;;  %4689 = vmatprep.subr.bf16.mxu0 %v4688_v10  ;;  %v1576_v9 = vld [vmem:[%s6537_s29 + $0x2510] sm:$0xff]  ;;  %v5080_v10 = vpack.c.bf16 %v1585_v3, %v1577_v2  ;;  %v4710_v16 = vpack.c.bf16 %v1582_v8, %v1574_v7  ;;  %v4728_v2 = vpack.c.bf16 %v1663_v61, %v1655_v60  ;;  %v1654_v3 = vld [vmem:[%s6537_s29 + $0x2780] sm:$0xff]  ;;  %v1671_v8 = vld [vmem:[%s6537_s29 + $0x2808] sm:$0xff] }
 0x17a   : > { %5061 = vmatprep.subr.bf16.mxu1 %v5060_v14  ;;  %v1593_v14 = vld [vmem:[%s6537_s29 + $0x2598] sm:$0xff]  ;;  %v5082_v17 = vpack.c.bf16 %v1584_v11, %v1576_v9  ;;  %v1664_v7 = vld [vmem:[%s6537_s29 + $0x27d0] sm:$0xff]  ;;  %v1679_v9 = vld [vmem:[%s6537_s29 + $0x2848] sm:$0xff] }
 0x17b   : > { %v1681_v11 = vld [vmem:[%s6537_s29 + $0x2858] sm:$0xff] }
 0x17c   : > { %4691 = vmatpush1.bf16.msra.mxu0 %v4690_v20  ;;  %v1598_v20 = vld [vmem:[%s6537_s29 + $0x25c0] sm:$0xff]  ;;  %v1729_v49 = vld [vmem:[%s6537_s29 + $0x29d8] sm:$0xff] }
 0x17d   : > { %5063 = vmatpush1.bf16.msra.mxu1 %v5062_v21  ;;  %4693 = vmatprep.subr.bf16.mxu0 %v4692_v22  ;;  %v1592_v21 = vld [vmem:[%s6537_s29 + $0x2590] sm:$0xff]  ;;  %v5084_v22 = vpack.c.bf16 %v1601_v15, %v1593_v14  ;;  %v4714_v28 = vpack.c.bf16 %v1598_v20, %v1590_v19  ;;  %v4732_v14 = vpack.c.bf16 %v1679_v9, %v1671_v8  ;;  %v1670_v15 = vld [vmem:[%s6537_s29 + $0x2800] sm:$0xff]  ;;  %v1687_v20 = vld [vmem:[%s6537_s29 + $0x2888] sm:$0xff] }
 0x17e   : > { %5065 = vmatprep.subr.bf16.mxu1 %v5064_v26  ;;  %v1609_v26 = vld [vmem:[%s6537_s29 + $0x2618] sm:$0xff]  ;;  %v5086_v29 = vpack.c.bf16 %v1600_v23, %v1592_v21  ;;  %v1680_v19 = vld [vmem:[%s6537_s29 + $0x2850] sm:$0xff]  ;;  %v1695_v21 = vld [vmem:[%s6537_s29 + $0x28c8] sm:$0xff] }
 0x17f   : > { %v1697_v23 = vld [vmem:[%s6537_s29 + $0x28d8] sm:$0xff] }
 0x180   : > { %4695 = vmatpush1.bf16.msra.mxu0 %v4694_v32  ;;  %v1614_v32 = vld [vmem:[%s6537_s29 + $0x2640] sm:$0xff]  ;;  %v1737_v60 = vld [vmem:[%s6537_s29 + $0x2a18] sm:$0xff] }
 0x181   : > { %5067 = vmatpush1.bf16.msra.mxu1 %v5066_v33  ;;  %4697 = vmatprep.subr.bf16.mxu0 %v4696_v34  ;;  %v1608_v33 = vld [vmem:[%s6537_s29 + $0x2610] sm:$0xff]  ;;  %v5088_v34 = vpack.c.bf16 %v1617_v27, %v1609_v26  ;;  %v4718_v40 = vpack.c.bf16 %v1614_v32, %v1606_v31  ;;  %v4736_v27 = vpack.c.bf16 %v1695_v21, %v1687_v20  ;;  %v1745_v61 = vld [vmem:[%s6537_s29 + $0x2a58] sm:$0xff] }
 0x182   : > { %5069 = vmatprep.subr.bf16.mxu1 %v5068_v38  ;;  %v1625_v38 = vld [vmem:[%s6537_s29 + $0x2698] sm:$0xff]  ;;  %v5090_v41 = vpack.c.bf16 %v1616_v35, %v1608_v33  ;;  %v1696_v32 = vld [vmem:[%s6537_s29 + $0x28d0] sm:$0xff]  ;;  %v1703_v33 = vld [vmem:[%s6537_s29 + $0x2908] sm:$0xff] }
 0x183   : > { %v1705_v35 = vld [vmem:[%s6537_s29 + $0x2918] sm:$0xff] }
 0x184   : > { %4699 = vmatpush1.bf16.msra.mxu0 %v4698_v44  ;;  %v1630_v44 = vld [vmem:[%s6537_s29 + $0x26c0] sm:$0xff]  ;;  %v1753_v8 = vld [vmem:[%s6537_s29 + $0x2a98] sm:$0xff] }
 0x185   : > { %5071 = vmatpush1.bf16.msra.mxu1 %v5070_v45  ;;  %4701 = vmatprep.subr.bf16.mxu0 %v4700_v46  ;;  %v1624_v45 = vld [vmem:[%s6537_s29 + $0x2690] sm:$0xff]  ;;  %v5092_v46 = vpack.c.bf16 %v1633_v39, %v1625_v38  ;;  %v4722_v52 = vpack.c.bf16 %v1630_v44, %v1622_v43  ;;  %v5112_v44 = vpack.c.bf16 %v1713_v36, %v1705_v35  ;;  %v1761_v9 = vld [vmem:[%s6537_s29 + $0x2ad8] sm:$0xff] }
 0x186   : > { %5073 = vmatprep.subr.bf16.mxu1 %v5072_v50  ;;  %v1641_v50 = vld [vmem:[%s6537_s29 + $0x2718] sm:$0xff]  ;;  %v5094_v53 = vpack.c.bf16 %v1632_v47, %v1624_v45  ;;  %v1704_v43 = vld [vmem:[%s6537_s29 + $0x2910] sm:$0xff]  ;;  %v1727_v47 = vld [vmem:[%s6537_s29 + $0x29c8] sm:$0xff] }
 0x187   : > { %v1712_v45 = vld [vmem:[%s6537_s29 + $0x2950] sm:$0xff]  ;;  %v1769_v20 = vld [vmem:[%s6537_s29 + $0x2b18] sm:$0xff] }
 0x188   : > { %4703 = vmatpush1.bf16.msra.mxu0 %v4702_v56  ;;  %v1646_v56 = vld [vmem:[%s6537_s29 + $0x2740] sm:$0xff]  ;;  %v1777_v21 = vld [vmem:[%s6537_s29 + $0x2b58] sm:$0xff] }
 0x189   : > { %5075 = vmatpush1.bf16.msra.mxu1 %v5074_v57  ;;  %4705 = vmatprep.subr.bf16.mxu0 %v4704_v58  ;;  %v1640_v57 = vld [vmem:[%s6537_s29 + $0x2710] sm:$0xff]  ;;  %v5096_v58 = vpack.c.bf16 %v1649_v51, %v1641_v50  ;;  %v4726_v0 = vpack.c.bf16 %v1646_v56, %v1638_v55  ;;  %v5114_v51 = vpack.c.bf16 %v1712_v45, %v1704_v43  ;;  %v1807_v43 = vld [vmem:[%s6537_s29 + $0x2c48] sm:$0xff]  ;;  %v1809_v45 = vld [vmem:[%s6537_s29 + $0x2c58] sm:$0xff] }
 0x18a   : > { %5077 = vmatprep.subr.bf16.mxu1 %v5076_v62  ;;  %v1657_v62 = vld [vmem:[%s6537_s29 + $0x2798] sm:$0xff]  ;;  %v5098_v1 = vpack.c.bf16 %v1648_v59, %v1640_v57  ;;  %v1720_v55 = vld [vmem:[%s6537_s29 + $0x2990] sm:$0xff]  ;;  %v5116_v56 = vpack.c.bf16 %v1729_v49, %v1721_v48  ;;  %v1743_v59 = vld [vmem:[%s6537_s29 + $0x2a48] sm:$0xff] }
 0x18b   : > { %v1728_v57 = vld [vmem:[%s6537_s29 + $0x29d0] sm:$0xff]  ;;  %v1798_v49 = vld [vmem:[%s6537_s29 + $0x2c00] sm:$0xff] }
 0x18c   : > { %4707 = vmatpush1.bf16.msra.mxu0 %v4706_v4  ;;  %v1662_v4 = vld [vmem:[%s6537_s29 + $0x27c0] sm:$0xff] }
 0x18d   : > { %5079 = vmatpush1.bf16.msra.mxu1 %v5078_v5  ;;  %4709 = vmatprep.subr.bf16.mxu0 %v4708_v6  ;;  %v1656_v5 = vld [vmem:[%s6537_s29 + $0x2790] sm:$0xff]  ;;  %v5100_v6 = vpack.c.bf16 %v1665_v63, %v1657_v62  ;;  %v4730_v12 = vpack.c.bf16 %v1662_v4, %v1654_v3  ;;  %v5118_v63 = vpack.c.bf16 %v1728_v57, %v1720_v55  ;;  %v1823_v55 = vld [vmem:[%s6537_s29 + $0x2cc8] sm:$0xff]  ;;  %v1825_v57 = vld [vmem:[%s6537_s29 + $0x2cd8] sm:$0xff] }
 0x18e   : > { %5081 = vmatprep.subr.bf16.mxu1 %v5080_v10  ;;  %v1673_v10 = vld [vmem:[%s6537_s29 + $0x2818] sm:$0xff]  ;;  %v5102_v13 = vpack.c.bf16 %v1664_v7, %v1656_v5  ;;  %v1736_v3 = vld [vmem:[%s6537_s29 + $0x2a10] sm:$0xff]  ;;  %v5120_v4 = vpack.c.bf16 %v1745_v61, %v1737_v60  ;;  %v1759_v7 = vld [vmem:[%s6537_s29 + $0x2ac8] sm:$0xff] }
 0x18f   : > { %v1744_v5 = vld [vmem:[%s6537_s29 + $0x2a50] sm:$0xff]  ;;  %v1814_v61 = vld [vmem:[%s6537_s29 + $0x2c80] sm:$0xff] }
 0x190   : > { %4711 = vmatpush1.bf16.msra.mxu0 %v4710_v16  ;;  %v1678_v16 = vld [vmem:[%s6537_s29 + $0x2840] sm:$0xff] }
 0x191   : > { %5083 = vmatpush1.bf16.msra.mxu1 %v5082_v17  ;;  %4713 = vmatprep.subr.bf16.mxu0 %v4712_v18  ;;  %v1672_v17 = vld [vmem:[%s6537_s29 + $0x2810] sm:$0xff]  ;;  %v5104_v18 = vpack.c.bf16 %v1681_v11, %v1673_v10  ;;  %v4734_v25 = vpack.c.bf16 %v1678_v16, %v1670_v15  ;;  %v5122_v11 = vpack.c.bf16 %v1744_v5, %v1736_v3  ;;  %v1839_v3 = vld [vmem:[%s6537_s29 + $0x2d48] sm:$0xff]  ;;  %v1841_v5 = vld [vmem:[%s6537_s29 + $0x2d58] sm:$0xff] }
 0x192   : > { %5085 = vmatprep.subr.bf16.mxu1 %v5084_v22  ;;  %v1689_v22 = vld [vmem:[%s6537_s29 + $0x2898] sm:$0xff]  ;;  %v5106_v26 = vpack.c.bf16 %v1680_v19, %v1672_v17  ;;  %v1752_v15 = vld [vmem:[%s6537_s29 + $0x2a90] sm:$0xff]  ;;  %v5124_v16 = vpack.c.bf16 %v1761_v9, %v1753_v8  ;;  %v1775_v19 = vld [vmem:[%s6537_s29 + $0x2b48] sm:$0xff] }
 0x193   : > { %v5108_v31 = vpack.c.bf16 %v1697_v23, %v1689_v22  ;;  %v1760_v17 = vld [vmem:[%s6537_s29 + $0x2ad0] sm:$0xff]  ;;  %v1830_v9 = vld [vmem:[%s6537_s29 + $0x2d00] sm:$0xff] }
 0x194   : > { %4715 = vmatpush1.bf16.msra.mxu0 %v4714_v28  ;;  %v1686_v28 = vld [vmem:[%s6537_s29 + $0x2880] sm:$0xff]  ;;  %v5126_v23 = vpack.c.bf16 %v1760_v17, %v1752_v15  ;;  %v1855_v15 = vld [vmem:[%s6537_s29 + $0x2dc8] sm:$0xff]  ;;  %v1857_v17 = vld [vmem:[%s6537_s29 + $0x2dd8] sm:$0xff] }
 0x195   : > { %5087 = vmatpush1.bf16.msra.mxu1 %v5086_v29  ;;  %4717 = vmatprep.subr.bf16.mxu0 %v4716_v30  ;;  %v1694_v29 = vld [vmem:[%s6537_s29 + $0x28c0] sm:$0xff]  ;;  %v1688_v30 = vld [vmem:[%s6537_s29 + $0x2890] sm:$0xff] }
 0x196   : > { %5089 = vmatprep.subr.bf16.mxu1 %v5088_v34  ;;  %v1711_v34 = vld [vmem:[%s6537_s29 + $0x2948] sm:$0xff]  ;;  %v4738_v38 = vpack.c.bf16 %v1694_v29, %v1686_v28  ;;  %v5110_v39 = vpack.c.bf16 %v1696_v32, %v1688_v30  ;;  %v5128_v28 = vpack.c.bf16 %v1777_v21, %v1769_v20  ;;  %v1776_v29 = vld [vmem:[%s6537_s29 + $0x2b50] sm:$0xff]  ;;  %v1785_v32 = vld [vmem:[%s6537_s29 + $0x2b98] sm:$0xff] }
 0x197   : > { %v1783_v30 = vld [vmem:[%s6537_s29 + $0x2b88] sm:$0xff]  ;;  %v1846_v21 = vld [vmem:[%s6537_s29 + $0x2d80] sm:$0xff] }
 0x198   : > { %4719 = vmatpush1.bf16.msra.mxu0 %v4718_v40  ;;  %v4740_v40 = vpack.c.bf16 %v1711_v34, %v1703_v33  ;;  %v1793_v33 = vld [vmem:[%s6537_s29 + $0x2bd8] sm:$0xff] }
 0x199   : > { %5091 = vmatpush1.bf16.msra.mxu1 %v5090_v41  ;;  %4721 = vmatprep.subr.bf16.mxu0 %v4720_v42  ;;  %v1702_v41 = vld [vmem:[%s6537_s29 + $0x2900] sm:$0xff] }
 0x19a   : > { %5093 = vmatprep.subr.bf16.mxu1 %v5092_v46  ;;  %v1710_v42 = vld [vmem:[%s6537_s29 + $0x2940] sm:$0xff]  ;;  %v1719_v46 = vld [vmem:[%s6537_s29 + $0x2988] sm:$0xff] }
 0x19b   : > { %v4742_v50 = vpack.c.bf16 %v1710_v42, %v1702_v41  ;;  %v1792_v41 = vld [vmem:[%s6537_s29 + $0x2bd0] sm:$0xff]  ;;  %v1799_v42 = vld [vmem:[%s6537_s29 + $0x2c08] sm:$0xff] }
 0x19c   : > { %4723 = vmatpush1.bf16.msra.mxu0 %v4722_v52  ;;  %v4744_v52 = vpack.c.bf16 %v1727_v47, %v1719_v46  ;;  %v4764_v48 = vpack.c.bf16 %v1807_v43, %v1799_v42  ;;  %v395_v42 = vld [vmem:[%s6537_s29 + $0x28] sm:$0xff]  ;;  %v1878_v43 = vld [vmem:[%s6537_s29 + $0x2e80] sm:$0xff] }
 0x19d   : > { %5095 = vmatpush1.bf16.msra.mxu1 %v5094_v53  ;;  %4725 = vmatprep.subr.bf16.mxu0 %v4724_v54  ;;  %v1718_v53 = vld [vmem:[%s6537_s29 + $0x2980] sm:$0xff] }
 0x19e   : > { %5097 = vmatprep.subr.bf16.mxu1 %v5096_v58  ;;  %v1726_v54 = vld [vmem:[%s6537_s29 + $0x29c0] sm:$0xff]  ;;  %v1735_v58 = vld [vmem:[%s6537_s29 + $0x2a08] sm:$0xff] }
 0x19f   : > { %v4746_v62 = vpack.c.bf16 %v1726_v54, %v1718_v53  ;;  %v1808_v53 = vld [vmem:[%s6537_s29 + $0x2c50] sm:$0xff]  ;;  %v1815_v54 = vld [vmem:[%s6537_s29 + $0x2c88] sm:$0xff] }
 0x1a0   : > { %4727 = vmatpush1.bf16.msra.mxu0 %v4726_v0  ;;  %v4748_v0 = vpack.c.bf16 %v1743_v59, %v1735_v58  ;;  %v4768_v60 = vpack.c.bf16 %v1823_v55, %v1815_v54  ;;  %v388_v54 = vld [vmem:[%s8385_s0 + $0x50] sm:$0xff] }
 0x1a1   : > { %5099 = vmatpush1.bf16.msra.mxu1 %v5098_v1  ;;  %4729 = vmatprep.subr.bf16.mxu0 %v4728_v2  ;;  %v1734_v1 = vld [vmem:[%s6537_s29 + $0x2a00] sm:$0xff] }
 0x1a2   : > { %5101 = vmatprep.subr.bf16.mxu1 %v5100_v6  ;;  %v1742_v2 = vld [vmem:[%s6537_s29 + $0x2a40] sm:$0xff]  ;;  %v1751_v6 = vld [vmem:[%s6537_s29 + $0x2a88] sm:$0xff] }
 0x1a3   : > { %v4750_v10 = vpack.c.bf16 %v1742_v2, %v1734_v1  ;;  %v1824_v1 = vld [vmem:[%s6537_s29 + $0x2cd0] sm:$0xff]  ;;  %v1831_v2 = vld [vmem:[%s6537_s29 + $0x2d08] sm:$0xff] }
 0x1a4   : > { %4731 = vmatpush1.bf16.msra.mxu0 %v4730_v12  ;;  %v4752_v12 = vpack.c.bf16 %v1759_v7, %v1751_v6  ;;  %v4772_v8 = vpack.c.bf16 %v1839_v3, %v1831_v2  ;;  %v420_v2 = vld [vmem:[%s6537_s29 + $0xf0] sm:$0xff]  ;;  %v427_v3 = vld [vmem:[%s6537_s29 + $0x128] sm:$0xff] }
 0x1a5   : > { %5103 = vmatpush1.bf16.msra.mxu1 %v5102_v13  ;;  %4733 = vmatprep.subr.bf16.mxu0 %v4732_v14  ;;  %v1750_v13 = vld [vmem:[%s6537_s29 + $0x2a80] sm:$0xff] }
 0x1a6   : > { %5105 = vmatprep.subr.bf16.mxu1 %v5104_v18  ;;  %v1758_v14 = vld [vmem:[%s6537_s29 + $0x2ac0] sm:$0xff]  ;;  %v1767_v18 = vld [vmem:[%s6537_s29 + $0x2b08] sm:$0xff] }
 0x1a7   : > { %2281 = vmatmul.mubr.f32.vlgmr.msra.gmra.mrb[0].mxu0 %v386_v24  ;;  %v4754_v22 = vpack.c.bf16 %v1758_v14, %v1750_v13  ;;  %v1840_v13 = vld [vmem:[%s6537_s29 + $0x2d50] sm:$0xff]  ;;  %v1847_v14 = vld [vmem:[%s6537_s29 + $0x2d88] sm:$0xff] }
 0x1a8   : > { %4735 = vmatpush1.bf16.msra.mxu0 %v4734_v25  ;;  %2707 = vmatmul.mubr.f32.vlgmr.msra.gmra.mrb[0].mxu1 %v386_v24  ;;  %v4756_v24 = vpack.c.bf16 %v1775_v19, %v1767_v18  ;;  %v1766_v25 = vld [vmem:[%s6537_s29 + $0x2b00] sm:$0xff]  ;;  %v4776_v20 = vpack.c.bf16 %v1855_v15, %v1847_v14  ;;  %v436_v14 = vld [vmem:[%s6537_s29 + $0x170] sm:$0xff]  ;;  %v443_v15 = vld [vmem:[%s6537_s29 + $0x1a8] sm:$0xff] }
 0x1a9   : > { %5107 = vmatpush1.bf16.msra.mxu1 %v5106_v26  ;;  %4737 = vmatprep.subr.bf16.mxu0 %v4736_v27  ;;  %v1774_v26 = vld [vmem:[%s6537_s29 + $0x2b40] sm:$0xff]  ;;  %v1768_v27 = vld [vmem:[%s6537_s29 + $0x2b10] sm:$0xff] }
 0x1aa   : > { %5109 = vmatprep.subr.bf16.mxu1 %v5108_v31  ;;  %4262 = vmatprep.mubr.msk.f32.mxu0 %vm1928_vm1, %v389_v37  ;;  %v1791_v31 = vld [vmem:[%s6537_s29 + $0x2bc8] sm:$0xff]  ;;  %v4758_v34 = vpack.c.bf16 %v1774_v26, %v1766_v25  ;;  %v5130_v35 = vpack.c.bf16 %v1776_v29, %v1768_v27  ;;  %v1856_v25 = vld [vmem:[%s6537_s29 + $0x2dd0] sm:$0xff]  ;;  %v1873_v29 = vld [vmem:[%s6537_s29 + $0x2e58] sm:$0xff] }
 0x1ab   : > { %4263 = vmatprep.mubr.msk.f32.mxu1 %vm1928_vm1, %v389_v37  ;;  %v4760_v36 = vpack.c.bf16 %v1791_v31, %v1783_v30  ;;  %v1782_v37 = vld [vmem:[%s6537_s29 + $0x2b80] sm:$0xff]  ;;  %v1863_v26 = vld [vmem:[%s6537_s29 + $0x2e08] sm:$0xff] }
 0x1ac   : > { %4739 = vmatpush1.bf16.msra.mxu0 %v4738_v38  ;;  %v1790_v38 = vld [vmem:[%s6537_s29 + $0x2bc0] sm:$0xff]  ;;  %v1871_v27 = vld [vmem:[%s6537_s29 + $0x2e48] sm:$0xff] }
 0x1ad   : > { %5111 = vmatpush1.bf16.msra.mxu1 %v5110_v39  ;;  %4741 = vmatprep.subr.bf16.mxu0 %v4740_v40  ;;  %v1784_v39 = vld [vmem:[%s6537_s29 + $0x2b90] sm:$0xff]  ;;  %v5132_v40 = vpack.c.bf16 %v1793_v33, %v1785_v32  ;;  %v4762_v46 = vpack.c.bf16 %v1790_v38, %v1782_v37  ;;  %v4780_v32 = vpack.c.bf16 %v1871_v27, %v1863_v26  ;;  %v1862_v33 = vld [vmem:[%s6537_s29 + $0x2e00] sm:$0xff] }
 0x1ae   : > { %5113 = vmatprep.subr.bf16.mxu1 %v5112_v44  ;;  %v1801_v44 = vld [vmem:[%s6537_s29 + $0x2c18] sm:$0xff]  ;;  %v5134_v47 = vpack.c.bf16 %v1792_v41, %v1784_v39  ;;  %v1872_v37 = vld [vmem:[%s6537_s29 + $0x2e50] sm:$0xff] }
 0x1af   : > { %v1881_v41 = vld [vmem:[%s6537_s29 + $0x2e98] sm:$0xff]  ;;  %v452_v27 = vld [vmem:[%s6537_s29 + $0x1f0] sm:$0xff] }
 0x1b0   : > { %4743 = vmatpush1.bf16.msra.mxu0 %v4742_v50  ;;  %v1806_v50 = vld [vmem:[%s6537_s29 + $0x2c40] sm:$0xff] }
 0x1b1   : > { %5115 = vmatpush1.bf16.msra.mxu1 %v5114_v51  ;;  %4745 = vmatprep.subr.bf16.mxu0 %v4744_v52  ;;  %v1800_v51 = vld [vmem:[%s6537_s29 + $0x2c10] sm:$0xff]  ;;  %v5136_v52 = vpack.c.bf16 %v1809_v45, %v1801_v44  ;;  %v4766_v58 = vpack.c.bf16 %v1806_v50, %v1798_v49  ;;  %v403_v44 = vld [vmem:[%s6537_s29 + $0x68] sm:$0xff]  ;;  %v397_v45 = vld [vmem:[%s6537_s29 + $0x38] sm:$0xff] }
 0x1b2   : > { %5117 = vmatprep.subr.bf16.mxu1 %v5116_v56  ;;  %v1817_v56 = vld [vmem:[%s6537_s29 + $0x2c98] sm:$0xff]  ;;  %v5138_v59 = vpack.c.bf16 %v1808_v53, %v1800_v51  ;;  %v402_v49 = vld [vmem:[%s6537_s29 + $0x60] sm:$0xff]  ;;  %v396_v50 = vld [vmem:[%s6537_s29 + $0x30] sm:$0xff]  ;;  %v5156_v55 = vpack.c.bf16 %v403_v44, %v395_v42 }
 0x1b3   : > { %v404_v51 = vld [vmem:[%s6537_s29 + $0x70] sm:$0xff]  ;;  %v419_v53 = vld [vmem:[%s6537_s29 + $0xe8] sm:$0xff]  ;;  %v477_v42 = vld [vmem:[%s6537_s29 + $0x2b8] sm:$0xff] }
 0x1b4   : > { %4747 = vmatpush1.bf16.msra.mxu0 %v4746_v62  ;;  %v1822_v62 = vld [vmem:[%s6537_s29 + $0x2cc0] sm:$0xff] }
 0x1b5   : > { %5119 = vmatpush1.bf16.msra.mxu1 %v5118_v63  ;;  %4749 = vmatprep.subr.bf16.mxu0 %v4748_v0  ;;  %v1816_v63 = vld [vmem:[%s6537_s29 + $0x2c90] sm:$0xff]  ;;  %v5140_v0 = vpack.c.bf16 %v1825_v57, %v1817_v56  ;;  %v4770_v6 = vpack.c.bf16 %v1822_v62, %v1814_v61  ;;  %v413_v56 = vld [vmem:[%s6537_s29 + $0xb8] sm:$0xff]  ;;  %v410_v62 = vld [vmem:[%s6537_s29 + $0xa0] sm:$0xff] }
 0x1b6   : > { %5121 = vmatprep.subr.bf16.mxu1 %v5120_v4  ;;  %v1833_v4 = vld [vmem:[%s6537_s29 + $0x2d18] sm:$0xff]  ;;  %v5142_v7 = vpack.c.bf16 %v1824_v1, %v1816_v63  ;;  %v418_v63 = vld [vmem:[%s6537_s29 + $0xe0] sm:$0xff] }
 0x1b7   : > { %v421_v57 = vld [vmem:[%s6537_s29 + $0xf8] sm:$0xff] }
 0x1b8   : > { %4751 = vmatpush1.bf16.msra.mxu0 %v4750_v10  ;;  %v1838_v10 = vld [vmem:[%s6537_s29 + $0x2d40] sm:$0xff]  ;;  %v5532_v1 = vpack.c.bf16 %v421_v57, %v413_v56 }
 0x1b9   : > { %5123 = vmatpush1.bf16.msra.mxu1 %v5122_v11  ;;  %4753 = vmatprep.subr.bf16.mxu0 %v4752_v12  ;;  %v1832_v11 = vld [vmem:[%s6537_s29 + $0x2d10] sm:$0xff]  ;;  %v5144_v12 = vpack.c.bf16 %v1841_v5, %v1833_v4  ;;  %v4774_v18 = vpack.c.bf16 %v1838_v10, %v1830_v9  ;;  %v435_v4 = vld [vmem:[%s6537_s29 + $0x168] sm:$0xff]  ;;  %v429_v5 = vld [vmem:[%s6537_s29 + $0x138] sm:$0xff] }
 0x1ba   : > { %5125 = vmatprep.subr.bf16.mxu1 %v5124_v16  ;;  %v1849_v16 = vld [vmem:[%s6537_s29 + $0x2d98] sm:$0xff]  ;;  %v5146_v19 = vpack.c.bf16 %v1840_v13, %v1832_v11  ;;  %v5164_v9 = vpack.c.bf16 %v435_v4, %v427_v3  ;;  %v426_v10 = vld [vmem:[%s6537_s29 + $0x120] sm:$0xff] }
 0x1bb   : > { %v434_v11 = vld [vmem:[%s6537_s29 + $0x160] sm:$0xff]  ;;  %v517_v3 = vld [vmem:[%s6537_s29 + $0x3f8] sm:$0xff] }
 0x1bc   : > { %4755 = vmatpush1.bf16.msra.mxu0 %v4754_v22  ;;  %v1854_v22 = vld [vmem:[%s6537_s29 + $0x2dc0] sm:$0xff] }
 0x1bd   : > { %5127 = vmatpush1.bf16.msra.mxu1 %v5126_v23  ;;  %4757 = vmatprep.subr.bf16.mxu0 %v4756_v24  ;;  %v1848_v23 = vld [vmem:[%s6537_s29 + $0x2d90] sm:$0xff]  ;;  %v5148_v24 = vpack.c.bf16 %v1857_v17, %v1849_v16  ;;  %v4778_v30 = vpack.c.bf16 %v1854_v22, %v1846_v21  ;;  %v451_v16 = vld [vmem:[%s6537_s29 + $0x1e8] sm:$0xff]  ;;  %v6187_v17 = vld [vmem:[%s8385_s0 + $0x8] sm:$0xff] }
 0x1be   : > { %5129 = vmatprep.subr.bf16.mxu1 %v5128_v28  ;;  %v1865_v28 = vld [vmem:[%s6537_s29 + $0x2e18] sm:$0xff]  ;;  %v5150_v31 = vpack.c.bf16 %v1856_v25, %v1848_v23  ;;  %v5168_v22 = vpack.c.bf16 %v451_v16, %v443_v15  ;;  %v442_v23 = vld [vmem:[%s6537_s29 + $0x1a0] sm:$0xff]  ;;  %v444_v25 = vld [vmem:[%s6537_s29 + $0x1b0] sm:$0xff] }
 0x1bf   : > { %v533_v15 = vld [vmem:[%s6537_s29 + $0x478] sm:$0xff] }
 0x1c0   : > { %4759 = vmatpush1.bf16.msra.mxu0 %v4758_v34  ;;  %v1870_v34 = vld [vmem:[%s6537_s29 + $0x2e40] sm:$0xff] }
 0x1c1   : > { %5131 = vmatpush1.bf16.msra.mxu1 %v5130_v35  ;;  %4761 = vmatprep.subr.bf16.mxu0 %v4760_v36  ;;  %v5152_v35 = vpack.c.bf16 %v1873_v29, %v1865_v28  ;;  %v1864_v36 = vld [vmem:[%s6537_s29 + $0x2e10] sm:$0xff]  ;;  %v4782_v38 = vpack.c.bf16 %v1870_v34, %v1862_v33  ;;  %v459_v28 = vld [vmem:[%s6537_s29 + $0x228] sm:$0xff]  ;;  %v5542_v33 = vpack.c.bf16 %v452_v27, %v444_v25  ;;  %v549_v27 = vld [vmem:[%s6537_s29 + $0x4f8] sm:$0xff] }
 0x1c2   : > { %5133 = vmatprep.subr.bf16.mxu1 %v5132_v40  ;;  %v5154_v39 = vpack.c.bf16 %v1872_v37, %v1864_v36  ;;  %v1879_v40 = vld [vmem:[%s6537_s29 + $0x2e88] sm:$0xff]  ;;  %v466_v36 = vld [vmem:[%s6537_s29 + $0x260] sm:$0xff]  ;;  %v460_v37 = vld [vmem:[%s6537_s29 + $0x230] sm:$0xff] }
 0x1c3   : > { %v467_v29 = vld [vmem:[%s6537_s29 + $0x268] sm:$0xff] }
 0x1c4   : > { %4763 = vmatpush1.bf16.msra.mxu0 %v4762_v46  ;;  %v405_v46 = vld [vmem:[%s6537_s29 + $0x78] sm:$0xff]  ;;  %v5172_v34 = vpack.c.bf16 %v467_v29, %v459_v28  ;;  %v547_v25 = vld [vmem:[%s6537_s29 + $0x4e8] sm:$0xff] }
 0x1c5   : > { %5135 = vmatpush1.bf16.msra.mxu1 %v5134_v47  ;;  %4765 = vmatprep.subr.bf16.mxu0 %v4764_v48  ;;  %v1880_v47 = vld [vmem:[%s6537_s29 + $0x2e90] sm:$0xff]  ;;  %v394_v48 = vld [vmem:[%s6537_s29 + $0x20] sm:$0xff] }
 0x1c6   : > { %5137 = vmatprep.subr.bf16.mxu1 %v5136_v52  ;;  %v411_v52 = vld [vmem:[%s6537_s29 + $0xa8] sm:$0xff] }
 0x1c7   : > { %v5160_v61 = vpack.c.bf16 %v419_v53, %v411_v52  ;;  %v491_v52 = vld [vmem:[%s6537_s29 + $0x328] sm:$0xff] }
 0x1c8   : > { %4767 = vmatpush1.bf16.msra.mxu0 %v4766_v58  ;;  %v5528_v58 = vpack.c.bf16 %v405_v46, %v397_v45  ;;  %v499_v53 = vld [vmem:[%s6537_s29 + $0x368] sm:$0xff] }
 0x1c9   : > { %5139 = vmatpush1.bf16.msra.mxu1 %v5138_v59  ;;  %4769 = vmatprep.subr.bf16.mxu0 %v4768_v60  ;;  %v5158_v59 = vpack.c.bf16 %v402_v49, %v394_v48  ;;  %v5530_v60 = vpack.c.bf16 %v404_v51, %v396_v50  ;;  %v482_v48 = vld [vmem:[%s6537_s29 + $0x2e0] sm:$0xff]  ;;  %v476_v49 = vld [vmem:[%s6537_s29 + $0x2b0] sm:$0xff] }
 0x1ca   : > { %5141 = vmatprep.subr.bf16.mxu1 %v5140_v0  ;;  %v412_v0 = vld [vmem:[%s6537_s29 + $0xb0] sm:$0xff] }
 0x1cb   : > { %v484_v51 = vld [vmem:[%s6537_s29 + $0x2f0] sm:$0xff] }
 0x1cc   : > { %4771 = vmatpush1.bf16.msra.mxu0 %v4770_v6  ;;  %v437_v6 = vld [vmem:[%s6537_s29 + $0x178] sm:$0xff]  ;;  %v5550_v57 = vpack.c.bf16 %v484_v51, %v476_v49  ;;  %v579_v49 = vld [vmem:[%s6537_s29 + $0x5e8] sm:$0xff] }
 0x1cd   : > { %5143 = vmatpush1.bf16.msra.mxu1 %v5142_v7  ;;  %4773 = vmatprep.subr.bf16.mxu0 %v4772_v8  ;;  %v5162_v7 = vpack.c.bf16 %v418_v63, %v410_v62  ;;  %v5534_v8 = vpack.c.bf16 %v420_v2, %v412_v0  ;;  %v5536_v13 = vpack.c.bf16 %v437_v6, %v429_v5  ;;  %v500_v63 = vld [vmem:[%s6537_s29 + $0x370] sm:$0xff]  ;;  %v507_v0 = vld [vmem:[%s6537_s29 + $0x3a8] sm:$0xff]  ;;  %v509_v2 = vld [vmem:[%s6537_s29 + $0x3b8] sm:$0xff] }
 0x1ce   : > { %5145 = vmatprep.subr.bf16.mxu1 %v5144_v12  ;;  %v428_v12 = vld [vmem:[%s6537_s29 + $0x130] sm:$0xff]  ;;  %v581_v51 = vld [vmem:[%s6537_s29 + $0x5f8] sm:$0xff] }
 0x1cf   : > { %v5538_v21 = vpack.c.bf16 %v436_v14, %v428_v12  ;;  %v523_v12 = vld [vmem:[%s6537_s29 + $0x428] sm:$0xff]  ;;  %v525_v14 = vld [vmem:[%s6537_s29 + $0x438] sm:$0xff] }
 0x1d0   : > { %4775 = vmatpush1.bf16.msra.mxu0 %v4774_v18  ;;  %v445_v18 = vld [vmem:[%s6537_s29 + $0x1b8] sm:$0xff] }
 0x1d1   : > { %5147 = vmatpush1.bf16.msra.mxu1 %v5146_v19  ;;  %4777 = vmatprep.subr.bf16.mxu0 %v4776_v20  ;;  %v453_v19 = vld [vmem:[%s6537_s29 + $0x1f8] sm:$0xff]  ;;  %v5166_v20 = vpack.c.bf16 %v434_v11, %v426_v10  ;;  %v5556_v10 = vpack.c.bf16 %v517_v3, %v509_v2  ;;  %v516_v11 = vld [vmem:[%s6537_s29 + $0x3f0] sm:$0xff]  ;;  %v586_v3 = vld [vmem:[%s6537_s29 + $0x620] sm:$0xff] }
 0x1d2   : > { %5149 = vmatprep.subr.bf16.mxu1 %v5148_v24  ;;  %v450_v24 = vld [vmem:[%s6537_s29 + $0x1e0] sm:$0xff]  ;;  %v5540_v26 = vpack.c.bf16 %v453_v19, %v445_v18 }
 0x1d3   : > { %v522_v19 = vld [vmem:[%s6537_s29 + $0x420] sm:$0xff] }
 0x1d4   : > { %4779 = vmatpush1.bf16.msra.mxu0 %v4778_v30  ;;  %v461_v30 = vld [vmem:[%s6537_s29 + $0x238] sm:$0xff] }
 0x1d5   : > { %5151 = vmatpush1.bf16.msra.mxu1 %v5150_v31  ;;  %4781 = vmatprep.subr.bf16.mxu0 %v4780_v32  ;;  %v469_v31 = vld [vmem:[%s6537_s29 + $0x278] sm:$0xff]  ;;  %v5170_v32 = vpack.c.bf16 %v450_v24, %v442_v23  ;;  %v532_v23 = vld [vmem:[%s6537_s29 + $0x470] sm:$0xff]  ;;  %v539_v24 = vld [vmem:[%s6537_s29 + $0x4a8] sm:$0xff] }
 0x1d6   : > { %5153 = vmatprep.subr.bf16.mxu1 %v5152_v35  ;;  %v458_v35 = vld [vmem:[%s6537_s29 + $0x220] sm:$0xff] }
 0x1d7   : > { %v5174_v44 = vpack.c.bf16 %v466_v36, %v458_v35  ;;  %v548_v35 = vld [vmem:[%s6537_s29 + $0x4f0] sm:$0xff]  ;;  %v555_v36 = vld [vmem:[%s6537_s29 + $0x528] sm:$0xff] }
 0x1d8   : > { %4783 = vmatpush1.bf16.msra.mxu0 %v4782_v38  ;;  %v5544_v38 = vpack.c.bf16 %v469_v31, %v461_v30  ;;  %v5192_v30 = vpack.c.bf16 %v547_v25, %v539_v24  ;;  %v538_v31 = vld [vmem:[%s6537_s29 + $0x4a0] sm:$0xff] }
 0x1d9   : > { %5155 = vmatpush1.bf16.msra.mxu1 %v5154_v39  ;;  %2339 = vmatprep.subr.mxu0 %v1879_v40  ;;  %v468_v39 = vld [vmem:[%s6537_s29 + $0x270] sm:$0xff]  ;;  %v475_v40 = vld [vmem:[%s6537_s29 + $0x2a8] sm:$0xff] }
 0x1da   : > { %2765 = vmatprep.subr.mxu1 %v1881_v41  ;;  %v483_v41 = vld [vmem:[%s6537_s29 + $0x2e8] sm:$0xff]  ;;  %v5546_v45 = vpack.c.bf16 %v468_v39, %v460_v37  ;;  %v565_v39 = vld [vmem:[%s6537_s29 + $0x578] sm:$0xff] }
 0x1db   : > { %v5176_v46 = vpack.c.bf16 %v483_v41, %v475_v40  ;;  %v563_v37 = vld [vmem:[%s6537_s29 + $0x568] sm:$0xff] }
 0x1dc   : > { %2340 = vmatpush1.msra.mxu0 %v1878_v43  ;;  %v485_v43 = vld [vmem:[%s6537_s29 + $0x2f8] sm:$0xff] }
 0x1dd   : > { %2766 = vmatpush1.msra.mxu1 %v1880_v47  ;;  %2352 = vmatmul.mubr.f32.vlgmr.msra.gmra.mrb[0].mxu0 %v388_v54  ;;  %v474_v47 = vld [vmem:[%s6537_s29 + $0x2a0] sm:$0xff]  ;;  %v5548_v50 = vpack.c.bf16 %v485_v43, %v477_v42  ;;  %v5196_v42 = vpack.c.bf16 %v563_v37, %v555_v36 }
 0x1de   : > { %2778 = vmatmul.mubr.f32.vlgmr.msra.gmra.mrb[0].mxu1 %v388_v54  ;;  %5157 = vmatprep.subr.bf16.mxu0 %v5156_v55  ;;  %v493_v54 = vld [vmem:[%s6537_s29 + $0x338] sm:$0xff]  ;;  %v5178_v56 = vpack.c.bf16 %v482_v48, %v474_v47  ;;  %v554_v43 = vld [vmem:[%s6537_s29 + $0x520] sm:$0xff]  ;;  %v564_v47 = vld [vmem:[%s6537_s29 + $0x570] sm:$0xff] }
 0x1df   : > { %5529 = vmatprep.subr.bf16.mxu1 %v5528_v58  ;;  %5159 = vmatpush1.bf16.msra.mxu0 %v5158_v59  ;;  %v501_v55 = vld [vmem:[%s6537_s29 + $0x378] sm:$0xff]  ;;  %v5180_v58 = vpack.c.bf16 %v499_v53, %v491_v52  ;;  %v490_v59 = vld [vmem:[%s6537_s29 + $0x320] sm:$0xff]  ;;  %v571_v48 = vld [vmem:[%s6537_s29 + $0x5a8] sm:$0xff] }
 0x1e0   : > { %5531 = vmatpush1.bf16.msra.mxu1 %v5530_v60  ;;  %5161 = vmatprep.subr.bf16.mxu0 %v5160_v61  ;;  %v498_v60 = vld [vmem:[%s6537_s29 + $0x360] sm:$0xff]  ;;  %v492_v61 = vld [vmem:[%s6537_s29 + $0x330] sm:$0xff]  ;;  %v5552_v62 = vpack.c.bf16 %v501_v55, %v493_v54  ;;  %v5200_v54 = vpack.c.bf16 %v579_v49, %v571_v48 }
 0x1e1   : > { %5533 = vmatprep.subr.bf16.mxu1 %v5532_v1  ;;  %2848 = vmatprep.mubr.f32.mxu0 %v6187_v17  ;;  %v515_v1 = vld [vmem:[%s6537_s29 + $0x3e8] sm:$0xff]  ;;  %v5182_v4 = vpack.c.bf16 %v498_v60, %v490_v59  ;;  %v5554_v5 = vpack.c.bf16 %v500_v63, %v492_v61  ;;  %v570_v55 = vld [vmem:[%s6537_s29 + $0x5a0] sm:$0xff]  ;;  %v580_v59 = vld [vmem:[%s6537_s29 + $0x5f0] sm:$0xff] }
 0x1e2   : > { %3274 = vmatprep.mubr.f32.mxu1 %v6187_v17  ;;  %v5184_v6 = vpack.c.bf16 %v515_v1, %v507_v0  ;;  %v587_v60 = vld [vmem:[%s6537_s29 + $0x628] sm:$0xff]  ;;  %v597_v63 = vld [vmem:[%s6537_s29 + $0x678] sm:$0xff] }
 0x1e3   : > { %5163 = vmatpush1.bf16.msra.mxu0 %v5162_v7  ;;  %v506_v7 = vld [vmem:[%s6537_s29 + $0x3a0] sm:$0xff]  ;;  %v595_v61 = vld [vmem:[%s6537_s29 + $0x668] sm:$0xff] }
 0x1e4   : > { %5535 = vmatpush1.bf16.msra.mxu1 %v5534_v8  ;;  %5165 = vmatprep.subr.bf16.mxu0 %v5164_v9  ;;  %v514_v8 = vld [vmem:[%s6537_s29 + $0x3e0] sm:$0xff]  ;;  %v508_v9 = vld [vmem:[%s6537_s29 + $0x3b0] sm:$0xff]  ;;  %v5204_v2 = vpack.c.bf16 %v595_v61, %v587_v60 }
 0x1e5   : > { %5537 = vmatprep.subr.bf16.mxu1 %v5536_v13  ;;  %v531_v13 = vld [vmem:[%s6537_s29 + $0x468] sm:$0xff]  ;;  %v5186_v16 = vpack.c.bf16 %v514_v8, %v506_v7  ;;  %v5558_v17 = vpack.c.bf16 %v516_v11, %v508_v9  ;;  %v596_v7 = vld [vmem:[%s6537_s29 + $0x670] sm:$0xff]  ;;  %v613_v11 = vld [vmem:[%s6537_s29 + $0x6f8] sm:$0xff] }
 0x1e6   : > { %v5188_v18 = vpack.c.bf16 %v531_v13, %v523_v12  ;;  %v603_v8 = vld [vmem:[%s6537_s29 + $0x6a8] sm:$0xff] }
 0x1e7   : > { %5167 = vmatpush1.bf16.msra.mxu0 %v5166_v20  ;;  %v530_v20 = vld [vmem:[%s6537_s29 + $0x460] sm:$0xff]  ;;  %v611_v9 = vld [vmem:[%s6537_s29 + $0x6e8] sm:$0xff] }
 0x1e8   : > { %5539 = vmatpush1.bf16.msra.mxu1 %v5538_v21  ;;  %5169 = vmatprep.subr.bf16.mxu0 %v5168_v22  ;;  %v524_v21 = vld [vmem:[%s6537_s29 + $0x430] sm:$0xff]  ;;  %v5560_v22 = vpack.c.bf16 %v533_v15, %v525_v14  ;;  %v5190_v28 = vpack.c.bf16 %v530_v20, %v522_v19  ;;  %v5208_v14 = vpack.c.bf16 %v611_v9, %v603_v8  ;;  %v602_v15 = vld [vmem:[%s6537_s29 + $0x6a0] sm:$0xff]  ;;  %v619_v20 = vld [vmem:[%s6537_s29 + $0x728] sm:$0xff] }
 0x1e9   : > { %5541 = vmatprep.subr.bf16.mxu1 %v5540_v26  ;;  %v541_v26 = vld [vmem:[%s6537_s29 + $0x4b8] sm:$0xff]  ;;  %v5562_v29 = vpack.c.bf16 %v532_v23, %v524_v21  ;;  %v612_v19 = vld [vmem:[%s6537_s29 + $0x6f0] sm:$0xff]  ;;  %v627_v21 = vld [vmem:[%s6537_s29 + $0x768] sm:$0xff] }
 0x1ea   : > { %v629_v23 = vld [vmem:[%s6537_s29 + $0x778] sm:$0xff] }
 0x1eb   : > { %5171 = vmatpush1.bf16.msra.mxu0 %v5170_v32  ;;  %v546_v32 = vld [vmem:[%s6537_s29 + $0x4e0] sm:$0xff]  ;;  %v693_v8 = vld [vmem:[%s6537_s29 + $0x978] sm:$0xff] }
 0x1ec   : > { %5543 = vmatpush1.bf16.msra.mxu1 %v5542_v33  ;;  %5173 = vmatprep.subr.bf16.mxu0 %v5172_v34  ;;  %v540_v33 = vld [vmem:[%s6537_s29 + $0x4b0] sm:$0xff]  ;;  %v5564_v34 = vpack.c.bf16 %v549_v27, %v541_v26  ;;  %v5194_v40 = vpack.c.bf16 %v546_v32, %v538_v31  ;;  %v5212_v26 = vpack.c.bf16 %v627_v21, %v619_v20  ;;  %v618_v27 = vld [vmem:[%s6537_s29 + $0x720] sm:$0xff]  ;;  %v635_v32 = vld [vmem:[%s6537_s29 + $0x7a8] sm:$0xff] }
 0x1ed   : > { %5545 = vmatprep.subr.bf16.mxu1 %v5544_v38  ;;  %v557_v38 = vld [vmem:[%s6537_s29 + $0x538] sm:$0xff]  ;;  %v5566_v41 = vpack.c.bf16 %v548_v35, %v540_v33  ;;  %v628_v31 = vld [vmem:[%s6537_s29 + $0x770] sm:$0xff]  ;;  %v643_v33 = vld [vmem:[%s6537_s29 + $0x7e8] sm:$0xff] }
 0x1ee   : > { %v645_v35 = vld [vmem:[%s6537_s29 + $0x7f8] sm:$0xff] }
 0x1ef   : > { %5175 = vmatpush1.bf16.msra.mxu0 %v5174_v44  ;;  %v562_v44 = vld [vmem:[%s6537_s29 + $0x560] sm:$0xff]  ;;  %v701_v20 = vld [vmem:[%s6537_s29 + $0x9b8] sm:$0xff] }
 0x1f0   : > { %5547 = vmatpush1.bf16.msra.mxu1 %v5546_v45  ;;  %5177 = vmatprep.subr.bf16.mxu0 %v5176_v46  ;;  %v556_v45 = vld [vmem:[%s6537_s29 + $0x530] sm:$0xff]  ;;  %v5568_v46 = vpack.c.bf16 %v565_v39, %v557_v38  ;;  %v5198_v52 = vpack.c.bf16 %v562_v44, %v554_v43  ;;  %v5216_v38 = vpack.c.bf16 %v643_v33, %v635_v32  ;;  %v634_v39 = vld [vmem:[%s6537_s29 + $0x7a0] sm:$0xff]  ;;  %v651_v44 = vld [vmem:[%s6537_s29 + $0x828] sm:$0xff] }
 0x1f1   : > { %5549 = vmatprep.subr.bf16.mxu1 %v5548_v50  ;;  %v573_v50 = vld [vmem:[%s6537_s29 + $0x5b8] sm:$0xff]  ;;  %v5570_v53 = vpack.c.bf16 %v564_v47, %v556_v45  ;;  %v644_v43 = vld [vmem:[%s6537_s29 + $0x7f0] sm:$0xff]  ;;  %v659_v45 = vld [vmem:[%s6537_s29 + $0x868] sm:$0xff] }
 0x1f2   : > { %v661_v47 = vld [vmem:[%s6537_s29 + $0x878] sm:$0xff] }
 0x1f3   : > { %5179 = vmatpush1.bf16.msra.mxu0 %v5178_v56  ;;  %v578_v56 = vld [vmem:[%s6537_s29 + $0x5e0] sm:$0xff]  ;;  %v709_v21 = vld [vmem:[%s6537_s29 + $0x9f8] sm:$0xff] }
 0x1f4   : > { %5551 = vmatpush1.bf16.msra.mxu1 %v5550_v57  ;;  %5181 = vmatprep.subr.bf16.mxu0 %v5180_v58  ;;  %v572_v57 = vld [vmem:[%s6537_s29 + $0x5b0] sm:$0xff]  ;;  %v5572_v58 = vpack.c.bf16 %v581_v51, %v573_v50  ;;  %v5202_v0 = vpack.c.bf16 %v578_v56, %v570_v55  ;;  %v5220_v50 = vpack.c.bf16 %v659_v45, %v651_v44  ;;  %v650_v51 = vld [vmem:[%s6537_s29 + $0x820] sm:$0xff]  ;;  %v667_v56 = vld [vmem:[%s6537_s29 + $0x8a8] sm:$0xff] }
 0x1f5   : > { %5553 = vmatprep.subr.bf16.mxu1 %v5552_v62  ;;  %v589_v62 = vld [vmem:[%s6537_s29 + $0x638] sm:$0xff]  ;;  %v5574_v1 = vpack.c.bf16 %v580_v59, %v572_v57  ;;  %v660_v55 = vld [vmem:[%s6537_s29 + $0x870] sm:$0xff]  ;;  %v675_v57 = vld [vmem:[%s6537_s29 + $0x8e8] sm:$0xff] }
 0x1f6   : > { %v677_v59 = vld [vmem:[%s6537_s29 + $0x8f8] sm:$0xff] }
 0x1f7   : > { %5183 = vmatpush1.bf16.msra.mxu0 %v5182_v4  ;;  %v594_v4 = vld [vmem:[%s6537_s29 + $0x660] sm:$0xff]  ;;  %v717_v32 = vld [vmem:[%s6537_s29 + $0xa38] sm:$0xff] }
 0x1f8   : > { %5555 = vmatpush1.bf16.msra.mxu1 %v5554_v5  ;;  %5185 = vmatprep.subr.bf16.mxu0 %v5184_v6  ;;  %v588_v5 = vld [vmem:[%s6537_s29 + $0x630] sm:$0xff]  ;;  %v5576_v6 = vpack.c.bf16 %v597_v63, %v589_v62  ;;  %v5206_v12 = vpack.c.bf16 %v594_v4, %v586_v3  ;;  %v5224_v62 = vpack.c.bf16 %v675_v57, %v667_v56  ;;  %v666_v63 = vld [vmem:[%s6537_s29 + $0x8a0] sm:$0xff]  ;;  %v683_v4 = vld [vmem:[%s6537_s29 + $0x928] sm:$0xff] }
 0x1f9   : > { %5557 = vmatprep.subr.bf16.mxu1 %v5556_v10  ;;  %v605_v10 = vld [vmem:[%s6537_s29 + $0x6b8] sm:$0xff]  ;;  %v5578_v13 = vpack.c.bf16 %v596_v7, %v588_v5  ;;  %v676_v3 = vld [vmem:[%s6537_s29 + $0x8f0] sm:$0xff]  ;;  %v691_v5 = vld [vmem:[%s6537_s29 + $0x968] sm:$0xff] }
 0x1fa   : > { %v685_v7 = vld [vmem:[%s6537_s29 + $0x938] sm:$0xff] }
 0x1fb   : > { %5187 = vmatpush1.bf16.msra.mxu0 %v5186_v16  ;;  %v610_v16 = vld [vmem:[%s6537_s29 + $0x6e0] sm:$0xff]  ;;  %v725_v33 = vld [vmem:[%s6537_s29 + $0xa78] sm:$0xff] }
 0x1fc   : > { %5559 = vmatpush1.bf16.msra.mxu1 %v5558_v17  ;;  %5189 = vmatprep.subr.bf16.mxu0 %v5188_v18  ;;  %v604_v17 = vld [vmem:[%s6537_s29 + $0x6b0] sm:$0xff]  ;;  %v5580_v18 = vpack.c.bf16 %v613_v11, %v605_v10  ;;  %v5210_v24 = vpack.c.bf16 %v610_v16, %v602_v15  ;;  %v5228_v11 = vpack.c.bf16 %v691_v5, %v683_v4  ;;  %v733_v44 = vld [vmem:[%s6537_s29 + $0xab8] sm:$0xff] }
 0x1fd   : > { %5561 = vmatprep.subr.bf16.mxu1 %v5560_v22  ;;  %v621_v22 = vld [vmem:[%s6537_s29 + $0x738] sm:$0xff]  ;;  %v5582_v25 = vpack.c.bf16 %v612_v19, %v604_v17  ;;  %v5600_v15 = vpack.c.bf16 %v693_v8, %v685_v7  ;;  %v692_v16 = vld [vmem:[%s6537_s29 + $0x970] sm:$0xff]  ;;  %v699_v17 = vld [vmem:[%s6537_s29 + $0x9a8] sm:$0xff] }
 0x1fe   : > { %v6189_v19 = vld [vmem:[%s8385_s0 + $0x18] sm:$0xff]  ;;  %v741_v45 = vld [vmem:[%s6537_s29 + $0xaf8] sm:$0xff] }
 0x1ff   : > { %5191 = vmatpush1.bf16.msra.mxu0 %v5190_v28  ;;  %v626_v28 = vld [vmem:[%s6537_s29 + $0x760] sm:$0xff]  ;;  %v749_v56 = vld [vmem:[%s6537_s29 + $0xb38] sm:$0xff] }
 0x200   : > { %5563 = vmatpush1.bf16.msra.mxu1 %v5562_v29  ;;  %5193 = vmatprep.subr.bf16.mxu0 %v5192_v30  ;;  %v620_v29 = vld [vmem:[%s6537_s29 + $0x730] sm:$0xff]  ;;  %v5584_v30 = vpack.c.bf16 %v629_v23, %v621_v22  ;;  %v5214_v36 = vpack.c.bf16 %v626_v28, %v618_v27  ;;  %v5604_v28 = vpack.c.bf16 %v709_v21, %v701_v20  ;;  %v757_v57 = vld [vmem:[%s6537_s29 + $0xb78] sm:$0xff]  ;;  %v778_v21 = vld [vmem:[%s6537_s29 + $0xc20] sm:$0xff] }
 0x201   : > { %5565 = vmatprep.subr.bf16.mxu1 %v5564_v34  ;;  %v637_v34 = vld [vmem:[%s6537_s29 + $0x7b8] sm:$0xff]  ;;  %v5586_v37 = vpack.c.bf16 %v628_v31, %v620_v29  ;;  %v700_v27 = vld [vmem:[%s6537_s29 + $0x9b0] sm:$0xff]  ;;  %v723_v31 = vld [vmem:[%s6537_s29 + $0xa68] sm:$0xff] }
 0x202   : > { %v708_v29 = vld [vmem:[%s6537_s29 + $0x9f0] sm:$0xff]  ;;  %v765_v4 = vld [vmem:[%s6537_s29 + $0xbb8] sm:$0xff] }
 0x203   : > { %5195 = vmatpush1.bf16.msra.mxu0 %v5194_v40  ;;  %v642_v40 = vld [vmem:[%s6537_s29 + $0x7e0] sm:$0xff]  ;;  %v773_v5 = vld [vmem:[%s6537_s29 + $0xbf8] sm:$0xff] }
 0x204   : > { %5567 = vmatpush1.bf16.msra.mxu1 %v5566_v41  ;;  %5197 = vmatprep.subr.bf16.mxu0 %v5196_v42  ;;  %v636_v41 = vld [vmem:[%s6537_s29 + $0x7b0] sm:$0xff]  ;;  %v5588_v42 = vpack.c.bf16 %v645_v35, %v637_v34  ;;  %v5218_v48 = vpack.c.bf16 %v642_v40, %v634_v39  ;;  %v5606_v35 = vpack.c.bf16 %v708_v29, %v700_v27  ;;  %v803_v27 = vld [vmem:[%s6537_s29 + $0xce8] sm:$0xff]  ;;  %v805_v29 = vld [vmem:[%s6537_s29 + $0xcf8] sm:$0xff] }
 0x205   : > { %5569 = vmatprep.subr.bf16.mxu1 %v5568_v46  ;;  %v653_v46 = vld [vmem:[%s6537_s29 + $0x838] sm:$0xff]  ;;  %v5590_v49 = vpack.c.bf16 %v644_v43, %v636_v41  ;;  %v716_v39 = vld [vmem:[%s6537_s29 + $0xa30] sm:$0xff]  ;;  %v5608_v40 = vpack.c.bf16 %v725_v33, %v717_v32  ;;  %v739_v43 = vld [vmem:[%s6537_s29 + $0xae8] sm:$0xff] }
 0x206   : > { %v724_v41 = vld [vmem:[%s6537_s29 + $0xa70] sm:$0xff]  ;;  %v794_v33 = vld [vmem:[%s6537_s29 + $0xca0] sm:$0xff] }
 0x207   : > { %5199 = vmatpush1.bf16.msra.mxu0 %v5198_v52  ;;  %v658_v52 = vld [vmem:[%s6537_s29 + $0x860] sm:$0xff] }
 0x208   : > { %5571 = vmatpush1.bf16.msra.mxu1 %v5570_v53  ;;  %5201 = vmatprep.subr.bf16.mxu0 %v5200_v54  ;;  %v652_v53 = vld [vmem:[%s6537_s29 + $0x830] sm:$0xff]  ;;  %v5592_v54 = vpack.c.bf16 %v661_v47, %v653_v46  ;;  %v5222_v60 = vpack.c.bf16 %v658_v52, %v650_v51  ;;  %v5610_v47 = vpack.c.bf16 %v724_v41, %v716_v39  ;;  %v819_v39 = vld [vmem:[%s6537_s29 + $0xd68] sm:$0xff]  ;;  %v821_v41 = vld [vmem:[%s6537_s29 + $0xd78] sm:$0xff] }
 0x209   : > { %5573 = vmatprep.subr.bf16.mxu1 %v5572_v58  ;;  %v669_v58 = vld [vmem:[%s6537_s29 + $0x8b8] sm:$0xff]  ;;  %v5594_v61 = vpack.c.bf16 %v660_v55, %v652_v53  ;;  %v732_v51 = vld [vmem:[%s6537_s29 + $0xab0] sm:$0xff]  ;;  %v5612_v52 = vpack.c.bf16 %v741_v45, %v733_v44  ;;  %v755_v55 = vld [vmem:[%s6537_s29 + $0xb68] sm:$0xff] }
 0x20a   : > { %v740_v53 = vld [vmem:[%s6537_s29 + $0xaf0] sm:$0xff]  ;;  %v810_v45 = vld [vmem:[%s6537_s29 + $0xd20] sm:$0xff] }
 0x20b   : > { %5203 = vmatpush1.bf16.msra.mxu0 %v5202_v0  ;;  %v674_v0 = vld [vmem:[%s6537_s29 + $0x8e0] sm:$0xff] }
 0x20c   : > { %5575 = vmatpush1.bf16.msra.mxu1 %v5574_v1  ;;  %5205 = vmatprep.subr.bf16.mxu0 %v5204_v2  ;;  %v668_v1 = vld [vmem:[%s6537_s29 + $0x8b0] sm:$0xff]  ;;  %v5596_v2 = vpack.c.bf16 %v677_v59, %v669_v58  ;;  %v5226_v9 = vpack.c.bf16 %v674_v0, %v666_v63  ;;  %v5614_v59 = vpack.c.bf16 %v740_v53, %v732_v51  ;;  %v835_v51 = vld [vmem:[%s6537_s29 + $0xde8] sm:$0xff]  ;;  %v837_v53 = vld [vmem:[%s6537_s29 + $0xdf8] sm:$0xff] }
 0x20d   : > { %5577 = vmatprep.subr.bf16.mxu1 %v5576_v6  ;;  %v6188_v6 = vld [vmem:[%s8385_s0] sm:$0xff]  ;;  %v5598_v10 = vpack.c.bf16 %v676_v3, %v668_v1  ;;  %v748_v63 = vld [vmem:[%s6537_s29 + $0xb30] sm:$0xff]  ;;  %v5616_v0 = vpack.c.bf16 %v757_v57, %v749_v56  ;;  %v771_v3 = vld [vmem:[%s6537_s29 + $0xbe8] sm:$0xff] }
 0x20e   : > { %v756_v1 = vld [vmem:[%s6537_s29 + $0xb70] sm:$0xff]  ;;  %v826_v57 = vld [vmem:[%s6537_s29 + $0xda0] sm:$0xff] }
 0x20f   : > { %5207 = vmatpush1.bf16.msra.mxu0 %v5206_v12  ;;  %v682_v12 = vld [vmem:[%s6537_s29 + $0x920] sm:$0xff]  ;;  %v5618_v7 = vpack.c.bf16 %v756_v1, %v748_v63  ;;  %v851_v63 = vld [vmem:[%s6537_s29 + $0xe68] sm:$0xff]  ;;  %v853_v1 = vld [vmem:[%s6537_s29 + $0xe78] sm:$0xff] }
 0x210   : > { %5579 = vmatpush1.bf16.msra.mxu1 %v5578_v13  ;;  %5209 = vmatprep.subr.bf16.mxu0 %v5208_v14  ;;  %v690_v13 = vld [vmem:[%s6537_s29 + $0x960] sm:$0xff]  ;;  %v684_v14 = vld [vmem:[%s6537_s29 + $0x930] sm:$0xff] }
 0x211   : > { %5581 = vmatprep.subr.bf16.mxu1 %v5580_v18  ;;  %v707_v18 = vld [vmem:[%s6537_s29 + $0x9e8] sm:$0xff]  ;;  %v5230_v22 = vpack.c.bf16 %v690_v13, %v682_v12  ;;  %v5602_v23 = vpack.c.bf16 %v692_v16, %v684_v14  ;;  %v5620_v12 = vpack.c.bf16 %v773_v5, %v765_v4  ;;  %v772_v13 = vld [vmem:[%s6537_s29 + $0xbf0] sm:$0xff]  ;;  %v781_v16 = vld [vmem:[%s6537_s29 + $0xc38] sm:$0xff] }
 0x212   : > { %v779_v14 = vld [vmem:[%s6537_s29 + $0xc28] sm:$0xff]  ;;  %v842_v5 = vld [vmem:[%s6537_s29 + $0xe20] sm:$0xff] }
 0x213   : > { %5211 = vmatpush1.bf16.msra.mxu0 %v5210_v24  ;;  %v5232_v24 = vpack.c.bf16 %v707_v18, %v699_v17  ;;  %v789_v17 = vld [vmem:[%s6537_s29 + $0xc78] sm:$0xff] }
 0x214   : > { %5583 = vmatpush1.bf16.msra.mxu1 %v5582_v25  ;;  %5213 = vmatprep.subr.bf16.mxu0 %v5212_v26  ;;  %v698_v25 = vld [vmem:[%s6537_s29 + $0x9a0] sm:$0xff] }
 0x215   : > { %5585 = vmatprep.subr.bf16.mxu1 %v5584_v30  ;;  %v706_v26 = vld [vmem:[%s6537_s29 + $0x9e0] sm:$0xff]  ;;  %v715_v30 = vld [vmem:[%s6537_s29 + $0xa28] sm:$0xff] }
 0x216   : > { %v5234_v34 = vpack.c.bf16 %v706_v26, %v698_v25  ;;  %v788_v25 = vld [vmem:[%s6537_s29 + $0xc70] sm:$0xff]  ;;  %v795_v26 = vld [vmem:[%s6537_s29 + $0xca8] sm:$0xff] }
 0x217   : > { %5215 = vmatpush1.bf16.msra.mxu0 %v5214_v36  ;;  %v5236_v36 = vpack.c.bf16 %v723_v31, %v715_v30  ;;  %v5256_v32 = vpack.c.bf16 %v803_v27, %v795_v26 }
 0x218   : > { %5587 = vmatpush1.bf16.msra.mxu1 %v5586_v37  ;;  %5217 = vmatprep.subr.bf16.mxu0 %v5216_v38  ;;  %v714_v37 = vld [vmem:[%s6537_s29 + $0xa20] sm:$0xff] }
 0x219   : > { %5589 = vmatprep.subr.bf16.mxu1 %v5588_v42  ;;  %v722_v38 = vld [vmem:[%s6537_s29 + $0xa60] sm:$0xff]  ;;  %v731_v42 = vld [vmem:[%s6537_s29 + $0xaa8] sm:$0xff] }
 0x21a   : > { %v5238_v46 = vpack.c.bf16 %v722_v38, %v714_v37  ;;  %v804_v37 = vld [vmem:[%s6537_s29 + $0xcf0] sm:$0xff]  ;;  %v811_v38 = vld [vmem:[%s6537_s29 + $0xd28] sm:$0xff] }
 0x21b   : > { %5219 = vmatpush1.bf16.msra.mxu0 %v5218_v48  ;;  %v5240_v48 = vpack.c.bf16 %v739_v43, %v731_v42  ;;  %v5260_v44 = vpack.c.bf16 %v819_v39, %v811_v38 }
 0x21c   : > { %5591 = vmatpush1.bf16.msra.mxu1 %v5590_v49  ;;  %5221 = vmatprep.subr.bf16.mxu0 %v5220_v50  ;;  %v730_v49 = vld [vmem:[%s6537_s29 + $0xaa0] sm:$0xff] }
 0x21d   : > { %5593 = vmatprep.subr.bf16.mxu1 %v5592_v54  ;;  %v738_v50 = vld [vmem:[%s6537_s29 + $0xae0] sm:$0xff]  ;;  %v747_v54 = vld [vmem:[%s6537_s29 + $0xb28] sm:$0xff] }
 0x21e   : > { %2849 = vmatmul.mubr.f32.vlgmr.msra.gmra.mrb[2].mxu0 %v6188_v6  ;;  %v5242_v58 = vpack.c.bf16 %v738_v50, %v730_v49  ;;  %v820_v49 = vld [vmem:[%s6537_s29 + $0xd70] sm:$0xff]  ;;  %v827_v50 = vld [vmem:[%s6537_s29 + $0xda8] sm:$0xff] }
 0x21f   : > { %5223 = vmatpush1.bf16.msra.mxu0 %v5222_v60  ;;  %3275 = vmatmul.mubr.f32.vlgmr.msra.gmra.mrb[2].mxu1 %v6188_v6  ;;  %v5244_v60 = vpack.c.bf16 %v755_v55, %v747_v54  ;;  %v5264_v56 = vpack.c.bf16 %v835_v51, %v827_v50 }
 0x220   : > { %5595 = vmatpush1.bf16.msra.mxu1 %v5594_v61  ;;  %5225 = vmatprep.subr.bf16.mxu0 %v5224_v62  ;;  %v746_v61 = vld [vmem:[%s6537_s29 + $0xb20] sm:$0xff] }
 0x221   : > { %5597 = vmatprep.subr.bf16.mxu1 %v5596_v2  ;;  %2919 = vmatprep.mubr.f32.mxu0 %v6189_v19  ;;  %v754_v62 = vld [vmem:[%s6537_s29 + $0xb60] sm:$0xff]  ;;  %v763_v2 = vld [vmem:[%s6537_s29 + $0xba8] sm:$0xff] }
 0x222   : > { %3345 = vmatprep.mubr.f32.mxu1 %v6189_v19  ;;  %v5246_v6 = vpack.c.bf16 %v754_v62, %v746_v61  ;;  %v5248_v8 = vpack.c.bf16 %v771_v3, %v763_v2  ;;  %v836_v61 = vld [vmem:[%s6537_s29 + $0xdf0] sm:$0xff]  ;;  %v843_v62 = vld [vmem:[%s6537_s29 + $0xe28] sm:$0xff] }
 0x223   : > { %5227 = vmatpush1.bf16.msra.mxu0 %v5226_v9  ;;  %v762_v9 = vld [vmem:[%s6537_s29 + $0xba0] sm:$0xff]  ;;  %v5268_v4 = vpack.c.bf16 %v851_v63, %v843_v62 }
 0x224   : > { %5599 = vmatpush1.bf16.msra.mxu1 %v5598_v10  ;;  %5229 = vmatprep.subr.bf16.mxu0 %v5228_v11  ;;  %v770_v10 = vld [vmem:[%s6537_s29 + $0xbe0] sm:$0xff]  ;;  %v764_v11 = vld [vmem:[%s6537_s29 + $0xbb0] sm:$0xff] }
 0x225   : > { %5601 = vmatprep.subr.bf16.mxu1 %v5600_v15  ;;  %v787_v15 = vld [vmem:[%s6537_s29 + $0xc68] sm:$0xff]  ;;  %v5250_v18 = vpack.c.bf16 %v770_v10, %v762_v9  ;;  %v5622_v19 = vpack.c.bf16 %v772_v13, %v764_v11  ;;  %v852_v9 = vld [vmem:[%s6537_s29 + $0xe70] sm:$0xff]  ;;  %v869_v13 = vld [vmem:[%s6537_s29 + $0xef8] sm:$0xff] }
 0x226   : > { %v5252_v20 = vpack.c.bf16 %v787_v15, %v779_v14  ;;  %v859_v10 = vld [vmem:[%s6537_s29 + $0xea8] sm:$0xff] }
 0x227   : > { %5231 = vmatpush1.bf16.msra.mxu0 %v5230_v22  ;;  %v786_v22 = vld [vmem:[%s6537_s29 + $0xc60] sm:$0xff]  ;;  %v867_v11 = vld [vmem:[%s6537_s29 + $0xee8] sm:$0xff] }
 0x228   : > { %5603 = vmatpush1.bf16.msra.mxu1 %v5602_v23  ;;  %5233 = vmatprep.subr.bf16.mxu0 %v5232_v24  ;;  %v780_v23 = vld [vmem:[%s6537_s29 + $0xc30] sm:$0xff]  ;;  %v5624_v24 = vpack.c.bf16 %v789_v17, %v781_v16  ;;  %v5254_v30 = vpack.c.bf16 %v786_v22, %v778_v21  ;;  %v5272_v16 = vpack.c.bf16 %v867_v11, %v859_v10  ;;  %v858_v17 = vld [vmem:[%s6537_s29 + $0xea0] sm:$0xff]  ;;  %v875_v22 = vld [vmem:[%s6537_s29 + $0xf28] sm:$0xff] }
 0x229   : > { %5605 = vmatprep.subr.bf16.mxu1 %v5604_v28  ;;  %v797_v28 = vld [vmem:[%s6537_s29 + $0xcb8] sm:$0xff]  ;;  %v5626_v31 = vpack.c.bf16 %v788_v25, %v780_v23  ;;  %v868_v21 = vld [vmem:[%s6537_s29 + $0xef0] sm:$0xff]  ;;  %v883_v23 = vld [vmem:[%s6537_s29 + $0xf68] sm:$0xff] }
 0x22a   : > { %v885_v25 = vld [vmem:[%s6537_s29 + $0xf78] sm:$0xff] }
 0x22b   : > { %5235 = vmatpush1.bf16.msra.mxu0 %v5234_v34  ;;  %v802_v34 = vld [vmem:[%s6537_s29 + $0xce0] sm:$0xff]  ;;  %v949_v10 = vld [vmem:[%s6537_s29 + $0x1178] sm:$0xff] }
 0x22c   : > { %5607 = vmatpush1.bf16.msra.mxu1 %v5606_v35  ;;  %5237 = vmatprep.subr.bf16.mxu0 %v5236_v36  ;;  %v796_v35 = vld [vmem:[%s6537_s29 + $0xcb0] sm:$0xff]  ;;  %v5628_v36 = vpack.c.bf16 %v805_v29, %v797_v28  ;;  %v5258_v42 = vpack.c.bf16 %v802_v34, %v794_v33  ;;  %v5276_v28 = vpack.c.bf16 %v883_v23, %v875_v22  ;;  %v874_v29 = vld [vmem:[%s6537_s29 + $0xf20] sm:$0xff]  ;;  %v891_v34 = vld [vmem:[%s6537_s29 + $0xfa8] sm:$0xff] }
 0x22d   : > { %5609 = vmatprep.subr.bf16.mxu1 %v5608_v40  ;;  %v813_v40 = vld [vmem:[%s6537_s29 + $0xd38] sm:$0xff]  ;;  %v5630_v43 = vpack.c.bf16 %v804_v37, %v796_v35  ;;  %v884_v33 = vld [vmem:[%s6537_s29 + $0xf70] sm:$0xff]  ;;  %v899_v35 = vld [vmem:[%s6537_s29 + $0xfe8] sm:$0xff] }
 0x22e   : > { %v901_v37 = vld [vmem:[%s6537_s29 + $0xff8] sm:$0xff] }
 0x22f   : > { %5239 = vmatpush1.bf16.msra.mxu0 %v5238_v46  ;;  %v818_v46 = vld [vmem:[%s6537_s29 + $0xd60] sm:$0xff]  ;;  %v957_v22 = vld [vmem:[%s6537_s29 + $0x11b8] sm:$0xff] }
 0x230   : > { %5611 = vmatpush1.bf16.msra.mxu1 %v5610_v47  ;;  %5241 = vmatprep.subr.bf16.mxu0 %v5240_v48  ;;  %v812_v47 = vld [vmem:[%s6537_s29 + $0xd30] sm:$0xff]  ;;  %v5632_v48 = vpack.c.bf16 %v821_v41, %v813_v40  ;;  %v5262_v54 = vpack.c.bf16 %v818_v46, %v810_v45  ;;  %v5280_v40 = vpack.c.bf16 %v899_v35, %v891_v34  ;;  %v890_v41 = vld [vmem:[%s6537_s29 + $0xfa0] sm:$0xff]  ;;  %v907_v46 = vld [vmem:[%s6537_s29 + $0x1028] sm:$0xff] }
 0x231   : > { %5613 = vmatprep.subr.bf16.mxu1 %v5612_v52  ;;  %v829_v52 = vld [vmem:[%s6537_s29 + $0xdb8] sm:$0xff]  ;;  %v5634_v55 = vpack.c.bf16 %v820_v49, %v812_v47  ;;  %v900_v45 = vld [vmem:[%s6537_s29 + $0xff0] sm:$0xff]  ;;  %v915_v47 = vld [vmem:[%s6537_s29 + $0x1068] sm:$0xff] }
 0x232   : > { %v917_v49 = vld [vmem:[%s6537_s29 + $0x1078] sm:$0xff] }
 0x233   : > { %5243 = vmatpush1.bf16.msra.mxu0 %v5242_v58  ;;  %v834_v58 = vld [vmem:[%s6537_s29 + $0xde0] sm:$0xff]  ;;  %v965_v23 = vld [vmem:[%s6537_s29 + $0x11f8] sm:$0xff] }
 0x234   : > { %5615 = vmatpush1.bf16.msra.mxu1 %v5614_v59  ;;  %5245 = vmatprep.subr.bf16.mxu0 %v5244_v60  ;;  %v828_v59 = vld [vmem:[%s6537_s29 + $0xdb0] sm:$0xff]  ;;  %v5636_v60 = vpack.c.bf16 %v837_v53, %v829_v52  ;;  %v5266_v2 = vpack.c.bf16 %v834_v58, %v826_v57  ;;  %v5284_v52 = vpack.c.bf16 %v915_v47, %v907_v46  ;;  %v906_v53 = vld [vmem:[%s6537_s29 + $0x1020] sm:$0xff]  ;;  %v923_v58 = vld [vmem:[%s6537_s29 + $0x10a8] sm:$0xff] }
 0x235   : > { %5617 = vmatprep.subr.bf16.mxu1 %v5616_v0  ;;  %v845_v0 = vld [vmem:[%s6537_s29 + $0xe38] sm:$0xff]  ;;  %v5638_v3 = vpack.c.bf16 %v836_v61, %v828_v59  ;;  %v916_v57 = vld [vmem:[%s6537_s29 + $0x1070] sm:$0xff]  ;;  %v931_v59 = vld [vmem:[%s6537_s29 + $0x10e8] sm:$0xff] }
 0x236   : > { %v933_v61 = vld [vmem:[%s6537_s29 + $0x10f8] sm:$0xff] }
 0x237   : > { %5247 = vmatpush1.bf16.msra.mxu0 %v5246_v6  ;;  %v850_v6 = vld [vmem:[%s6537_s29 + $0xe60] sm:$0xff]  ;;  %v973_v34 = vld [vmem:[%s6537_s29 + $0x1238] sm:$0xff] }
 0x238   : > { %5619 = vmatpush1.bf16.msra.mxu1 %v5618_v7  ;;  %5249 = vmatprep.subr.bf16.mxu0 %v5248_v8  ;;  %v844_v7 = vld [vmem:[%s6537_s29 + $0xe30] sm:$0xff]  ;;  %v5640_v8 = vpack.c.bf16 %v853_v1, %v845_v0  ;;  %v5270_v14 = vpack.c.bf16 %v850_v6, %v842_v5  ;;  %v5288_v0 = vpack.c.bf16 %v931_v59, %v923_v58  ;;  %v922_v1 = vld [vmem:[%s6537_s29 + $0x10a0] sm:$0xff]  ;;  %v939_v6 = vld [vmem:[%s6537_s29 + $0x1128] sm:$0xff] }
 0x239   : > { %5621 = vmatprep.subr.bf16.mxu1 %v5620_v12  ;;  %v861_v12 = vld [vmem:[%s6537_s29 + $0xeb8] sm:$0xff]  ;;  %v5642_v15 = vpack.c.bf16 %v852_v9, %v844_v7  ;;  %v932_v5 = vld [vmem:[%s6537_s29 + $0x10f0] sm:$0xff]  ;;  %v947_v7 = vld [vmem:[%s6537_s29 + $0x1168] sm:$0xff] }
 0x23a   : > { %v941_v9 = vld [vmem:[%s6537_s29 + $0x1138] sm:$0xff] }
 0x23b   : > { %5251 = vmatpush1.bf16.msra.mxu0 %v5250_v18  ;;  %v866_v18 = vld [vmem:[%s6537_s29 + $0xee0] sm:$0xff]  ;;  %v981_v35 = vld [vmem:[%s6537_s29 + $0x1278] sm:$0xff] }
 0x23c   : > { %5623 = vmatpush1.bf16.msra.mxu1 %v5622_v19  ;;  %5253 = vmatprep.subr.bf16.mxu0 %v5252_v20  ;;  %v860_v19 = vld [vmem:[%s6537_s29 + $0xeb0] sm:$0xff]  ;;  %v5644_v20 = vpack.c.bf16 %v869_v13, %v861_v12  ;;  %v5274_v26 = vpack.c.bf16 %v866_v18, %v858_v17  ;;  %v5292_v13 = vpack.c.bf16 %v947_v7, %v939_v6  ;;  %v989_v46 = vld [vmem:[%s6537_s29 + $0x12b8] sm:$0xff] }
 0x23d   : > { %5625 = vmatprep.subr.bf16.mxu1 %v5624_v24  ;;  %v877_v24 = vld [vmem:[%s6537_s29 + $0xf38] sm:$0xff]  ;;  %v5646_v27 = vpack.c.bf16 %v868_v21, %v860_v19  ;;  %v5664_v17 = vpack.c.bf16 %v949_v10, %v941_v9  ;;  %v948_v18 = vld [vmem:[%s6537_s29 + $0x1170] sm:$0xff]  ;;  %v955_v19 = vld [vmem:[%s6537_s29 + $0x11a8] sm:$0xff] }
 0x23e   : > { %v6191_v21 = vld [vmem:[%s8385_s0 + $0x28] sm:$0xff]  ;;  %v997_v47 = vld [vmem:[%s6537_s29 + $0x12f8] sm:$0xff] }
 0x23f   : > { %5255 = vmatpush1.bf16.msra.mxu0 %v5254_v30  ;;  %v882_v30 = vld [vmem:[%s6537_s29 + $0xf60] sm:$0xff]  ;;  %v1005_v58 = vld [vmem:[%s6537_s29 + $0x1338] sm:$0xff] }
 0x240   : > { %5627 = vmatpush1.bf16.msra.mxu1 %v5626_v31  ;;  %5257 = vmatprep.subr.bf16.mxu0 %v5256_v32  ;;  %v876_v31 = vld [vmem:[%s6537_s29 + $0xf30] sm:$0xff]  ;;  %v5648_v32 = vpack.c.bf16 %v885_v25, %v877_v24  ;;  %v5278_v38 = vpack.c.bf16 %v882_v30, %v874_v29  ;;  %v5668_v30 = vpack.c.bf16 %v965_v23, %v957_v22  ;;  %v1013_v59 = vld [vmem:[%s6537_s29 + $0x1378] sm:$0xff]  ;;  %v1034_v23 = vld [vmem:[%s6537_s29 + $0x1420] sm:$0xff] }
 0x241   : > { %5629 = vmatprep.subr.bf16.mxu1 %v5628_v36  ;;  %v893_v36 = vld [vmem:[%s6537_s29 + $0xfb8] sm:$0xff]  ;;  %v5650_v39 = vpack.c.bf16 %v884_v33, %v876_v31  ;;  %v956_v29 = vld [vmem:[%s6537_s29 + $0x11b0] sm:$0xff]  ;;  %v979_v33 = vld [vmem:[%s6537_s29 + $0x1268] sm:$0xff] }
 0x242   : > { %v964_v31 = vld [vmem:[%s6537_s29 + $0x11f0] sm:$0xff]  ;;  %v1021_v6 = vld [vmem:[%s6537_s29 + $0x13b8] sm:$0xff] }
 0x243   : > { %5259 = vmatpush1.bf16.msra.mxu0 %v5258_v42  ;;  %v898_v42 = vld [vmem:[%s6537_s29 + $0xfe0] sm:$0xff]  ;;  %v1029_v7 = vld [vmem:[%s6537_s29 + $0x13f8] sm:$0xff] }
 0x244   : > { %5631 = vmatpush1.bf16.msra.mxu1 %v5630_v43  ;;  %5261 = vmatprep.subr.bf16.mxu0 %v5260_v44  ;;  %v892_v43 = vld [vmem:[%s6537_s29 + $0xfb0] sm:$0xff]  ;;  %v5652_v44 = vpack.c.bf16 %v901_v37, %v893_v36  ;;  %v5282_v50 = vpack.c.bf16 %v898_v42, %v890_v41  ;;  %v5670_v37 = vpack.c.bf16 %v964_v31, %v956_v29  ;;  %v1059_v29 = vld [vmem:[%s6537_s29 + $0x14e8] sm:$0xff]  ;;  %v1061_v31 = vld [vmem:[%s6537_s29 + $0x14f8] sm:$0xff] }
 0x245   : > { %5633 = vmatprep.subr.bf16.mxu1 %v5632_v48  ;;  %v909_v48 = vld [vmem:[%s6537_s29 + $0x1038] sm:$0xff]  ;;  %v5654_v51 = vpack.c.bf16 %v900_v45, %v892_v43  ;;  %v972_v41 = vld [vmem:[%s6537_s29 + $0x1230] sm:$0xff]  ;;  %v5672_v42 = vpack.c.bf16 %v981_v35, %v973_v34  ;;  %v995_v45 = vld [vmem:[%s6537_s29 + $0x12e8] sm:$0xff] }
 0x246   : > { %v980_v43 = vld [vmem:[%s6537_s29 + $0x1270] sm:$0xff]  ;;  %v1050_v35 = vld [vmem:[%s6537_s29 + $0x14a0] sm:$0xff] }
 0x247   : > { %5263 = vmatpush1.bf16.msra.mxu0 %v5262_v54  ;;  %v914_v54 = vld [vmem:[%s6537_s29 + $0x1060] sm:$0xff] }
 0x248   : > { %5635 = vmatpush1.bf16.msra.mxu1 %v5634_v55  ;;  %5265 = vmatprep.subr.bf16.mxu0 %v5264_v56  ;;  %v908_v55 = vld [vmem:[%s6537_s29 + $0x1030] sm:$0xff]  ;;  %v5656_v56 = vpack.c.bf16 %v917_v49, %v909_v48  ;;  %v5286_v62 = vpack.c.bf16 %v914_v54, %v906_v53  ;;  %v5674_v49 = vpack.c.bf16 %v980_v43, %v972_v41  ;;  %v1075_v41 = vld [vmem:[%s6537_s29 + $0x1568] sm:$0xff]  ;;  %v1077_v43 = vld [vmem:[%s6537_s29 + $0x1578] sm:$0xff] }
 0x249   : > { %5637 = vmatprep.subr.bf16.mxu1 %v5636_v60  ;;  %v925_v60 = vld [vmem:[%s6537_s29 + $0x10b8] sm:$0xff]  ;;  %v5658_v63 = vpack.c.bf16 %v916_v57, %v908_v55  ;;  %v988_v53 = vld [vmem:[%s6537_s29 + $0x12b0] sm:$0xff]  ;;  %v5676_v54 = vpack.c.bf16 %v997_v47, %v989_v46  ;;  %v1011_v57 = vld [vmem:[%s6537_s29 + $0x1368] sm:$0xff] }
 0x24a   : > { %v996_v55 = vld [vmem:[%s6537_s29 + $0x12f0] sm:$0xff]  ;;  %v1066_v47 = vld [vmem:[%s6537_s29 + $0x1520] sm:$0xff] }
 0x24b   : > { %5267 = vmatpush1.bf16.msra.mxu0 %v5266_v2  ;;  %v930_v2 = vld [vmem:[%s6537_s29 + $0x10e0] sm:$0xff] }
 0x24c   : > { %5639 = vmatpush1.bf16.msra.mxu1 %v5638_v3  ;;  %5269 = vmatprep.subr.bf16.mxu0 %v5268_v4  ;;  %v924_v3 = vld [vmem:[%s6537_s29 + $0x10b0] sm:$0xff]  ;;  %v5660_v4 = vpack.c.bf16 %v933_v61, %v925_v60  ;;  %v5290_v11 = vpack.c.bf16 %v930_v2, %v922_v1  ;;  %v5678_v61 = vpack.c.bf16 %v996_v55, %v988_v53  ;;  %v1091_v53 = vld [vmem:[%s6537_s29 + $0x15e8] sm:$0xff]  ;;  %v1093_v55 = vld [vmem:[%s6537_s29 + $0x15f8] sm:$0xff] }
 0x24d   : > { %5641 = vmatprep.subr.bf16.mxu1 %v5640_v8  ;;  %v6190_v8 = vld [vmem:[%s8385_s0 + $0x10] sm:$0xff]  ;;  %v5662_v12 = vpack.c.bf16 %v932_v5, %v924_v3  ;;  %v1004_v1 = vld [vmem:[%s6537_s29 + $0x1330] sm:$0xff]  ;;  %v5680_v2 = vpack.c.bf16 %v1013_v59, %v1005_v58  ;;  %v1082_v59 = vld [vmem:[%s6537_s29 + $0x15a0] sm:$0xff] }
 0x24e   : > { %v1012_v3 = vld [vmem:[%s6537_s29 + $0x1370] sm:$0xff]  ;;  %v1027_v5 = vld [vmem:[%s6537_s29 + $0x13e8] sm:$0xff] }
 0x24f   : > { %5271 = vmatpush1.bf16.msra.mxu0 %v5270_v14  ;;  %v938_v14 = vld [vmem:[%s6537_s29 + $0x1120] sm:$0xff]  ;;  %v5682_v9 = vpack.c.bf16 %v1012_v3, %v1004_v1  ;;  %v1107_v1 = vld [vmem:[%s6537_s29 + $0x1668] sm:$0xff]  ;;  %v1109_v3 = vld [vmem:[%s6537_s29 + $0x1678] sm:$0xff] }
 0x250   : > { %5643 = vmatpush1.bf16.msra.mxu1 %v5642_v15  ;;  %5273 = vmatprep.subr.bf16.mxu0 %v5272_v16  ;;  %v946_v15 = vld [vmem:[%s6537_s29 + $0x1160] sm:$0xff]  ;;  %v940_v16 = vld [vmem:[%s6537_s29 + $0x1130] sm:$0xff] }
 0x251   : > { %5645 = vmatprep.subr.bf16.mxu1 %v5644_v20  ;;  %v963_v20 = vld [vmem:[%s6537_s29 + $0x11e8] sm:$0xff]  ;;  %v5294_v24 = vpack.c.bf16 %v946_v15, %v938_v14  ;;  %v5666_v25 = vpack.c.bf16 %v948_v18, %v940_v16  ;;  %v5684_v14 = vpack.c.bf16 %v1029_v7, %v1021_v6  ;;  %v1028_v15 = vld [vmem:[%s6537_s29 + $0x13f0] sm:$0xff]  ;;  %v1037_v18 = vld [vmem:[%s6537_s29 + $0x1438] sm:$0xff] }
 0x252   : > { %v1035_v16 = vld [vmem:[%s6537_s29 + $0x1428] sm:$0xff]  ;;  %v1098_v7 = vld [vmem:[%s6537_s29 + $0x1620] sm:$0xff] }
 0x253   : > { %5275 = vmatpush1.bf16.msra.mxu0 %v5274_v26  ;;  %v5296_v26 = vpack.c.bf16 %v963_v20, %v955_v19  ;;  %v1045_v19 = vld [vmem:[%s6537_s29 + $0x1478] sm:$0xff] }
 0x254   : > { %5647 = vmatpush1.bf16.msra.mxu1 %v5646_v27  ;;  %5277 = vmatprep.subr.bf16.mxu0 %v5276_v28  ;;  %v954_v27 = vld [vmem:[%s6537_s29 + $0x11a0] sm:$0xff] }
 0x255   : > { %5649 = vmatprep.subr.bf16.mxu1 %v5648_v32  ;;  %v962_v28 = vld [vmem:[%s6537_s29 + $0x11e0] sm:$0xff]  ;;  %v971_v32 = vld [vmem:[%s6537_s29 + $0x1228] sm:$0xff] }
 0x256   : > { %v5298_v36 = vpack.c.bf16 %v962_v28, %v954_v27  ;;  %v1044_v27 = vld [vmem:[%s6537_s29 + $0x1470] sm:$0xff]  ;;  %v1051_v28 = vld [vmem:[%s6537_s29 + $0x14a8] sm:$0xff] }
 0x257   : > { %5279 = vmatpush1.bf16.msra.mxu0 %v5278_v38  ;;  %v5300_v38 = vpack.c.bf16 %v979_v33, %v971_v32  ;;  %v5320_v34 = vpack.c.bf16 %v1059_v29, %v1051_v28 }
 0x258   : > { %5651 = vmatpush1.bf16.msra.mxu1 %v5650_v39  ;;  %5281 = vmatprep.subr.bf16.mxu0 %v5280_v40  ;;  %v970_v39 = vld [vmem:[%s6537_s29 + $0x1220] sm:$0xff] }
 0x259   : > { %5653 = vmatprep.subr.bf16.mxu1 %v5652_v44  ;;  %v978_v40 = vld [vmem:[%s6537_s29 + $0x1260] sm:$0xff]  ;;  %v987_v44 = vld [vmem:[%s6537_s29 + $0x12a8] sm:$0xff] }
 0x25a   : > { %v5302_v48 = vpack.c.bf16 %v978_v40, %v970_v39  ;;  %v1060_v39 = vld [vmem:[%s6537_s29 + $0x14f0] sm:$0xff]  ;;  %v1067_v40 = vld [vmem:[%s6537_s29 + $0x1528] sm:$0xff] }
 0x25b   : > { %5283 = vmatpush1.bf16.msra.mxu0 %v5282_v50  ;;  %v5304_v50 = vpack.c.bf16 %v995_v45, %v987_v44  ;;  %v5324_v46 = vpack.c.bf16 %v1075_v41, %v1067_v40 }
 0x25c   : > { %5655 = vmatpush1.bf16.msra.mxu1 %v5654_v51  ;;  %5285 = vmatprep.subr.bf16.mxu0 %v5284_v52  ;;  %v986_v51 = vld [vmem:[%s6537_s29 + $0x12a0] sm:$0xff] }
 0x25d   : > { %5657 = vmatprep.subr.bf16.mxu1 %v5656_v56  ;;  %v994_v52 = vld [vmem:[%s6537_s29 + $0x12e0] sm:$0xff]  ;;  %v1003_v56 = vld [vmem:[%s6537_s29 + $0x1328] sm:$0xff] }
 0x25e   : > { %2920 = vmatmul.mubr.f32.vlgmr.msra.gmra.mrb[2].mxu0 %v6190_v8  ;;  %v5306_v60 = vpack.c.bf16 %v994_v52, %v986_v51  ;;  %v1076_v51 = vld [vmem:[%s6537_s29 + $0x1570] sm:$0xff]  ;;  %v1083_v52 = vld [vmem:[%s6537_s29 + $0x15a8] sm:$0xff] }
 0x25f   : > { %5287 = vmatpush1.bf16.msra.mxu0 %v5286_v62  ;;  %3346 = vmatmul.mubr.f32.vlgmr.msra.gmra.mrb[2].mxu1 %v6190_v8  ;;  %v5308_v62 = vpack.c.bf16 %v1011_v57, %v1003_v56  ;;  %v5328_v58 = vpack.c.bf16 %v1091_v53, %v1083_v52 }
 0x260   : > { %5659 = vmatpush1.bf16.msra.mxu1 %v5658_v63  ;;  %5289 = vmatprep.subr.bf16.mxu0 %v5288_v0  ;;  %v1002_v63 = vld [vmem:[%s6537_s29 + $0x1320] sm:$0xff] }
 0x261   : > { %5661 = vmatprep.subr.bf16.mxu1 %v5660_v4  ;;  %2990 = vmatprep.mubr.f32.mxu0 %v6191_v21  ;;  %v1010_v0 = vld [vmem:[%s6537_s29 + $0x1360] sm:$0xff]  ;;  %v1019_v4 = vld [vmem:[%s6537_s29 + $0x13a8] sm:$0xff] }
 0x262   : > { %3416 = vmatprep.mubr.f32.mxu1 %v6191_v21  ;;  %v5310_v8 = vpack.c.bf16 %v1010_v0, %v1002_v63  ;;  %v5312_v10 = vpack.c.bf16 %v1027_v5, %v1019_v4  ;;  %v1092_v63 = vld [vmem:[%s6537_s29 + $0x15f0] sm:$0xff]  ;;  %v1099_v0 = vld [vmem:[%s6537_s29 + $0x1628] sm:$0xff] }
 0x263   : > { %5291 = vmatpush1.bf16.msra.mxu0 %v5290_v11  ;;  %v1018_v11 = vld [vmem:[%s6537_s29 + $0x13a0] sm:$0xff]  ;;  %v5332_v6 = vpack.c.bf16 %v1107_v1, %v1099_v0 }
 0x264   : > { %5663 = vmatpush1.bf16.msra.mxu1 %v5662_v12  ;;  %5293 = vmatprep.subr.bf16.mxu0 %v5292_v13  ;;  %v1026_v12 = vld [vmem:[%s6537_s29 + $0x13e0] sm:$0xff]  ;;  %v1020_v13 = vld [vmem:[%s6537_s29 + $0x13b0] sm:$0xff] }
 0x265   : > { %5665 = vmatprep.subr.bf16.mxu1 %v5664_v17  ;;  %v1043_v17 = vld [vmem:[%s6537_s29 + $0x1468] sm:$0xff]  ;;  %v5314_v20 = vpack.c.bf16 %v1026_v12, %v1018_v11  ;;  %v5686_v21 = vpack.c.bf16 %v1028_v15, %v1020_v13  ;;  %v1108_v11 = vld [vmem:[%s6537_s29 + $0x1670] sm:$0xff]  ;;  %v1125_v15 = vld [vmem:[%s6537_s29 + $0x16f8] sm:$0xff] }
 0x266   : > { %v5316_v22 = vpack.c.bf16 %v1043_v17, %v1035_v16  ;;  %v1115_v12 = vld [vmem:[%s6537_s29 + $0x16a8] sm:$0xff] }
 0x267   : > { %5295 = vmatpush1.bf16.msra.mxu0 %v5294_v24  ;;  %v1042_v24 = vld [vmem:[%s6537_s29 + $0x1460] sm:$0xff]  ;;  %v1123_v13 = vld [vmem:[%s6537_s29 + $0x16e8] sm:$0xff] }
 0x268   : > { %5667 = vmatpush1.bf16.msra.mxu1 %v5666_v25  ;;  %5297 = vmatprep.subr.bf16.mxu0 %v5296_v26  ;;  %v1036_v25 = vld [vmem:[%s6537_s29 + $0x1430] sm:$0xff]  ;;  %v5688_v26 = vpack.c.bf16 %v1045_v19, %v1037_v18  ;;  %v5318_v32 = vpack.c.bf16 %v1042_v24, %v1034_v23  ;;  %v5336_v18 = vpack.c.bf16 %v1123_v13, %v1115_v12  ;;  %v1114_v19 = vld [vmem:[%s6537_s29 + $0x16a0] sm:$0xff]  ;;  %v1131_v24 = vld [vmem:[%s6537_s29 + $0x1728] sm:$0xff] }
 0x269   : > { %5669 = vmatprep.subr.bf16.mxu1 %v5668_v30  ;;  %v1053_v30 = vld [vmem:[%s6537_s29 + $0x14b8] sm:$0xff]  ;;  %v5690_v33 = vpack.c.bf16 %v1044_v27, %v1036_v25  ;;  %v1124_v23 = vld [vmem:[%s6537_s29 + $0x16f0] sm:$0xff]  ;;  %v1139_v25 = vld [vmem:[%s6537_s29 + $0x1768] sm:$0xff] }
 0x26a   : > { %v1141_v27 = vld [vmem:[%s6537_s29 + $0x1778] sm:$0xff] }
 0x26b   : > { %5299 = vmatpush1.bf16.msra.mxu0 %v5298_v36  ;;  %v1058_v36 = vld [vmem:[%s6537_s29 + $0x14e0] sm:$0xff]  ;;  %v1205_v12 = vld [vmem:[%s6537_s29 + $0x1978] sm:$0xff] }
 0x26c   : > { %5671 = vmatpush1.bf16.msra.mxu1 %v5670_v37  ;;  %5301 = vmatprep.subr.bf16.mxu0 %v5300_v38  ;;  %v1052_v37 = vld [vmem:[%s6537_s29 + $0x14b0] sm:$0xff]  ;;  %v5692_v38 = vpack.c.bf16 %v1061_v31, %v1053_v30  ;;  %v5322_v44 = vpack.c.bf16 %v1058_v36, %v1050_v35  ;;  %v5340_v30 = vpack.c.bf16 %v1139_v25, %v1131_v24  ;;  %v1130_v31 = vld [vmem:[%s6537_s29 + $0x1720] sm:$0xff]  ;;  %v1147_v36 = vld [vmem:[%s6537_s29 + $0x17a8] sm:$0xff] }
 0x26d   : > { %5673 = vmatprep.subr.bf16.mxu1 %v5672_v42  ;;  %v1069_v42 = vld [vmem:[%s6537_s29 + $0x1538] sm:$0xff]  ;;  %v5694_v45 = vpack.c.bf16 %v1060_v39, %v1052_v37  ;;  %v1140_v35 = vld [vmem:[%s6537_s29 + $0x1770] sm:$0xff]  ;;  %v1155_v37 = vld [vmem:[%s6537_s29 + $0x17e8] sm:$0xff] }
 0x26e   : > { %v1157_v39 = vld [vmem:[%s6537_s29 + $0x17f8] sm:$0xff] }
 0x26f   : > { %5303 = vmatpush1.bf16.msra.mxu0 %v5302_v48  ;;  %v1074_v48 = vld [vmem:[%s6537_s29 + $0x1560] sm:$0xff]  ;;  %v1213_v24 = vld [vmem:[%s6537_s29 + $0x19b8] sm:$0xff] }
 0x270   : > { %5675 = vmatpush1.bf16.msra.mxu1 %v5674_v49  ;;  %5305 = vmatprep.subr.bf16.mxu0 %v5304_v50  ;;  %v1068_v49 = vld [vmem:[%s6537_s29 + $0x1530] sm:$0xff]  ;;  %v5696_v50 = vpack.c.bf16 %v1077_v43, %v1069_v42  ;;  %v5326_v56 = vpack.c.bf16 %v1074_v48, %v1066_v47  ;;  %v5344_v42 = vpack.c.bf16 %v1155_v37, %v1147_v36  ;;  %v1146_v43 = vld [vmem:[%s6537_s29 + $0x17a0] sm:$0xff]  ;;  %v1163_v48 = vld [vmem:[%s6537_s29 + $0x1828] sm:$0xff] }
 0x271   : > { %5677 = vmatprep.subr.bf16.mxu1 %v5676_v54  ;;  %v1085_v54 = vld [vmem:[%s6537_s29 + $0x15b8] sm:$0xff]  ;;  %v5698_v57 = vpack.c.bf16 %v1076_v51, %v1068_v49  ;;  %v1156_v47 = vld [vmem:[%s6537_s29 + $0x17f0] sm:$0xff]  ;;  %v1171_v49 = vld [vmem:[%s6537_s29 + $0x1868] sm:$0xff] }
 0x272   : > { %v1173_v51 = vld [vmem:[%s6537_s29 + $0x1878] sm:$0xff] }
 0x273   : > { %5307 = vmatpush1.bf16.msra.mxu0 %v5306_v60  ;;  %v1090_v60 = vld [vmem:[%s6537_s29 + $0x15e0] sm:$0xff]  ;;  %v1221_v25 = vld [vmem:[%s6537_s29 + $0x19f8] sm:$0xff] }
 0x274   : > { %5679 = vmatpush1.bf16.msra.mxu1 %v5678_v61  ;;  %5309 = vmatprep.subr.bf16.mxu0 %v5308_v62  ;;  %v1084_v61 = vld [vmem:[%s6537_s29 + $0x15b0] sm:$0xff]  ;;  %v5700_v62 = vpack.c.bf16 %v1093_v55, %v1085_v54  ;;  %v5330_v4 = vpack.c.bf16 %v1090_v60, %v1082_v59  ;;  %v5348_v54 = vpack.c.bf16 %v1171_v49, %v1163_v48  ;;  %v1162_v55 = vld [vmem:[%s6537_s29 + $0x1820] sm:$0xff]  ;;  %v1179_v60 = vld [vmem:[%s6537_s29 + $0x18a8] sm:$0xff] }
 0x275   : > { %5681 = vmatprep.subr.bf16.mxu1 %v5680_v2  ;;  %v1101_v2 = vld [vmem:[%s6537_s29 + $0x1638] sm:$0xff]  ;;  %v5702_v5 = vpack.c.bf16 %v1092_v63, %v1084_v61  ;;  %v1172_v59 = vld [vmem:[%s6537_s29 + $0x1870] sm:$0xff]  ;;  %v1187_v61 = vld [vmem:[%s6537_s29 + $0x18e8] sm:$0xff] }
 0x276   : > { %v1189_v63 = vld [vmem:[%s6537_s29 + $0x18f8] sm:$0xff] }
 0x277   : > { %5311 = vmatpush1.bf16.msra.mxu0 %v5310_v8  ;;  %v1106_v8 = vld [vmem:[%s6537_s29 + $0x1660] sm:$0xff]  ;;  %v1229_v36 = vld [vmem:[%s6537_s29 + $0x1a38] sm:$0xff] }
 0x278   : > { %5683 = vmatpush1.bf16.msra.mxu1 %v5682_v9  ;;  %5313 = vmatprep.subr.bf16.mxu0 %v5312_v10  ;;  %v1100_v9 = vld [vmem:[%s6537_s29 + $0x1630] sm:$0xff]  ;;  %v5704_v10 = vpack.c.bf16 %v1109_v3, %v1101_v2  ;;  %v5334_v16 = vpack.c.bf16 %v1106_v8, %v1098_v7  ;;  %v5352_v2 = vpack.c.bf16 %v1187_v61, %v1179_v60  ;;  %v1178_v3 = vld [vmem:[%s6537_s29 + $0x18a0] sm:$0xff]  ;;  %v1195_v8 = vld [vmem:[%s6537_s29 + $0x1928] sm:$0xff] }
 0x279   : > { %5685 = vmatprep.subr.bf16.mxu1 %v5684_v14  ;;  %v1117_v14 = vld [vmem:[%s6537_s29 + $0x16b8] sm:$0xff]  ;;  %v5706_v17 = vpack.c.bf16 %v1108_v11, %v1100_v9  ;;  %v1188_v7 = vld [vmem:[%s6537_s29 + $0x18f0] sm:$0xff]  ;;  %v1203_v9 = vld [vmem:[%s6537_s29 + $0x1968] sm:$0xff] }
 0x27a   : > { %v1197_v11 = vld [vmem:[%s6537_s29 + $0x1938] sm:$0xff] }
 0x27b   : > { %5315 = vmatpush1.bf16.msra.mxu0 %v5314_v20  ;;  %v1122_v20 = vld [vmem:[%s6537_s29 + $0x16e0] sm:$0xff]  ;;  %v1237_v37 = vld [vmem:[%s6537_s29 + $0x1a78] sm:$0xff] }
 0x27c   : > { %5687 = vmatpush1.bf16.msra.mxu1 %v5686_v21  ;;  %5317 = vmatprep.subr.bf16.mxu0 %v5316_v22  ;;  %v1116_v21 = vld [vmem:[%s6537_s29 + $0x16b0] sm:$0xff]  ;;  %v5708_v22 = vpack.c.bf16 %v1125_v15, %v1117_v14  ;;  %v5338_v28 = vpack.c.bf16 %v1122_v20, %v1114_v19  ;;  %v5356_v15 = vpack.c.bf16 %v1203_v9, %v1195_v8  ;;  %v1245_v48 = vld [vmem:[%s6537_s29 + $0x1ab8] sm:$0xff]  ;;  %v1275_v9 = vld [vmem:[%s6537_s29 + $0x1ba8] sm:$0xff] }
 0x27d   : > { %5689 = vmatprep.subr.bf16.mxu1 %v5688_v26  ;;  %v1133_v26 = vld [vmem:[%s6537_s29 + $0x1738] sm:$0xff]  ;;  %v5710_v29 = vpack.c.bf16 %v1124_v23, %v1116_v21  ;;  %v5728_v19 = vpack.c.bf16 %v1205_v12, %v1197_v11  ;;  %v1204_v20 = vld [vmem:[%s6537_s29 + $0x1970] sm:$0xff]  ;;  %v1211_v21 = vld [vmem:[%s6537_s29 + $0x19a8] sm:$0xff] }
 0x27e   : > { %v6193_v23 = vld [vmem:[%s8385_s0 + $0x38] sm:$0xff]  ;;  %v1253_v49 = vld [vmem:[%s6537_s29 + $0x1af8] sm:$0xff] }
 0x27f   : > { %5319 = vmatpush1.bf16.msra.mxu0 %v5318_v32  ;;  %v1138_v32 = vld [vmem:[%s6537_s29 + $0x1760] sm:$0xff]  ;;  %v1261_v60 = vld [vmem:[%s6537_s29 + $0x1b38] sm:$0xff]  ;;  %v1268_v8 = vld [vmem:[%s6537_s29 + $0x1b70] sm:$0xff] }
 0x280   : > { %5691 = vmatpush1.bf16.msra.mxu1 %v5690_v33  ;;  %5321 = vmatprep.subr.bf16.mxu0 %v5320_v34  ;;  %v1132_v33 = vld [vmem:[%s6537_s29 + $0x1730] sm:$0xff]  ;;  %v5712_v34 = vpack.c.bf16 %v1141_v27, %v1133_v26  ;;  %v5342_v40 = vpack.c.bf16 %v1138_v32, %v1130_v31  ;;  %v5732_v32 = vpack.c.bf16 %v1221_v25, %v1213_v24  ;;  %v1269_v61 = vld [vmem:[%s6537_s29 + $0x1b78] sm:$0xff] }
 0x281   : > { %5693 = vmatprep.subr.bf16.mxu1 %v5692_v38  ;;  %v1149_v38 = vld [vmem:[%s6537_s29 + $0x17b8] sm:$0xff]  ;;  %v5714_v41 = vpack.c.bf16 %v1140_v35, %v1132_v33  ;;  %v1212_v31 = vld [vmem:[%s6537_s29 + $0x19b0] sm:$0xff]  ;;  %v1235_v35 = vld [vmem:[%s6537_s29 + $0x1a68] sm:$0xff] }
 0x282   : > { %v1220_v33 = vld [vmem:[%s6537_s29 + $0x19f0] sm:$0xff]  ;;  %v1277_v12 = vld [vmem:[%s6537_s29 + $0x1bb8] sm:$0xff] }
 0x283   : > { %5323 = vmatpush1.bf16.msra.mxu0 %v5322_v44  ;;  %v1154_v44 = vld [vmem:[%s6537_s29 + $0x17e0] sm:$0xff]  ;;  %v1293_v24 = vld [vmem:[%s6537_s29 + $0x1c38] sm:$0xff] }
 0x284   : > { %5695 = vmatpush1.bf16.msra.mxu1 %v5694_v45  ;;  %5325 = vmatprep.subr.bf16.mxu0 %v5324_v46  ;;  %v1148_v45 = vld [vmem:[%s6537_s29 + $0x17b0] sm:$0xff]  ;;  %v5716_v46 = vpack.c.bf16 %v1157_v39, %v1149_v38  ;;  %v5346_v52 = vpack.c.bf16 %v1154_v44, %v1146_v43  ;;  %v5734_v39 = vpack.c.bf16 %v1220_v33, %v1212_v31  ;;  %v1301_v25 = vld [vmem:[%s6537_s29 + $0x1c78] sm:$0xff] }
 0x285   : > { %5697 = vmatprep.subr.bf16.mxu1 %v5696_v50  ;;  %v1165_v50 = vld [vmem:[%s6537_s29 + $0x1838] sm:$0xff]  ;;  %v5718_v53 = vpack.c.bf16 %v1156_v47, %v1148_v45  ;;  %v1228_v43 = vld [vmem:[%s6537_s29 + $0x1a30] sm:$0xff]  ;;  %v5736_v44 = vpack.c.bf16 %v1237_v37, %v1229_v36  ;;  %v1251_v47 = vld [vmem:[%s6537_s29 + $0x1ae8] sm:$0xff] }
 0x286   : > { %v1236_v45 = vld [vmem:[%s6537_s29 + $0x1a70] sm:$0xff]  ;;  %v1309_v36 = vld [vmem:[%s6537_s29 + $0x1cb8] sm:$0xff] }
 0x287   : > { %5327 = vmatpush1.bf16.msra.mxu0 %v5326_v56  ;;  %v1170_v56 = vld [vmem:[%s6537_s29 + $0x1860] sm:$0xff]  ;;  %v1292_v31 = vld [vmem:[%s6537_s29 + $0x1c30] sm:$0xff]  ;;  %v1317_v37 = vld [vmem:[%s6537_s29 + $0x1cf8] sm:$0xff] }
 0x288   : > { %5699 = vmatpush1.bf16.msra.mxu1 %v5698_v57  ;;  %5329 = vmatprep.subr.bf16.mxu0 %v5328_v58  ;;  %v1164_v57 = vld [vmem:[%s6537_s29 + $0x1830] sm:$0xff]  ;;  %v5720_v58 = vpack.c.bf16 %v1173_v51, %v1165_v50  ;;  %v5350_v0 = vpack.c.bf16 %v1170_v56, %v1162_v55  ;;  %v5738_v51 = vpack.c.bf16 %v1236_v45, %v1228_v43 }
 0x289   : > { %5701 = vmatprep.subr.bf16.mxu1 %v5700_v62  ;;  %v1181_v62 = vld [vmem:[%s6537_s29 + $0x18b8] sm:$0xff]  ;;  %v5722_v1 = vpack.c.bf16 %v1172_v59, %v1164_v57  ;;  %v1244_v55 = vld [vmem:[%s6537_s29 + $0x1ab0] sm:$0xff]  ;;  %v5740_v56 = vpack.c.bf16 %v1253_v49, %v1245_v48  ;;  %v1267_v59 = vld [vmem:[%s6537_s29 + $0x1b68] sm:$0xff] }
 0x28a   : > { %v1252_v57 = vld [vmem:[%s6537_s29 + $0x1af0] sm:$0xff]  ;;  %v1325_v48 = vld [vmem:[%s6537_s29 + $0x1d38] sm:$0xff] }
 0x28b   : > { %5331 = vmatpush1.bf16.msra.mxu0 %v5330_v4  ;;  %v1186_v4 = vld [vmem:[%s6537_s29 + $0x18e0] sm:$0xff]  ;;  %v1300_v33 = vld [vmem:[%s6537_s29 + $0x1c70] sm:$0xff]  ;;  %v1333_v49 = vld [vmem:[%s6537_s29 + $0x1d78] sm:$0xff] }
 0x28c   : > { %5703 = vmatpush1.bf16.msra.mxu1 %v5702_v5  ;;  %5333 = vmatprep.subr.bf16.mxu0 %v5332_v6  ;;  %v1180_v5 = vld [vmem:[%s6537_s29 + $0x18b0] sm:$0xff]  ;;  %v5724_v6 = vpack.c.bf16 %v1189_v63, %v1181_v62  ;;  %v5354_v13 = vpack.c.bf16 %v1186_v4, %v1178_v3  ;;  %v1266_v3 = vld [vmem:[%s6537_s29 + $0x1b60] sm:$0xff] }
 0x28d   : > { %5705 = vmatprep.subr.bf16.mxu1 %v5704_v10  ;;  %v6192_v10 = vld [vmem:[%s8385_s0 + $0x20] sm:$0xff]  ;;  %v5726_v14 = vpack.c.bf16 %v1188_v7, %v1180_v5  ;;  %v1260_v4 = vld [vmem:[%s6537_s29 + $0x1b30] sm:$0xff]  ;;  %v5744_v7 = vpack.c.bf16 %v1269_v61, %v1261_v60 }
 0x28e   : > { %v1308_v43 = vld [vmem:[%s6537_s29 + $0x1cb0] sm:$0xff]  ;;  %v1341_v60 = vld [vmem:[%s6537_s29 + $0x1db8] sm:$0xff] }
 0x28f   : > { %5335 = vmatpush1.bf16.msra.mxu0 %v5334_v16  ;;  %v1194_v16 = vld [vmem:[%s6537_s29 + $0x1920] sm:$0xff]  ;;  %v1316_v45 = vld [vmem:[%s6537_s29 + $0x1cf0] sm:$0xff]  ;;  %v1349_v61 = vld [vmem:[%s6537_s29 + $0x1df8] sm:$0xff] }
 0x290   : > { %5707 = vmatpush1.bf16.msra.mxu1 %v5706_v17  ;;  %5337 = vmatprep.subr.bf16.mxu0 %v5336_v18  ;;  %v1202_v17 = vld [vmem:[%s6537_s29 + $0x1960] sm:$0xff]  ;;  %v1196_v18 = vld [vmem:[%s6537_s29 + $0x1930] sm:$0xff] }
 0x291   : > { %5709 = vmatprep.subr.bf16.mxu1 %v5708_v22  ;;  %v1219_v22 = vld [vmem:[%s6537_s29 + $0x19e8] sm:$0xff]  ;;  %v5358_v26 = vpack.c.bf16 %v1202_v17, %v1194_v16  ;;  %v5730_v27 = vpack.c.bf16 %v1204_v20, %v1196_v18  ;;  %v1274_v17 = vld [vmem:[%s6537_s29 + $0x1ba0] sm:$0xff] }
 0x292   : > { %v1282_v18 = vld [vmem:[%s6537_s29 + $0x1be0] sm:$0xff] }
 0x293   : > { %5339 = vmatpush1.bf16.msra.mxu0 %v5338_v28  ;;  %v5360_v28 = vpack.c.bf16 %v1219_v22, %v1211_v21  ;;  %v1284_v21 = vld [vmem:[%s6537_s29 + $0x1bf0] sm:$0xff]  ;;  %v1291_v22 = vld [vmem:[%s6537_s29 + $0x1c28] sm:$0xff] }
 0x294   : > { %5711 = vmatpush1.bf16.msra.mxu1 %v5710_v29  ;;  %5341 = vmatprep.subr.bf16.mxu0 %v5340_v30  ;;  %v1210_v29 = vld [vmem:[%s6537_s29 + $0x19a0] sm:$0xff] }
 0x295   : > { %5713 = vmatprep.subr.bf16.mxu1 %v5712_v34  ;;  %v1218_v30 = vld [vmem:[%s6537_s29 + $0x19e0] sm:$0xff]  ;;  %v1227_v34 = vld [vmem:[%s6537_s29 + $0x1a28] sm:$0xff] }
 0x296   : > { %v5362_v38 = vpack.c.bf16 %v1218_v30, %v1210_v29  ;;  %v1290_v29 = vld [vmem:[%s6537_s29 + $0x1c20] sm:$0xff] }
 0x297   : > { %5343 = vmatpush1.bf16.msra.mxu0 %v5342_v40  ;;  %v5364_v40 = vpack.c.bf16 %v1235_v35, %v1227_v34  ;;  %v1298_v30 = vld [vmem:[%s6537_s29 + $0x1c60] sm:$0xff]  ;;  %v1307_v34 = vld [vmem:[%s6537_s29 + $0x1ca8] sm:$0xff] }
 0x298   : > { %5715 = vmatpush1.bf16.msra.mxu1 %v5714_v41  ;;  %5345 = vmatprep.subr.bf16.mxu0 %v5344_v42  ;;  %v1226_v41 = vld [vmem:[%s6537_s29 + $0x1a20] sm:$0xff]  ;;  %v1315_v35 = vld [vmem:[%s6537_s29 + $0x1ce8] sm:$0xff] }
 0x299   : > { %5717 = vmatprep.subr.bf16.mxu1 %v5716_v46  ;;  %v1234_v42 = vld [vmem:[%s6537_s29 + $0x1a60] sm:$0xff]  ;;  %v1243_v46 = vld [vmem:[%s6537_s29 + $0x1aa8] sm:$0xff] }
 0x29a   : > { %v5366_v50 = vpack.c.bf16 %v1234_v42, %v1226_v41  ;;  %v1306_v41 = vld [vmem:[%s6537_s29 + $0x1ca0] sm:$0xff] }
 0x29b   : > { %5347 = vmatpush1.bf16.msra.mxu0 %v5346_v52  ;;  %v5368_v52 = vpack.c.bf16 %v1251_v47, %v1243_v46  ;;  %v1314_v42 = vld [vmem:[%s6537_s29 + $0x1ce0] sm:$0xff]  ;;  %v1323_v46 = vld [vmem:[%s6537_s29 + $0x1d28] sm:$0xff] }
 0x29c   : > { %5719 = vmatpush1.bf16.msra.mxu1 %v5718_v53  ;;  %5349 = vmatprep.subr.bf16.mxu0 %v5348_v54  ;;  %v1242_v53 = vld [vmem:[%s6537_s29 + $0x1aa0] sm:$0xff]  ;;  %v1331_v47 = vld [vmem:[%s6537_s29 + $0x1d68] sm:$0xff] }
 0x29d   : > { %5721 = vmatprep.subr.bf16.mxu1 %v5720_v58  ;;  %v1250_v54 = vld [vmem:[%s6537_s29 + $0x1ae0] sm:$0xff]  ;;  %v1259_v58 = vld [vmem:[%s6537_s29 + $0x1b28] sm:$0xff] }
 0x29e   : > { %2991 = vmatmul.mubr.f32.vlgmr.msra.gmra.mrb[2].mxu0 %v6192_v10  ;;  %v5370_v62 = vpack.c.bf16 %v1250_v54, %v1242_v53  ;;  %v1322_v53 = vld [vmem:[%s6537_s29 + $0x1d20] sm:$0xff] }
 0x29f   : > { %5351 = vmatpush1.bf16.msra.mxu0 %v5350_v0  ;;  %3417 = vmatmul.mubr.f32.vlgmr.msra.gmra.mrb[2].mxu1 %v6192_v10  ;;  %v5742_v0 = vpack.c.bf16 %v1252_v57, %v1244_v55  ;;  %v1283_v10 = vld [vmem:[%s6537_s29 + $0x1be8] sm:$0xff]  ;;  %v1330_v54 = vld [vmem:[%s6537_s29 + $0x1d60] sm:$0xff]  ;;  %v1324_v55 = vld [vmem:[%s6537_s29 + $0x1d30] sm:$0xff] }
 0x2a0   : > { %5723 = vmatpush1.bf16.msra.mxu1 %v5722_v1  ;;  %5353 = vmatprep.subr.bf16.mxu0 %v5352_v2  ;;  %v5372_v1 = vpack.c.bf16 %v1267_v59, %v1259_v58  ;;  %v1258_v2 = vld [vmem:[%s6537_s29 + $0x1b20] sm:$0xff]  ;;  %v5376_v16 = vpack.c.bf16 %v1283_v10, %v1275_v9  ;;  %v1332_v57 = vld [vmem:[%s6537_s29 + $0x1d70] sm:$0xff]  ;;  %v1339_v58 = vld [vmem:[%s6537_s29 + $0x1da8] sm:$0xff] }
 0x2a1   : > { %5725 = vmatprep.subr.bf16.mxu1 %v5724_v6  ;;  %3061 = vmatprep.mubr.f32.mxu0 %v6193_v23  ;;  %v1347_v59 = vld [vmem:[%s6537_s29 + $0x1de8] sm:$0xff] }
 0x2a2   : > { %3487 = vmatprep.mubr.f32.mxu1 %v6193_v23  ;;  %v1299_v23 = vld [vmem:[%s6537_s29 + $0x1c68] sm:$0xff] }
 0x2a3   : > { %5355 = vmatpush1.bf16.msra.mxu0 %v5354_v13  ;;  %v1285_v13 = vld [vmem:[%s6537_s29 + $0x1bf8] sm:$0xff]  ;;  %v1355_v9 = vld [vmem:[%s6537_s29 + $0x1e28] sm:$0xff] }
 0x2a4   : > { %5727 = vmatpush1.bf16.msra.mxu1 %v5726_v14  ;;  %5357 = vmatprep.subr.bf16.mxu0 %v5356_v15  ;;  %v5374_v14 = vpack.c.bf16 %v1266_v3, %v1258_v2  ;;  %v5746_v15 = vpack.c.bf16 %v1268_v8, %v1260_v4  ;;  %v5748_v20 = vpack.c.bf16 %v1285_v13, %v1277_v12  ;;  %v1338_v2 = vld [vmem:[%s6537_s29 + $0x1da0] sm:$0xff]  ;;  %v1340_v4 = vld [vmem:[%s6537_s29 + $0x1db0] sm:$0xff]  ;;  %v1363_v10 = vld [vmem:[%s6537_s29 + $0x1e68] sm:$0xff] }
 0x2a5   : > { %5729 = vmatprep.subr.bf16.mxu1 %v5728_v19  ;;  %v1276_v19 = vld [vmem:[%s6537_s29 + $0x1bb0] sm:$0xff]  ;;  %v1346_v3 = vld [vmem:[%s6537_s29 + $0x1de0] sm:$0xff]  ;;  %v1357_v12 = vld [vmem:[%s6537_s29 + $0x1e38] sm:$0xff] }
 0x2a6   : > { %v1348_v8 = vld [vmem:[%s6537_s29 + $0x1df0] sm:$0xff]  ;;  %v1365_v13 = vld [vmem:[%s6537_s29 + $0x1e78] sm:$0xff] }
 0x2a7   : > { %5359 = vmatpush1.bf16.msra.mxu0 %v5358_v26  ;;  %v5378_v26 = vpack.c.bf16 %v1282_v18, %v1274_v17  ;;  %v1354_v17 = vld [vmem:[%s6537_s29 + $0x1e20] sm:$0xff] }
 0x2a8   : > { %5731 = vmatpush1.bf16.msra.mxu1 %v5730_v27  ;;  %5361 = vmatprep.subr.bf16.mxu0 %v5360_v28  ;;  %v5750_v27 = vpack.c.bf16 %v1284_v21, %v1276_v19  ;;  %v5380_v28 = vpack.c.bf16 %v1299_v23, %v1291_v22  ;;  %v1362_v18 = vld [vmem:[%s6537_s29 + $0x1e60] sm:$0xff]  ;;  %v1356_v19 = vld [vmem:[%s6537_s29 + $0x1e30] sm:$0xff]  ;;  %v1371_v22 = vld [vmem:[%s6537_s29 + $0x1ea8] sm:$0xff] }
 0x2a9   : > { %5733 = vmatprep.subr.bf16.mxu1 %v5732_v32  ;;  %v5752_v32 = vpack.c.bf16 %v1301_v25, %v1293_v24  ;;  %v1364_v21 = vld [vmem:[%s6537_s29 + $0x1e70] sm:$0xff]  ;;  %v1379_v23 = vld [vmem:[%s6537_s29 + $0x1ee8] sm:$0xff]  ;;  %v1373_v24 = vld [vmem:[%s6537_s29 + $0x1eb8] sm:$0xff] }
 0x2aa   : > { %v1381_v25 = vld [vmem:[%s6537_s29 + $0x1ef8] sm:$0xff] }
 0x2ab   : > { %5363 = vmatpush1.bf16.msra.mxu0 %v5362_v38  ;;  %v5382_v38 = vpack.c.bf16 %v1298_v30, %v1290_v29  ;;  %v1370_v29 = vld [vmem:[%s6537_s29 + $0x1ea0] sm:$0xff] }
 0x2ac   : > { %5735 = vmatpush1.bf16.msra.mxu1 %v5734_v39  ;;  %5365 = vmatprep.subr.bf16.mxu0 %v5364_v40  ;;  %v5754_v39 = vpack.c.bf16 %v1300_v33, %v1292_v31  ;;  %v5384_v40 = vpack.c.bf16 %v1315_v35, %v1307_v34  ;;  %v1378_v30 = vld [vmem:[%s6537_s29 + $0x1ee0] sm:$0xff]  ;;  %v1372_v31 = vld [vmem:[%s6537_s29 + $0x1eb0] sm:$0xff]  ;;  %v1387_v34 = vld [vmem:[%s6537_s29 + $0x1f28] sm:$0xff] }
 0x2ad   : > { %5737 = vmatprep.subr.bf16.mxu1 %v5736_v44  ;;  %v5756_v44 = vpack.c.bf16 %v1317_v37, %v1309_v36  ;;  %v1380_v33 = vld [vmem:[%s6537_s29 + $0x1ef0] sm:$0xff]  ;;  %v1395_v35 = vld [vmem:[%s6537_s29 + $0x1f68] sm:$0xff]  ;;  %v1389_v36 = vld [vmem:[%s6537_s29 + $0x1f38] sm:$0xff] }
 0x2ae   : > { %v1397_v37 = vld [vmem:[%s6537_s29 + $0x1f78] sm:$0xff] }
 0x2af   : > { %5367 = vmatpush1.bf16.msra.mxu0 %v5366_v50  ;;  %v5386_v50 = vpack.c.bf16 %v1314_v42, %v1306_v41  ;;  %v1386_v41 = vld [vmem:[%s6537_s29 + $0x1f20] sm:$0xff] }
 0x2b0   : > { %5739 = vmatpush1.bf16.msra.mxu1 %v5738_v51  ;;  %v7816_v63 = vpop.f32.mrb[0].mxu0  ;;  %5369 = vmatprep.subr.bf16.mxu0 %v5368_v52  ;;  %v5758_v51 = vpack.c.bf16 %v1316_v45, %v1308_v43  ;;  %v5388_v52 = vpack.c.bf16 %v1331_v47, %v1323_v46  ;;  %v1394_v42 = vld [vmem:[%s6537_s29 + $0x1f60] sm:$0xff]  ;;  %v1388_v43 = vld [vmem:[%s6537_s29 + $0x1f30] sm:$0xff]  ;;  %v1403_v46 = vld [vmem:[%s6537_s29 + $0x1fa8] sm:$0xff] }
 0x2b1   : > { %v7821_v5 = vpop.f32.mrb[0].mxu1  ;;  %v7823_v6 = vpop.f32.mrb[1].mxu0  ;;  %5741 = vmatprep.subr.bf16.mxu1 %v5740_v56  ;;  %v5760_v56 = vpack.c.bf16 %v1333_v49, %v1325_v48  ;;  %v1396_v45 = vld [vmem:[%s6537_s29 + $0x1f70] sm:$0xff]  ;;  %v1411_v47 = vld [vmem:[%s6537_s29 + $0x1fe8] sm:$0xff]  ;;  %v1405_v48 = vld [vmem:[%s6537_s29 + $0x1fb8] sm:$0xff] }
 0x2b2   : > { %v7828_v11 = vpop.f32.mrb[1].mxu1  ;;  %v1413_v49 = vld [vmem:[%s6537_s29 + $0x1ff8] sm:$0xff] }
 0x2b3   : > { %5371 = vmatpush1.bf16.msra.mxu0 %v5370_v62  ;;  %v5390_v62 = vpack.c.bf16 %v1330_v54, %v1322_v53  ;;  %v1402_v53 = vld [vmem:[%s6537_s29 + $0x1fa0] sm:$0xff] }
 0x2b4   : > { %5743 = vmatpush1.bf16.msra.mxu1 %v5742_v0  ;;  %5373 = vmatprep.subr.bf16.mxu0 %v5372_v1  ;;  %v5762_v0 = vpack.c.bf16 %v1332_v57, %v1324_v55  ;;  %v5392_v1 = vpack.c.bf16 %v1347_v59, %v1339_v58  ;;  %v1410_v54 = vld [vmem:[%s6537_s29 + $0x1fe0] sm:$0xff]  ;;  %v1404_v55 = vld [vmem:[%s6537_s29 + $0x1fb0] sm:$0xff]  ;;  %v1419_v58 = vld [vmem:[%s6537_s29 + $0x2028] sm:$0xff] }
 0x2b5   : > { %5745 = vmatprep.subr.bf16.mxu1 %v5744_v7  ;;  %v5764_v7 = vpack.c.bf16 %v1349_v61, %v1341_v60  ;;  %v1412_v57 = vld [vmem:[%s6537_s29 + $0x1ff0] sm:$0xff]  ;;  %v1427_v59 = vld [vmem:[%s6537_s29 + $0x2068] sm:$0xff]  ;;  %v1421_v60 = vld [vmem:[%s6537_s29 + $0x2038] sm:$0xff] }
 0x2b6   : > { %v1429_v61 = vld [vmem:[%s6537_s29 + $0x2078] sm:$0xff] }
 0x2b7   : > { %5375 = vmatpush1.bf16.msra.mxu0 %v5374_v14  ;;  %v5394_v14 = vpack.c.bf16 %v1346_v3, %v1338_v2  ;;  %v1418_v2 = vld [vmem:[%s6537_s29 + $0x2020] sm:$0xff] }
 0x2b8   : > { %5747 = vmatpush1.bf16.msra.mxu1 %v5746_v15  ;;  %5377 = vmatprep.subr.bf16.mxu0 %v5376_v16  ;;  %v5766_v15 = vpack.c.bf16 %v1348_v8, %v1340_v4  ;;  %v5396_v16 = vpack.c.bf16 %v1363_v10, %v1355_v9  ;;  %v1426_v3 = vld [vmem:[%s6537_s29 + $0x2060] sm:$0xff]  ;;  %v1420_v4 = vld [vmem:[%s6537_s29 + $0x2030] sm:$0xff]  ;;  %v1435_v9 = vld [vmem:[%s6537_s29 + $0x20a8] sm:$0xff] }
 0x2b9   : > { %5749 = vmatprep.subr.bf16.mxu1 %v5748_v20  ;;  %v5768_v20 = vpack.c.bf16 %v1365_v13, %v1357_v12  ;;  %v1428_v8 = vld [vmem:[%s6537_s29 + $0x2070] sm:$0xff]  ;;  %v1443_v10 = vld [vmem:[%s6537_s29 + $0x20e8] sm:$0xff]  ;;  %v1437_v12 = vld [vmem:[%s6537_s29 + $0x20b8] sm:$0xff] }
 0x2ba   : > { %v1445_v13 = vld [vmem:[%s6537_s29 + $0x20f8] sm:$0xff] }
 0x2bb   : > { %5379 = vmatpush1.bf16.msra.mxu0 %v5378_v26  ;;  %v5398_v26 = vpack.c.bf16 %v1362_v18, %v1354_v17  ;;  %v1434_v17 = vld [vmem:[%s6537_s29 + $0x20a0] sm:$0xff] }
 0x2bc   : > { %5751 = vmatpush1.bf16.msra.mxu1 %v5750_v27  ;;  %5381 = vmatprep.subr.bf16.mxu0 %v5380_v28  ;;  %v5770_v27 = vpack.c.bf16 %v1364_v21, %v1356_v19  ;;  %v5400_v28 = vpack.c.bf16 %v1379_v23, %v1371_v22  ;;  %v1442_v18 = vld [vmem:[%s6537_s29 + $0x20e0] sm:$0xff]  ;;  %v1436_v19 = vld [vmem:[%s6537_s29 + $0x20b0] sm:$0xff]  ;;  %v1451_v22 = vld [vmem:[%s6537_s29 + $0x2128] sm:$0xff] }
 0x2bd   : > { %5753 = vmatprep.subr.bf16.mxu1 %v5752_v32  ;;  %v5772_v32 = vpack.c.bf16 %v1381_v25, %v1373_v24  ;;  %v1444_v21 = vld [vmem:[%s6537_s29 + $0x20f0] sm:$0xff]  ;;  %v1459_v23 = vld [vmem:[%s6537_s29 + $0x2168] sm:$0xff]  ;;  %v1453_v25 = vld [vmem:[%s6537_s29 + $0x2138] sm:$0xff] }
 0x2be   : > { %v6194_v24 = vld [vmem:[%s8385_s0 + $0x30] sm:$0xff] }
 0x2bf   : > { %5383 = vmatpush1.bf16.msra.mxu0 %v5382_v38  ;;  %v5402_v38 = vpack.c.bf16 %v1378_v30, %v1370_v29  ;;  %v5420_v29 = vpack.c.bf16 %v1459_v23, %v1451_v22  ;;  %v1450_v30 = vld [vmem:[%s6537_s29 + $0x2120] sm:$0xff]  ;;  %v1524_v23 = vld [vmem:[%s6537_s29 + $0x2370] sm:$0xff] }
 0x2c0   : > { %5755 = vmatpush1.bf16.msra.mxu1 %v5754_v39  ;;  %5385 = vmatprep.subr.bf16.mxu0 %v5384_v40  ;;  %v5774_v39 = vpack.c.bf16 %v1380_v33, %v1372_v31  ;;  %v5404_v40 = vpack.c.bf16 %v1395_v35, %v1387_v34  ;;  %v1458_v31 = vld [vmem:[%s6537_s29 + $0x2160] sm:$0xff]  ;;  %v1460_v34 = vld [vmem:[%s6537_s29 + $0x2170] sm:$0xff]  ;;  %v1467_v35 = vld [vmem:[%s6537_s29 + $0x21a8] sm:$0xff] }
 0x2c1   : > { %5757 = vmatprep.subr.bf16.mxu1 %v5756_v44  ;;  %v5776_v44 = vpack.c.bf16 %v1397_v37, %v1389_v36  ;;  %v1475_v36 = vld [vmem:[%s6537_s29 + $0x21e8] sm:$0xff]  ;;  %v6195_v37 = vld [vmem:[%s8385_s0 + $0x48] sm:$0xff] }
 0x2c3   : > { %5387 = vmatpush1.bf16.msra.mxu0 %v5386_v50  ;;  %v5406_v50 = vpack.c.bf16 %v1394_v42, %v1386_v41  ;;  %v5424_v42 = vpack.c.bf16 %v1475_v36, %v1467_v35  ;;  %v1540_v35 = vld [vmem:[%s6537_s29 + $0x23f0] sm:$0xff]  ;;  %v1547_v36 = vld [vmem:[%s6537_s29 + $0x2428] sm:$0xff] }
 0x2c4   : > { %5759 = vmatpush1.bf16.msra.mxu1 %v5758_v51  ;;  %5389 = vmatprep.subr.bf16.mxu0 %v5388_v52  ;;  %v5778_v51 = vpack.c.bf16 %v1396_v45, %v1388_v43  ;;  %v5408_v52 = vpack.c.bf16 %v1411_v47, %v1403_v46  ;;  %v1466_v43 = vld [vmem:[%s6537_s29 + $0x21a0] sm:$0xff]  ;;  %v1468_v45 = vld [vmem:[%s6537_s29 + $0x21b0] sm:$0xff] }
 0x2c5   : > { %5761 = vmatprep.subr.bf16.mxu1 %v5760_v56  ;;  %v5780_v56 = vpack.c.bf16 %v1413_v49, %v1405_v48  ;;  %v1476_v47 = vld [vmem:[%s6537_s29 + $0x21f0] sm:$0xff]  ;;  %v1483_v48 = vld [vmem:[%s6537_s29 + $0x2228] sm:$0xff] }
 0x2c6   : > { %v1491_v49 = vld [vmem:[%s6537_s29 + $0x2268] sm:$0xff] }
 0x2c7   : > { %5391 = vmatpush1.bf16.msra.mxu0 %v5390_v62  ;;  %v5410_v62 = vpack.c.bf16 %v1410_v54, %v1402_v53  ;;  %v5798_v53 = vpack.c.bf16 %v1476_v47, %v1468_v45  ;;  %v5428_v54 = vpack.c.bf16 %v1491_v49, %v1483_v48  ;;  %v1548_v45 = vld [vmem:[%s6537_s29 + $0x2430] sm:$0xff]  ;;  %v1563_v48 = vld [vmem:[%s6537_s29 + $0x24a8] sm:$0xff] }
 0x2c8   : > { %5763 = vmatpush1.bf16.msra.mxu1 %v5762_v0  ;;  %5393 = vmatprep.subr.bf16.mxu0 %v5392_v1  ;;  %v5782_v0 = vpack.c.bf16 %v1412_v57, %v1404_v55  ;;  %v5412_v1 = vpack.c.bf16 %v1427_v59, %v1419_v58  ;;  %v1482_v55 = vld [vmem:[%s6537_s29 + $0x2220] sm:$0xff]  ;;  %v1484_v57 = vld [vmem:[%s6537_s29 + $0x2230] sm:$0xff]  ;;  %v1571_v49 = vld [vmem:[%s6537_s29 + $0x24e8] sm:$0xff] }
 0x2c9   : > { %5765 = vmatprep.subr.bf16.mxu1 %v5764_v7  ;;  %v5784_v7 = vpack.c.bf16 %v1429_v61, %v1421_v60  ;;  %v1492_v59 = vld [vmem:[%s6537_s29 + $0x2270] sm:$0xff]  ;;  %v1499_v60 = vld [vmem:[%s6537_s29 + $0x22a8] sm:$0xff] }
 0x2ca   : > { %v1507_v61 = vld [vmem:[%s6537_s29 + $0x22e8] sm:$0xff]  ;;  %v1556_v47 = vld [vmem:[%s6537_s29 + $0x2470] sm:$0xff] }
 0x2cb   : > { %5395 = vmatpush1.bf16.msra.mxu0 %v5394_v14  ;;  %v5414_v14 = vpack.c.bf16 %v1426_v3, %v1418_v2  ;;  %v5802_v2 = vpack.c.bf16 %v1492_v59, %v1484_v57  ;;  %v5432_v3 = vpack.c.bf16 %v1507_v61, %v1499_v60  ;;  %v1564_v57 = vld [vmem:[%s6537_s29 + $0x24b0] sm:$0xff]  ;;  %v1579_v60 = vld [vmem:[%s6537_s29 + $0x2528] sm:$0xff] }
 0x2cc   : > { %5767 = vmatpush1.bf16.msra.mxu1 %v5766_v15  ;;  %5397 = vmatprep.subr.bf16.mxu0 %v5396_v16  ;;  %v5786_v15 = vpack.c.bf16 %v1428_v8, %v1420_v4  ;;  %v5416_v16 = vpack.c.bf16 %v1443_v10, %v1435_v9  ;;  %v1498_v4 = vld [vmem:[%s6537_s29 + $0x22a0] sm:$0xff]  ;;  %v1500_v8 = vld [vmem:[%s6537_s29 + $0x22b0] sm:$0xff]  ;;  %v1587_v61 = vld [vmem:[%s6537_s29 + $0x2568] sm:$0xff] }
 0x2cd   : > { %5769 = vmatprep.subr.bf16.mxu1 %v5768_v20  ;;  %v5788_v20 = vpack.c.bf16 %v1445_v13, %v1437_v12  ;;  %v1508_v10 = vld [vmem:[%s6537_s29 + $0x22f0] sm:$0xff]  ;;  %v1515_v12 = vld [vmem:[%s6537_s29 + $0x2328] sm:$0xff] }
 0x2ce   : > { %v1523_v13 = vld [vmem:[%s6537_s29 + $0x2368] sm:$0xff]  ;;  %v1572_v59 = vld [vmem:[%s6537_s29 + $0x24f0] sm:$0xff] }
 0x2cf   : > { %5399 = vmatpush1.bf16.msra.mxu0 %v5398_v26  ;;  %v1461_v26 = vld [vmem:[%s6537_s29 + $0x2178] sm:$0xff] }
 0x2d0   : > { %5771 = vmatpush1.bf16.msra.mxu1 %v5770_v27  ;;  %5401 = vmatprep.subr.bf16.mxu0 %v5400_v28  ;;  %v5418_v27 = vpack.c.bf16 %v1442_v18, %v1434_v17  ;;  %v5790_v28 = vpack.c.bf16 %v1444_v21, %v1436_v19  ;;  %v5792_v33 = vpack.c.bf16 %v1461_v26, %v1453_v25  ;;  %v1514_v19 = vld [vmem:[%s6537_s29 + $0x2320] sm:$0xff]  ;;  %v1516_v21 = vld [vmem:[%s6537_s29 + $0x2330] sm:$0xff]  ;;  %v1539_v25 = vld [vmem:[%s6537_s29 + $0x23e8] sm:$0xff] }
 0x2d1   : > { %5773 = vmatprep.subr.bf16.mxu1 %v5772_v32  ;;  %v1452_v32 = vld [vmem:[%s6537_s29 + $0x2130] sm:$0xff]  ;;  %v5806_v17 = vpack.c.bf16 %v1508_v10, %v1500_v8  ;;  %v5436_v18 = vpack.c.bf16 %v1523_v13, %v1515_v12  ;;  %v1533_v26 = vld [vmem:[%s6537_s29 + $0x23b8] sm:$0xff]  ;;  %v1595_v12 = vld [vmem:[%s6537_s29 + $0x25a8] sm:$0xff] }
 0x2d2   : > { %v5794_v41 = vpack.c.bf16 %v1460_v34, %v1452_v32  ;;  %v1538_v32 = vld [vmem:[%s6537_s29 + $0x23e0] sm:$0xff]  ;;  %v1580_v8 = vld [vmem:[%s6537_s29 + $0x2530] sm:$0xff]  ;;  %v1603_v13 = vld [vmem:[%s6537_s29 + $0x25e8] sm:$0xff] }
 0x2d3   : > { %5403 = vmatpush1.bf16.msra.mxu0 %v5402_v38  ;;  %v1469_v38 = vld [vmem:[%s6537_s29 + $0x21b8] sm:$0xff]  ;;  %v1588_v10 = vld [vmem:[%s6537_s29 + $0x2570] sm:$0xff] }
 0x2d4   : > { %5775 = vmatpush1.bf16.msra.mxu1 %v5774_v39  ;;  %5405 = vmatprep.subr.bf16.mxu0 %v5404_v40  ;;  %v1477_v39 = vld [vmem:[%s6537_s29 + $0x21f8] sm:$0xff]  ;;  %v5422_v40 = vpack.c.bf16 %v1458_v31, %v1450_v30  ;;  %v1530_v31 = vld [vmem:[%s6537_s29 + $0x23a0] sm:$0xff] }
 0x2d5   : > { %5777 = vmatprep.subr.bf16.mxu1 %v5776_v44  ;;  %v1474_v44 = vld [vmem:[%s6537_s29 + $0x21e0] sm:$0xff]  ;;  %v5796_v46 = vpack.c.bf16 %v1477_v39, %v1469_v38  ;;  %v1549_v38 = vld [vmem:[%s6537_s29 + $0x2438] sm:$0xff] }
 0x2d6   : > { %v1557_v39 = vld [vmem:[%s6537_s29 + $0x2478] sm:$0xff] }
 0x2d7   : > { %5407 = vmatpush1.bf16.msra.mxu0 %v5406_v50  ;;  %v1485_v50 = vld [vmem:[%s6537_s29 + $0x2238] sm:$0xff] }
 0x2d8   : > { %5779 = vmatpush1.bf16.msra.mxu1 %v5778_v51  ;;  %5409 = vmatprep.subr.bf16.mxu0 %v5408_v52  ;;  %v1493_v51 = vld [vmem:[%s6537_s29 + $0x2278] sm:$0xff]  ;;  %v5426_v52 = vpack.c.bf16 %v1474_v44, %v1466_v43  ;;  %v1546_v43 = vld [vmem:[%s6537_s29 + $0x2420] sm:$0xff] }
 0x2d9   : > { %5781 = vmatprep.subr.bf16.mxu1 %v5780_v56  ;;  %v1490_v56 = vld [vmem:[%s6537_s29 + $0x2260] sm:$0xff]  ;;  %v5800_v58 = vpack.c.bf16 %v1493_v51, %v1485_v50  ;;  %v1565_v50 = vld [vmem:[%s6537_s29 + $0x24b8] sm:$0xff] }
 0x2da   : > { %v1554_v44 = vld [vmem:[%s6537_s29 + $0x2460] sm:$0xff]  ;;  %v1573_v51 = vld [vmem:[%s6537_s29 + $0x24f8] sm:$0xff] }
 0x2db   : > { %5411 = vmatpush1.bf16.msra.mxu0 %v5410_v62  ;;  %v1501_v62 = vld [vmem:[%s6537_s29 + $0x22b8] sm:$0xff] }
 0x2dc   : > { %5783 = vmatpush1.bf16.msra.mxu1 %v5782_v0  ;;  %5413 = vmatprep.subr.bf16.mxu0 %v5412_v1  ;;  %v1509_v0 = vld [vmem:[%s6537_s29 + $0x22f8] sm:$0xff]  ;;  %v5430_v1 = vpack.c.bf16 %v1490_v56, %v1482_v55  ;;  %v1562_v55 = vld [vmem:[%s6537_s29 + $0x24a0] sm:$0xff] }
 0x2dd   : > { %5785 = vmatprep.subr.bf16.mxu1 %v5784_v7  ;;  %v1506_v7 = vld [vmem:[%s6537_s29 + $0x22e0] sm:$0xff]  ;;  %v5804_v9 = vpack.c.bf16 %v1509_v0, %v1501_v62  ;;  %v1581_v62 = vld [vmem:[%s6537_s29 + $0x2538] sm:$0xff] }
 0x2de   : > { %3062 = vmatmul.mubr.f32.vlgmr.msra.gmra.mrb[2].mxu0 %v6194_v24  ;;  %v1570_v56 = vld [vmem:[%s6537_s29 + $0x24e0] sm:$0xff]  ;;  %v1589_v0 = vld [vmem:[%s6537_s29 + $0x2578] sm:$0xff] }
 0x2df   : > { %5415 = vmatpush1.bf16.msra.mxu0 %v5414_v14  ;;  %3488 = vmatmul.mubr.f32.vlgmr.msra.gmra.mrb[2].mxu1 %v6194_v24  ;;  %v1517_v14 = vld [vmem:[%s6537_s29 + $0x2338] sm:$0xff]  ;;  %v1531_v24 = vld [vmem:[%s6537_s29 + $0x23a8] sm:$0xff] }
 0x2e0   : > { %5787 = vmatpush1.bf16.msra.mxu1 %v5786_v15  ;;  %5417 = vmatprep.subr.bf16.mxu0 %v5416_v16  ;;  %v1525_v15 = vld [vmem:[%s6537_s29 + $0x2378] sm:$0xff]  ;;  %v5434_v16 = vpack.c.bf16 %v1506_v7, %v1498_v4  ;;  %v5440_v30 = vpack.c.bf16 %v1539_v25, %v1531_v24  ;;  %v1578_v4 = vld [vmem:[%s6537_s29 + $0x2520] sm:$0xff]  ;;  %v1611_v24 = vld [vmem:[%s6537_s29 + $0x2628] sm:$0xff] }
 0x2e1   : > { %5789 = vmatprep.subr.bf16.mxu1 %v5788_v20  ;;  %3132 = vmatprep.mubr.f32.mxu0 %v6195_v37  ;;  %v1522_v20 = vld [vmem:[%s6537_s29 + $0x2360] sm:$0xff]  ;;  %v5808_v22 = vpack.c.bf16 %v1525_v15, %v1517_v14  ;;  %v1597_v14 = vld [vmem:[%s6537_s29 + $0x25b8] sm:$0xff]  ;;  %v1619_v25 = vld [vmem:[%s6537_s29 + $0x2668] sm:$0xff] }
 0x2e2   : > { %3558 = vmatprep.mubr.f32.mxu1 %v6195_v37  ;;  %v1555_v37 = vld [vmem:[%s6537_s29 + $0x2468] sm:$0xff]  ;;  %v1586_v7 = vld [vmem:[%s6537_s29 + $0x2560] sm:$0xff]  ;;  %v1605_v15 = vld [vmem:[%s6537_s29 + $0x25f8] sm:$0xff] }
 0x2e3   : > { %5419 = vmatpush1.bf16.msra.mxu0 %v5418_v27  ;;  %v1541_v27 = vld [vmem:[%s6537_s29 + $0x23f8] sm:$0xff] }
 0x2e4   : > { %5791 = vmatpush1.bf16.msra.mxu1 %v5790_v28  ;;  %5421 = vmatprep.subr.bf16.mxu0 %v5420_v29  ;;  %v5438_v28 = vpack.c.bf16 %v1522_v20, %v1514_v19  ;;  %v5810_v29 = vpack.c.bf16 %v1524_v23, %v1516_v21  ;;  %v5812_v34 = vpack.c.bf16 %v1541_v27, %v1533_v26  ;;  %v1594_v19 = vld [vmem:[%s6537_s29 + $0x25a0] sm:$0xff]  ;;  %v1596_v21 = vld [vmem:[%s6537_s29 + $0x25b0] sm:$0xff]  ;;  %v1613_v26 = vld [vmem:[%s6537_s29 + $0x2638] sm:$0xff] }
 0x2e5   : > { %5793 = vmatprep.subr.bf16.mxu1 %v5792_v33  ;;  %v1532_v33 = vld [vmem:[%s6537_s29 + $0x23b0] sm:$0xff]  ;;  %v1602_v20 = vld [vmem:[%s6537_s29 + $0x25e0] sm:$0xff]  ;;  %v1621_v27 = vld [vmem:[%s6537_s29 + $0x2678] sm:$0xff] }
 0x2e6   : > { %v1604_v23 = vld [vmem:[%s6537_s29 + $0x25f0] sm:$0xff] }
 0x2e7   : > { %5423 = vmatpush1.bf16.msra.mxu0 %v5422_v40  ;;  %v5442_v40 = vpack.c.bf16 %v1538_v32, %v1530_v31  ;;  %v1610_v31 = vld [vmem:[%s6537_s29 + $0x2620] sm:$0xff] }
 0x2e8   : > { %5795 = vmatpush1.bf16.msra.mxu1 %v5794_v41  ;;  %5425 = vmatprep.subr.bf16.mxu0 %v5424_v42  ;;  %v5814_v41 = vpack.c.bf16 %v1540_v35, %v1532_v33  ;;  %v5444_v42 = vpack.c.bf16 %v1555_v37, %v1547_v36  ;;  %v1618_v32 = vld [vmem:[%s6537_s29 + $0x2660] sm:$0xff]  ;;  %v1612_v33 = vld [vmem:[%s6537_s29 + $0x2630] sm:$0xff]  ;;  %v1627_v36 = vld [vmem:[%s6537_s29 + $0x26a8] sm:$0xff] }
 0x2e9   : > { %5797 = vmatprep.subr.bf16.mxu1 %v5796_v46  ;;  %v5816_v46 = vpack.c.bf16 %v1557_v39, %v1549_v38  ;;  %v1620_v35 = vld [vmem:[%s6537_s29 + $0x2670] sm:$0xff]  ;;  %v1635_v37 = vld [vmem:[%s6537_s29 + $0x26e8] sm:$0xff]  ;;  %v1629_v38 = vld [vmem:[%s6537_s29 + $0x26b8] sm:$0xff] }
 0x2ea   : > { %v1637_v39 = vld [vmem:[%s6537_s29 + $0x26f8] sm:$0xff] }
 0x2eb   : > { %5427 = vmatpush1.bf16.msra.mxu0 %v5426_v52  ;;  %v5446_v52 = vpack.c.bf16 %v1554_v44, %v1546_v43  ;;  %v1626_v43 = vld [vmem:[%s6537_s29 + $0x26a0] sm:$0xff] }
 0x2ec   : > { %5799 = vmatpush1.bf16.msra.mxu1 %v5798_v53  ;;  %5429 = vmatprep.subr.bf16.mxu0 %v5428_v54  ;;  %v5818_v53 = vpack.c.bf16 %v1556_v47, %v1548_v45  ;;  %v5448_v54 = vpack.c.bf16 %v1571_v49, %v1563_v48  ;;  %v1634_v44 = vld [vmem:[%s6537_s29 + $0x26e0] sm:$0xff]  ;;  %v1628_v45 = vld [vmem:[%s6537_s29 + $0x26b0] sm:$0xff]  ;;  %v1643_v48 = vld [vmem:[%s6537_s29 + $0x2728] sm:$0xff] }
 0x2ed   : > { %5801 = vmatprep.subr.bf16.mxu1 %v5800_v58  ;;  %v5820_v58 = vpack.c.bf16 %v1573_v51, %v1565_v50  ;;  %v1636_v47 = vld [vmem:[%s6537_s29 + $0x26f0] sm:$0xff]  ;;  %v1651_v49 = vld [vmem:[%s6537_s29 + $0x2768] sm:$0xff]  ;;  %v1645_v50 = vld [vmem:[%s6537_s29 + $0x2738] sm:$0xff] }
 0x2ee   : > { %v1653_v51 = vld [vmem:[%s6537_s29 + $0x2778] sm:$0xff] }
 0x2ef   : > { %5431 = vmatpush1.bf16.msra.mxu0 %v5430_v1  ;;  %v5450_v1 = vpack.c.bf16 %v1570_v56, %v1562_v55  ;;  %v1642_v55 = vld [vmem:[%s6537_s29 + $0x2720] sm:$0xff] }
 0x2f0   : > { %5803 = vmatpush1.bf16.msra.mxu1 %v5802_v2  ;;  %5433 = vmatprep.subr.bf16.mxu0 %v5432_v3  ;;  %v5822_v2 = vpack.c.bf16 %v1572_v59, %v1564_v57  ;;  %v5452_v3 = vpack.c.bf16 %v1587_v61, %v1579_v60  ;;  %v1650_v56 = vld [vmem:[%s6537_s29 + $0x2760] sm:$0xff]  ;;  %v1644_v57 = vld [vmem:[%s6537_s29 + $0x2730] sm:$0xff]  ;;  %v1659_v60 = vld [vmem:[%s6537_s29 + $0x27a8] sm:$0xff] }
 0x2f1   : > { %5805 = vmatprep.subr.bf16.mxu1 %v5804_v9  ;;  %v5824_v9 = vpack.c.bf16 %v1589_v0, %v1581_v62  ;;  %v1652_v59 = vld [vmem:[%s6537_s29 + $0x2770] sm:$0xff]  ;;  %v1667_v61 = vld [vmem:[%s6537_s29 + $0x27e8] sm:$0xff]  ;;  %v1661_v62 = vld [vmem:[%s6537_s29 + $0x27b8] sm:$0xff] }
 0x2f2   : > { %v1669_v0 = vld [vmem:[%s6537_s29 + $0x27f8] sm:$0xff] }
 0x2f3   : > { %5435 = vmatpush1.bf16.msra.mxu0 %v5434_v16  ;;  %v5454_v16 = vpack.c.bf16 %v1586_v7, %v1578_v4  ;;  %v1658_v4 = vld [vmem:[%s6537_s29 + $0x27a0] sm:$0xff] }
 0x2f4   : > { %5807 = vmatpush1.bf16.msra.mxu1 %v5806_v17  ;;  %5437 = vmatprep.subr.bf16.mxu0 %v5436_v18  ;;  %v5826_v17 = vpack.c.bf16 %v1588_v10, %v1580_v8  ;;  %v5456_v18 = vpack.c.bf16 %v1603_v13, %v1595_v12  ;;  %v1666_v7 = vld [vmem:[%s6537_s29 + $0x27e0] sm:$0xff]  ;;  %v1660_v8 = vld [vmem:[%s6537_s29 + $0x27b0] sm:$0xff]  ;;  %v1675_v12 = vld [vmem:[%s6537_s29 + $0x2828] sm:$0xff] }
 0x2f5   : > { %5809 = vmatprep.subr.bf16.mxu1 %v5808_v22  ;;  %v5828_v22 = vpack.c.bf16 %v1605_v15, %v1597_v14  ;;  %v1668_v10 = vld [vmem:[%s6537_s29 + $0x27f0] sm:$0xff]  ;;  %v1683_v13 = vld [vmem:[%s6537_s29 + $0x2868] sm:$0xff]  ;;  %v1677_v14 = vld [vmem:[%s6537_s29 + $0x2838] sm:$0xff] }
 0x2f6   : > { %v1685_v15 = vld [vmem:[%s6537_s29 + $0x2878] sm:$0xff] }
 0x2f7   : > { %5439 = vmatpush1.bf16.msra.mxu0 %v5438_v28  ;;  %v5458_v28 = vpack.c.bf16 %v1602_v20, %v1594_v19  ;;  %v1674_v19 = vld [vmem:[%s6537_s29 + $0x2820] sm:$0xff] }
 0x2f8   : > { %5811 = vmatpush1.bf16.msra.mxu1 %v5810_v29  ;;  %5441 = vmatprep.subr.bf16.mxu0 %v5440_v30  ;;  %v5830_v29 = vpack.c.bf16 %v1604_v23, %v1596_v21  ;;  %v5460_v30 = vpack.c.bf16 %v1619_v25, %v1611_v24  ;;  %v1682_v20 = vld [vmem:[%s6537_s29 + $0x2860] sm:$0xff]  ;;  %v1676_v21 = vld [vmem:[%s6537_s29 + $0x2830] sm:$0xff]  ;;  %v1691_v24 = vld [vmem:[%s6537_s29 + $0x28a8] sm:$0xff] }
 0x2f9   : > { %5813 = vmatprep.subr.bf16.mxu1 %v5812_v34  ;;  %v5832_v34 = vpack.c.bf16 %v1621_v27, %v1613_v26  ;;  %v1684_v23 = vld [vmem:[%s6537_s29 + $0x2870] sm:$0xff]  ;;  %v1699_v25 = vld [vmem:[%s6537_s29 + $0x28e8] sm:$0xff]  ;;  %v1693_v26 = vld [vmem:[%s6537_s29 + $0x28b8] sm:$0xff] }
 0x2fa   : > { %v1701_v27 = vld [vmem:[%s6537_s29 + $0x28f8] sm:$0xff] }
 0x2fb   : > { %5443 = vmatpush1.bf16.msra.mxu0 %v5442_v40  ;;  %v5462_v40 = vpack.c.bf16 %v1618_v32, %v1610_v31  ;;  %v1690_v31 = vld [vmem:[%s6537_s29 + $0x28a0] sm:$0xff] }
 0x2fc   : > { %5815 = vmatpush1.bf16.msra.mxu1 %v5814_v41  ;;  %5445 = vmatprep.subr.bf16.mxu0 %v5444_v42  ;;  %v5834_v41 = vpack.c.bf16 %v1620_v35, %v1612_v33  ;;  %v5464_v42 = vpack.c.bf16 %v1635_v37, %v1627_v36  ;;  %v1698_v32 = vld [vmem:[%s6537_s29 + $0x28e0] sm:$0xff]  ;;  %v1692_v33 = vld [vmem:[%s6537_s29 + $0x28b0] sm:$0xff]  ;;  %v1707_v36 = vld [vmem:[%s6537_s29 + $0x2928] sm:$0xff] }
 0x2fd   : > { %5817 = vmatprep.subr.bf16.mxu1 %v5816_v46  ;;  %v5836_v46 = vpack.c.bf16 %v1637_v39, %v1629_v38  ;;  %v1700_v35 = vld [vmem:[%s6537_s29 + $0x28f0] sm:$0xff]  ;;  %v1715_v37 = vld [vmem:[%s6537_s29 + $0x2968] sm:$0xff]  ;;  %v6196_v38 = vld [vmem:[%s8385_s0 + $0x40] sm:$0xff] }
 0x2fe   : > { %v1709_v39 = vld [vmem:[%s6537_s29 + $0x2938] sm:$0xff] }
 0x2ff   : > { %5447 = vmatpush1.bf16.msra.mxu0 %v5446_v52  ;;  %v5466_v52 = vpack.c.bf16 %v1634_v44, %v1626_v43  ;;  %v5484_v43 = vpack.c.bf16 %v1715_v37, %v1707_v36  ;;  %v1706_v44 = vld [vmem:[%s6537_s29 + $0x2920] sm:$0xff]  ;;  %v1780_v37 = vld [vmem:[%s6537_s29 + $0x2b70] sm:$0xff] }
 0x300   : > { %5819 = vmatpush1.bf16.msra.mxu1 %v5818_v53  ;;  %5449 = vmatprep.subr.bf16.mxu0 %v5448_v54  ;;  %v5838_v53 = vpack.c.bf16 %v1636_v47, %v1628_v45  ;;  %v5468_v54 = vpack.c.bf16 %v1651_v49, %v1643_v48  ;;  %v1714_v45 = vld [vmem:[%s6537_s29 + $0x2960] sm:$0xff]  ;;  %v1716_v48 = vld [vmem:[%s6537_s29 + $0x2970] sm:$0xff]  ;;  %v1723_v49 = vld [vmem:[%s6537_s29 + $0x29a8] sm:$0xff] }
 0x301   : > { %5821 = vmatprep.subr.bf16.mxu1 %v5820_v58  ;;  %v5840_v58 = vpack.c.bf16 %v1653_v51, %v1645_v50  ;;  %v1731_v50 = vld [vmem:[%s6537_s29 + $0x29e8] sm:$0xff]  ;;  %v6197_v51 = vld [vmem:[%s8385_s0 + $0x58] sm:$0xff] }
 0x303   : > { %5451 = vmatpush1.bf16.msra.mxu0 %v5450_v1  ;;  %v5470_v1 = vpack.c.bf16 %v1650_v56, %v1642_v55  ;;  %v5488_v56 = vpack.c.bf16 %v1731_v50, %v1723_v49  ;;  %v1796_v49 = vld [vmem:[%s6537_s29 + $0x2bf0] sm:$0xff]  ;;  %v1803_v50 = vld [vmem:[%s6537_s29 + $0x2c28] sm:$0xff] }
 0x304   : > { %5823 = vmatpush1.bf16.msra.mxu1 %v5822_v2  ;;  %5453 = vmatprep.subr.bf16.mxu0 %v5452_v3  ;;  %v5842_v2 = vpack.c.bf16 %v1652_v59, %v1644_v57  ;;  %v5472_v3 = vpack.c.bf16 %v1667_v61, %v1659_v60  ;;  %v1722_v57 = vld [vmem:[%s6537_s29 + $0x29a0] sm:$0xff]  ;;  %v1724_v59 = vld [vmem:[%s6537_s29 + $0x29b0] sm:$0xff] }
 0x305   : > { %5825 = vmatprep.subr.bf16.mxu1 %v5824_v9  ;;  %v5844_v9 = vpack.c.bf16 %v1669_v0, %v1661_v62  ;;  %v1732_v61 = vld [vmem:[%s6537_s29 + $0x29f0] sm:$0xff]  ;;  %v1739_v62 = vld [vmem:[%s6537_s29 + $0x2a28] sm:$0xff] }
 0x306   : > { %v1747_v0 = vld [vmem:[%s6537_s29 + $0x2a68] sm:$0xff] }
 0x307   : > { %5455 = vmatpush1.bf16.msra.mxu0 %v5454_v16  ;;  %v5474_v16 = vpack.c.bf16 %v1666_v7, %v1658_v4  ;;  %v5862_v4 = vpack.c.bf16 %v1732_v61, %v1724_v59  ;;  %v5492_v7 = vpack.c.bf16 %v1747_v0, %v1739_v62  ;;  %v1804_v59 = vld [vmem:[%s6537_s29 + $0x2c30] sm:$0xff]  ;;  %v1819_v62 = vld [vmem:[%s6537_s29 + $0x2ca8] sm:$0xff] }
 0x308   : > { %5827 = vmatpush1.bf16.msra.mxu1 %v5826_v17  ;;  %5457 = vmatprep.subr.bf16.mxu0 %v5456_v18  ;;  %v5846_v17 = vpack.c.bf16 %v1668_v10, %v1660_v8  ;;  %v5476_v18 = vpack.c.bf16 %v1683_v13, %v1675_v12  ;;  %v1738_v8 = vld [vmem:[%s6537_s29 + $0x2a20] sm:$0xff]  ;;  %v1740_v10 = vld [vmem:[%s6537_s29 + $0x2a30] sm:$0xff]  ;;  %v1827_v0 = vld [vmem:[%s6537_s29 + $0x2ce8] sm:$0xff] }
 0x309   : > { %5829 = vmatprep.subr.bf16.mxu1 %v5828_v22  ;;  %v5848_v22 = vpack.c.bf16 %v1685_v15, %v1677_v14  ;;  %v1748_v13 = vld [vmem:[%s6537_s29 + $0x2a70] sm:$0xff]  ;;  %v1755_v14 = vld [vmem:[%s6537_s29 + $0x2aa8] sm:$0xff] }
 0x30a   : > { %v1763_v15 = vld [vmem:[%s6537_s29 + $0x2ae8] sm:$0xff]  ;;  %v1812_v61 = vld [vmem:[%s6537_s29 + $0x2c70] sm:$0xff] }
 0x30b   : > { %5459 = vmatpush1.bf16.msra.mxu0 %v5458_v28  ;;  %v5478_v28 = vpack.c.bf16 %v1682_v20, %v1674_v19  ;;  %v5866_v19 = vpack.c.bf16 %v1748_v13, %v1740_v10  ;;  %v5496_v20 = vpack.c.bf16 %v1763_v15, %v1755_v14  ;;  %v1820_v10 = vld [vmem:[%s6537_s29 + $0x2cb0] sm:$0xff]  ;;  %v1835_v14 = vld [vmem:[%s6537_s29 + $0x2d28] sm:$0xff] }
 0x30c   : > { %5831 = vmatpush1.bf16.msra.mxu1 %v5830_v29  ;;  %5461 = vmatprep.subr.bf16.mxu0 %v5460_v30  ;;  %v5850_v29 = vpack.c.bf16 %v1684_v23, %v1676_v21  ;;  %v5480_v30 = vpack.c.bf16 %v1699_v25, %v1691_v24  ;;  %v1754_v21 = vld [vmem:[%s6537_s29 + $0x2aa0] sm:$0xff]  ;;  %v1756_v23 = vld [vmem:[%s6537_s29 + $0x2ab0] sm:$0xff]  ;;  %v1843_v15 = vld [vmem:[%s6537_s29 + $0x2d68] sm:$0xff] }
 0x30d   : > { %5833 = vmatprep.subr.bf16.mxu1 %v5832_v34  ;;  %v5852_v34 = vpack.c.bf16 %v1701_v27, %v1693_v26  ;;  %v1764_v25 = vld [vmem:[%s6537_s29 + $0x2af0] sm:$0xff]  ;;  %v1771_v26 = vld [vmem:[%s6537_s29 + $0x2b28] sm:$0xff] }
 0x30e   : > { %v1779_v27 = vld [vmem:[%s6537_s29 + $0x2b68] sm:$0xff]  ;;  %v1828_v13 = vld [vmem:[%s6537_s29 + $0x2cf0] sm:$0xff] }
 0x30f   : > { %5463 = vmatpush1.bf16.msra.mxu0 %v5462_v40  ;;  %v1717_v40 = vld [vmem:[%s6537_s29 + $0x2978] sm:$0xff] }
 0x310   : > { %5835 = vmatpush1.bf16.msra.mxu1 %v5834_v41  ;;  %5465 = vmatprep.subr.bf16.mxu0 %v5464_v42  ;;  %v5482_v41 = vpack.c.bf16 %v1698_v32, %v1690_v31  ;;  %v5854_v42 = vpack.c.bf16 %v1700_v35, %v1692_v33  ;;  %v5856_v47 = vpack.c.bf16 %v1717_v40, %v1709_v39  ;;  %v1770_v33 = vld [vmem:[%s6537_s29 + $0x2b20] sm:$0xff]  ;;  %v1772_v35 = vld [vmem:[%s6537_s29 + $0x2b30] sm:$0xff]  ;;  %v1795_v39 = vld [vmem:[%s6537_s29 + $0x2be8] sm:$0xff] }
 0x311   : > { %5837 = vmatprep.subr.bf16.mxu1 %v5836_v46  ;;  %v1708_v46 = vld [vmem:[%s6537_s29 + $0x2930] sm:$0xff]  ;;  %v5870_v31 = vpack.c.bf16 %v1764_v25, %v1756_v23  ;;  %v5500_v32 = vpack.c.bf16 %v1779_v27, %v1771_v26  ;;  %v1789_v40 = vld [vmem:[%s6537_s29 + $0x2bb8] sm:$0xff]  ;;  %v1842_v23 = vld [vmem:[%s6537_s29 + $0x2d60] sm:$0xff] }
 0x312   : > { %v5858_v55 = vpack.c.bf16 %v1716_v48, %v1708_v46  ;;  %v1794_v46 = vld [vmem:[%s6537_s29 + $0x2be0] sm:$0xff]  ;;  %v1844_v26 = vld [vmem:[%s6537_s29 + $0x2d70] sm:$0xff]  ;;  %v1851_v27 = vld [vmem:[%s6537_s29 + $0x2da8] sm:$0xff] }
 0x313   : > { %5467 = vmatpush1.bf16.msra.mxu0 %v5466_v52  ;;  %v1725_v52 = vld [vmem:[%s6537_s29 + $0x29b8] sm:$0xff] }
 0x314   : > { %5839 = vmatpush1.bf16.msra.mxu1 %v5838_v53  ;;  %5469 = vmatprep.subr.bf16.mxu0 %v5468_v54  ;;  %v1733_v53 = vld [vmem:[%s6537_s29 + $0x29f8] sm:$0xff]  ;;  %v5486_v54 = vpack.c.bf16 %v1714_v45, %v1706_v44  ;;  %v1786_v45 = vld [vmem:[%s6537_s29 + $0x2ba0] sm:$0xff] }
 0x315   : > { %5841 = vmatprep.subr.bf16.mxu1 %v5840_v58  ;;  %v1730_v58 = vld [vmem:[%s6537_s29 + $0x29e0] sm:$0xff]  ;;  %v5860_v60 = vpack.c.bf16 %v1733_v53, %v1725_v52  ;;  %v1805_v52 = vld [vmem:[%s6537_s29 + $0x2c38] sm:$0xff] }
 0x316   : > { %v1813_v53 = vld [vmem:[%s6537_s29 + $0x2c78] sm:$0xff] }
 0x317   : > { %5471 = vmatpush1.bf16.msra.mxu0 %v5470_v1  ;;  %v1741_v1 = vld [vmem:[%s6537_s29 + $0x2a38] sm:$0xff] }
 0x318   : > { %5843 = vmatpush1.bf16.msra.mxu1 %v5842_v2  ;;  %5473 = vmatprep.subr.bf16.mxu0 %v5472_v3  ;;  %v1749_v2 = vld [vmem:[%s6537_s29 + $0x2a78] sm:$0xff]  ;;  %v5490_v3 = vpack.c.bf16 %v1730_v58, %v1722_v57  ;;  %v1802_v57 = vld [vmem:[%s6537_s29 + $0x2c20] sm:$0xff] }
 0x319   : > { %5845 = vmatprep.subr.bf16.mxu1 %v5844_v9  ;;  %v1746_v9 = vld [vmem:[%s6537_s29 + $0x2a60] sm:$0xff]  ;;  %v5864_v12 = vpack.c.bf16 %v1749_v2, %v1741_v1  ;;  %v1821_v1 = vld [vmem:[%s6537_s29 + $0x2cb8] sm:$0xff] }
 0x31a   : > { %v1810_v58 = vld [vmem:[%s6537_s29 + $0x2c60] sm:$0xff]  ;;  %v1829_v2 = vld [vmem:[%s6537_s29 + $0x2cf8] sm:$0xff] }
 0x31b   : > { %5475 = vmatpush1.bf16.msra.mxu0 %v5474_v16  ;;  %v1757_v16 = vld [vmem:[%s6537_s29 + $0x2ab8] sm:$0xff] }
 0x31c   : > { %5847 = vmatpush1.bf16.msra.mxu1 %v5846_v17  ;;  %5477 = vmatprep.subr.bf16.mxu0 %v5476_v18  ;;  %v1765_v17 = vld [vmem:[%s6537_s29 + $0x2af8] sm:$0xff]  ;;  %v5494_v18 = vpack.c.bf16 %v1746_v9, %v1738_v8  ;;  %v1818_v8 = vld [vmem:[%s6537_s29 + $0x2ca0] sm:$0xff] }
 0x31d   : > { %5849 = vmatprep.subr.bf16.mxu1 %v5848_v22  ;;  %v1762_v22 = vld [vmem:[%s6537_s29 + $0x2ae0] sm:$0xff]  ;;  %v5868_v24 = vpack.c.bf16 %v1765_v17, %v1757_v16  ;;  %v1888_v16 = vlaneseq  ;;  %v1837_v17 = vld [vmem:[%s6537_s29 + $0x2d38] sm:$0xff] }
 0x31e   : > { %3133 = vmatmul.mubr.f32.vlgmr.msra.gmra.mrb[2].mxu0 %v6196_v38  ;;  %v1826_v9 = vld [vmem:[%s6537_s29 + $0x2ce0] sm:$0xff] }
 0x31f   : > { %5479 = vmatpush1.bf16.msra.mxu0 %v5478_v28  ;;  %3559 = vmatmul.mubr.f32.vlgmr.msra.gmra.mrb[2].mxu1 %v6196_v38  ;;  %v1773_v28 = vld [vmem:[%s6537_s29 + $0x2b38] sm:$0xff]  ;;  %v1787_v38 = vld [vmem:[%s6537_s29 + $0x2ba8] sm:$0xff] }
 0x320   : > { %5851 = vmatpush1.bf16.msra.mxu1 %v5850_v29  ;;  %5481 = vmatprep.subr.bf16.mxu0 %v5480_v30  ;;  %v1781_v29 = vld [vmem:[%s6537_s29 + $0x2b78] sm:$0xff]  ;;  %v5498_v30 = vpack.c.bf16 %v1762_v22, %v1754_v21  ;;  %v5504_v44 = vpack.c.bf16 %v1795_v39, %v1787_v38  ;;  %v5516_v21 = vpack.c.bf16 %v1843_v15, %v1835_v14  ;;  %v1834_v22 = vld [vmem:[%s6537_s29 + $0x2d20] sm:$0xff]  ;;  %v1860_v39 = vld [vmem:[%s6537_s29 + $0x2df0] sm:$0xff] }
 0x321   : > { %5853 = vmatprep.subr.bf16.mxu1 %v5852_v34  ;;  %4264 = vmatprep.mubr.msk.f32.mxu0 %vm1928_vm1, %v6197_v51  ;;  %v1778_v34 = vld [vmem:[%s6537_s29 + $0x2b60] sm:$0xff]  ;;  %v5872_v36 = vpack.c.bf16 %v1781_v29, %v1773_v28  ;;  %v1859_v28 = vld [vmem:[%s6537_s29 + $0x2de8] sm:$0xff]  ;;  %v8132_v29 = vshrl.u32 %v1888_v16, 7  ;;  %v3680_v14 = vld [vmem:[%s6569_s20 + $0x98] sm:$0xff] }
 0x322   : > { %4265 = vmatprep.mubr.msk.f32.mxu1 %vm1928_vm1, %v6197_v51  ;;  %v1811_v51 = vld [vmem:[%s6537_s29 + $0x2c68] sm:$0xff] }
 0x323   : > { %5483 = vmatpush1.bf16.msra.mxu0 %v5482_v41  ;;  %v1797_v41 = vld [vmem:[%s6537_s29 + $0x2bf8] sm:$0xff] }
 0x324   : > { %5855 = vmatpush1.bf16.msra.mxu1 %v5854_v42  ;;  %5485 = vmatprep.subr.bf16.mxu0 %v5484_v43  ;;  %v5502_v42 = vpack.c.bf16 %v1778_v34, %v1770_v33  ;;  %v5874_v43 = vpack.c.bf16 %v1780_v37, %v1772_v35  ;;  %v5876_v48 = vpack.c.bf16 %v1797_v41, %v1789_v40  ;;  %v1850_v35 = vld [vmem:[%s6537_s29 + $0x2da0] sm:$0xff]  ;;  %v1852_v37 = vld [vmem:[%s6537_s29 + $0x2db0] sm:$0xff]  ;;  %v1867_v40 = vld [vmem:[%s6537_s29 + $0x2e28] sm:$0xff] }
 0x325   : > { %5857 = vmatprep.subr.bf16.mxu1 %v5856_v47  ;;  %v1788_v47 = vld [vmem:[%s6537_s29 + $0x2bb0] sm:$0xff]  ;;  %v5520_v34 = vpack.c.bf16 %v1859_v28, %v1851_v27  ;;  %v1875_v41 = vld [vmem:[%s6537_s29 + $0x2e68] sm:$0xff]  ;;  %v3681_v27 = vld [vmem:[%s6569_s20 + $0xa0] sm:$0xff] }
 0x326   : > { %v3682_v28 = vld [vmem:[%s6569_s20 + $0xa8] sm:$0xff] }
 0x327   : > { %5487 = vmatpush1.bf16.msra.mxu0 %v5486_v54  ;;  %v5506_v54 = vpack.c.bf16 %v1794_v46, %v1786_v45  ;;  %v8150_v45 = vld [vmem:[%s357_s14] sm:$0xff]  ;;  %v1902_v46 = vsub.s32 3, %v8132_v29 }
 0x328   : > { %5859 = vmatpush1.bf16.msra.mxu1 %v5858_v55  ;;  %5489 = vmatprep.subr.bf16.mxu0 %v5488_v56  ;;  %v5878_v55 = vpack.c.bf16 %v1796_v49, %v1788_v47  ;;  %v5508_v56 = vpack.c.bf16 %v1811_v51, %v1803_v50  ;;  %v5524_v49 = vpack.c.bf16 %v1875_v41, %v1867_v40  ;;  %v1866_v50 = vld [vmem:[%s6537_s29 + $0x2e20] sm:$0xff]  ;;  %v3697_v40 = vld [vmem:[%s6569_s20 + $0x120] sm:$0xff] }
 0x329   : > { %5861 = vmatprep.subr.bf16.mxu1 %v5860_v60  ;;  %v5880_v60 = vpack.c.bf16 %v1813_v53, %v1805_v52  ;;  %v1874_v51 = vld [vmem:[%s6537_s29 + $0x2e60] sm:$0xff]  ;;  %v1868_v53 = vld [vmem:[%s6537_s29 + $0x2e30] sm:$0xff] }
 0x32b   : > { %5491 = vmatpush1.bf16.msra.mxu0 %v5490_v3  ;;  %v5510_v3 = vpack.c.bf16 %v1810_v58, %v1802_v57  ;;  %v5526_v57 = vpack.c.bf16 %v1874_v51, %v1866_v50  ;;  %v3667_v51 = vld [vmem:[%s6569_s20 + $0x30] sm:$0xff] }
 0x32c   : > { %5863 = vmatpush1.bf16.msra.mxu1 %v5862_v4  ;;  %5493 = vmatprep.subr.bf16.mxu0 %v5492_v7  ;;  %v5882_v4 = vpack.c.bf16 %v1812_v61, %v1804_v59  ;;  %v5512_v7 = vpack.c.bf16 %v1827_v0, %v1819_v62  ;;  %v1883_v59 = vld [vmem:[%s6537_s29 + $0x2ea8] sm:$0xff]  ;;  %v3677_v62 = vld [vmem:[%s6569_s20 + $0x80] sm:$0xff]  ;;  %v3678_v0 = vld [vmem:[%s6569_s20 + $0x88] sm:$0xff] }
 0x32d   : > { %5865 = vmatprep.subr.bf16.mxu1 %v5864_v12  ;;  %v5884_v12 = vpack.c.bf16 %v1829_v2, %v1821_v1  ;;  %v3709_v1 = vld [vmem:[%s6569_s20 + $0x180] sm:$0xff] }
 0x32f   : > { %5495 = vmatpush1.bf16.msra.mxu0 %v5494_v18  ;;  %v1845_v18 = vld [vmem:[%s6537_s29 + $0x2d78] sm:$0xff] }
 0x330   : > { %5867 = vmatpush1.bf16.msra.mxu1 %v5866_v19  ;;  %5497 = vmatprep.subr.bf16.mxu0 %v5496_v20  ;;  %v5514_v19 = vpack.c.bf16 %v1826_v9, %v1818_v8  ;;  %v5886_v20 = vpack.c.bf16 %v1828_v13, %v1820_v10  ;;  %v5888_v25 = vpack.c.bf16 %v1845_v18, %v1837_v17  ;;  %v1882_v8 = vld [vmem:[%s6537_s29 + $0x2ea0] sm:$0xff]  ;;  %v3693_v9 = vld [vmem:[%s6569_s20 + $0x100] sm:$0xff]  ;;  %v3679_v13 = vld [vmem:[%s6569_s20 + $0x90] sm:$0xff] }
 0x331   : > { %5869 = vmatprep.subr.bf16.mxu1 %v5868_v24  ;;  %v1836_v24 = vld [vmem:[%s6537_s29 + $0x2d30] sm:$0xff]  ;;  %v3694_v10 = vld [vmem:[%s6569_s20 + $0x108] sm:$0xff]  ;;  %v3711_v17 = vld [vmem:[%s6569_s20 + $0x190] sm:$0xff] }
 0x332   : > { %v5890_v33 = vpack.c.bf16 %v1844_v26, %v1836_v24  ;;  %v3712_v18 = vld [vmem:[%s6569_s20 + $0x198] sm:$0xff]  ;;  %v6198_v24 = vld [vmem:[%s8385_s0 + $0x50] sm:$0xff] }
 0x333   : > { %5499 = vmatpush1.bf16.msra.mxu0 %v5498_v30  ;;  %v1853_v30 = vld [vmem:[%s6537_s29 + $0x2db8] sm:$0xff]  ;;  %v3696_v26 = vld [vmem:[%s6569_s20 + $0x118] sm:$0xff] }
 0x334   : > { %5871 = vmatpush1.bf16.msra.mxu1 %v5870_v31  ;;  %5501 = vmatprep.subr.bf16.mxu0 %v5500_v32  ;;  %v1861_v31 = vld [vmem:[%s6537_s29 + $0x2df8] sm:$0xff]  ;;  %v5518_v32 = vpack.c.bf16 %v1842_v23, %v1834_v22  ;;  %v3664_v22 = vld [vmem:[%s6569_s20 + $0x18] sm:$0xff]  ;;  %v3695_v23 = vld [vmem:[%s6569_s20 + $0x110] sm:$0xff] }
 0x335   : > { %5873 = vmatprep.subr.bf16.mxu1 %v5872_v36  ;;  %v1858_v36 = vld [vmem:[%s6537_s29 + $0x2de0] sm:$0xff]  ;;  %v5892_v38 = vpack.c.bf16 %v1861_v31, %v1853_v30  ;;  %v5936_v30 = vpack.c.bf16 %v3712_v18, %v3711_v17  ;;  %v3713_v31 = vld [vmem:[%s6569_s20 + $0x1a0] sm:$0xff]  ;;  %v3704_v18 = vld [vmem:[%s6569_s20 + $0x158] sm:$0xff] }
 0x336   : > { %v5522_v47 = vpack.c.bf16 %v1858_v36, %v1850_v35  ;;  %v5938_v36 = vpack.c.bf16 %v3696_v26, %v3695_v23  ;;  %v3722_v23 = vld [vmem:[%s6569_s20 + $0x1e8] sm:$0xff] }
 0x337   : > { %5503 = vmatpush1.bf16.msra.mxu0 %v5502_v42  ;;  %v1894_v42 = vsub.s32 1, %v8132_v29 }
 0x338   : > { %5875 = vmatpush1.bf16.msra.mxu1 %v5874_v43  ;;  %5505 = vmatprep.subr.bf16.mxu0 %v5504_v44  ;;  %v1869_v43 = vld [vmem:[%s6537_s29 + $0x2e38] sm:$0xff] }
 0x339   : > { %5877 = vmatprep.subr.bf16.mxu1 %v5876_v48  ;;  %v1877_v44 = vld [vmem:[%s6537_s29 + $0x2e78] sm:$0xff]  ;;  %v5894_v48 = vpack.c.bf16 %v1860_v39, %v1852_v37  ;;  %v5908_v37 = vpack.c.bf16 %v3682_v28, %v3681_v27  ;;  %v3666_v39 = vld [vmem:[%s6569_s20 + $0x28] sm:$0xff] }
 0x33a   : > { %v5896_v52 = vpack.c.bf16 %v1877_v44, %v1869_v43  ;;  %v3683_v43 = vld [vmem:[%s6569_s20 + $0xb0] sm:$0xff]  ;;  %v3684_v44 = vld [vmem:[%s6569_s20 + $0xb8] sm:$0xff]  ;;  %v3673_v27 = vld [vmem:[%s6569_s20 + $0x60] sm:$0xff] }
 0x33b   : > { %5507 = vmatpush1.bf16.msra.mxu0 %v5506_v54  ;;  %v1876_v54 = vld [vmem:[%s6537_s29 + $0x2e70] sm:$0xff]  ;;  %v5912_v50 = vpack.c.bf16 %v3684_v44, %v3683_v43  ;;  %v3674_v28 = vld [vmem:[%s6569_s20 + $0x68] sm:$0xff]  ;;  %v3707_v44 = vld [vmem:[%s6569_s20 + $0x170] sm:$0xff] }
 0x33c   : > { %5879 = vmatpush1.bf16.msra.mxu1 %v5878_v55  ;;  %5509 = vmatprep.subr.bf16.mxu0 %v5508_v56  ;;  %v1895_v55 = vrot.slane %v8150_v45, %v1894_v42  ;;  %v1903_v56 = vrot.slane %v8150_v45, %v1902_v46  ;;  %v5898_v58 = vpack.c.bf16 %v1876_v54, %v1868_v53  ;;  %v3698_v42 = vld [vmem:[%s6569_s20 + $0x128] sm:$0xff]  ;;  %v3715_v46 = vld [vmem:[%s6569_s20 + $0x1b0] sm:$0xff]  ;;  %v3676_v43 = vld [vmem:[%s6569_s20 + $0x78] sm:$0xff] }
 0x33d   : > { %5881 = vmatprep.subr.bf16.mxu1 %v5880_v60  ;;  %v1885_v60 = vld [vmem:[%s6537_s29 + $0x2eb8] sm:$0xff]  ;;  %v3699_v53 = vld [vmem:[%s6569_s20 + $0x130] sm:$0xff] }
 0x33e   : > { %v6029_v61 = vadd.f32 %v7823_v6, %v1895_v55  ;;  %v6031_v2 = vadd.f32 %v7828_v11, %v1903_v56  ;;  %v1884_v6 = vld [vmem:[%s6537_s29 + $0x2eb0] sm:$0xff]  ;;  %v3685_v56 = vld [vmem:[%s6569_s20 + $0xc0] sm:$0xff] }
 0x33f   : > { %5511 = vmatpush1.bf16.msra.mxu0 %v5510_v3  ;;  %v3710_v3 = vld [vmem:[%s6569_s20 + $0x188] sm:$0xff]  ;;  %v3700_v55 = vld [vmem:[%s6569_s20 + $0x138] sm:$0xff] }
 0x340   : > { %5883 = vmatpush1.bf16.msra.mxu1 %v5882_v4  ;;  %5513 = vmatprep.subr.bf16.mxu0 %v5512_v7  ;;  %v3661_v4 = vld [vmem:[%s6569_s20] sm:$0xff]  ;;  %v3662_v7 = vld [vmem:[%s6569_s20 + $0x8] sm:$0xff]  ;;  %v3645_v11 = vmul.f32 0.01, %v6029_v61  ;;  %v5932_v15 = vpack.c.bf16 %v3710_v3, %v3709_v1  ;;  %vm3637_vm2 = vcmp.ge.f32.partialorder %v6029_v61, 0.0  ;;  %vm3639_vm3 = vcmp.ge.f32.partialorder %v6031_v2, 0.0 }
 0x341   : > { %5885 = vmatprep.subr.bf16.mxu1 %v5884_v12  ;;  %v5900_v12 = vpack.c.bf16 %v3678_v0, %v3677_v62  ;;  %v5902_v16 = vpack.c.bf16 %v3662_v7, %v3661_v4  ;;  %v3669_v0 = vld [vmem:[%s6569_s20 + $0x40] sm:$0xff]  ;;  %v3670_v1 = vld [vmem:[%s6569_s20 + $0x48] sm:$0xff]  ;;  %v3687_v7 = vld [vmem:[%s6569_s20 + $0xd0] sm:$0xff] }
 0x342   : > { %v3702_v4 = vld [vmem:[%s6569_s20 + $0x148] sm:$0xff] }
 0x343   : > { %5515 = vmatpush1.bf16.msra.mxu0 %v5514_v19  ;;  %v3647_v19 = vmul.f32 0.01, %v6031_v2 }
 0x344   : > { %5887 = vmatpush1.bf16.msra.mxu1 %v5886_v20  ;;  %5517 = vmatprep.subr.bf16.mxu0 %v5516_v21  ;;  %v5934_v20 = vpack.c.bf16 %v3694_v10, %v3693_v9  ;;  %v3663_v21 = vld [vmem:[%s6569_s20 + $0x10] sm:$0xff]  ;;  %v3720_v10 = vld [vmem:[%s6569_s20 + $0x1d8] sm:$0xff] }
 0x345   : > { %5889 = vmatprep.subr.bf16.mxu1 %v5888_v25  ;;  %v5904_v25 = vpack.c.bf16 %v3680_v14, %v3679_v13  ;;  %v3655_v35 = vsel %vm3639_vm3, %v6031_v2, %v3647_v19  ;;  %v3701_v2 = vld [vmem:[%s6569_s20 + $0x140] sm:$0xff]  ;;  %v3719_v9 = vld [vmem:[%s6569_s20 + $0x1d0] sm:$0xff] }
 0x346   : > { %v3671_v14 = vld [vmem:[%s6569_s20 + $0x50] sm:$0xff]  ;;  %v5952_v17 = vpack.c.bf16 %v3720_v10, %v3719_v9  ;;  %v3689_v19 = vld [vmem:[%s6569_s20 + $0xe0] sm:$0xff]  ;;  %v3728_v9 = vld [vmem:[%s6569_s20 + $0x218] sm:$0xff] }
 0x347   : > { %5519 = vmatpush1.bf16.msra.mxu0 %v5518_v32  ;;  %v3714_v32 = vld [vmem:[%s6569_s20 + $0x1a8] sm:$0xff]  ;;  %v3759_v10 = vld [vmem:[%s6569_s20 + $0x310] sm:$0xff] }
 0x348   : > { %5891 = vmatpush1.bf16.msra.mxu1 %v5890_v33  ;;  %5521 = vmatprep.subr.bf16.mxu0 %v5520_v34  ;;  %v3653_v33 = vsel %vm3637_vm2, %v6029_v61, %v3645_v11  ;;  %v5906_v34 = vpack.c.bf16 %v3664_v22, %v3663_v21  ;;  %v5940_v41 = vpack.c.bf16 %v3714_v32, %v3713_v31  ;;  %v3672_v11 = vld [vmem:[%s6569_s20 + $0x58] sm:$0xff]  ;;  %v1898_v21 = vsub.s32 2, %v8132_v29  ;;  %v3721_v22 = vld [vmem:[%s6569_s20 + $0x1e0] sm:$0xff] }
 0x349   : > { %5893 = vmatprep.subr.bf16.mxu1 %v5892_v38  ;;  %v3665_v38 = vld [vmem:[%s6569_s20 + $0x20] sm:$0xff]  ;;  %v5946_v61 = vpack.c.bf16 %v3700_v55, %v3699_v53  ;;  %v5956_v32 = vpack.c.bf16 %v3722_v23, %v3721_v22  ;;  %v3774_v53 = vld [vmem:[%s6569_s20 + $0x388] sm:$0xff] }
 0x34a   : > { %v3730_v22 = vld [vmem:[%s6569_s20 + $0x228] sm:$0xff]  ;;  %v3761_v23 = vld [vmem:[%s6569_s20 + $0x320] sm:$0xff] }
 0x34b   : > { %5523 = vmatpush1.bf16.msra.mxu0 %v5522_v47  ;;  %v3716_v47 = vld [vmem:[%s6569_s20 + $0x1b8] sm:$0xff] }
 0x34c   : > { %5895 = vmatpush1.bf16.msra.mxu1 %v5894_v48  ;;  %5525 = vmatprep.subr.bf16.mxu0 %v5524_v49  ;;  %v5910_v48 = vpack.c.bf16 %v3666_v39, %v3665_v38  ;;  %v5942_v49 = vpack.c.bf16 %v3698_v42, %v3697_v40  ;;  %v5944_v54 = vpack.c.bf16 %v3716_v47, %v3715_v46  ;;  %v3724_v38 = vld [vmem:[%s6569_s20 + $0x1f8] sm:$0xff]  ;;  %v3675_v42 = vld [vmem:[%s6569_s20 + $0x70] sm:$0xff] }
 0x34d   : > { %5897 = vmatprep.subr.bf16.mxu1 %v5896_v52  ;;  %v3668_v52 = vld [vmem:[%s6569_s20 + $0x38] sm:$0xff]  ;;  %v5926_v39 = vpack.c.bf16 %v3674_v28, %v3673_v27  ;;  %v3779_v28 = vld [vmem:[%s6569_s20 + $0x3b0] sm:$0xff] }
 0x34e   : > { %v3748_v27 = vld [vmem:[%s6569_s20 + $0x2b8] sm:$0xff] }
 0x34f   : > { %5527 = vmatpush1.bf16.msra.mxu0 %v5526_v57  ;;  %v3686_v57 = vld [vmem:[%s6569_s20 + $0xc8] sm:$0xff] }
 0x350   : > { %5899 = vmatpush1.bf16.msra.mxu1 %v5898_v58  ;;  %3191 = vmatprep.subr.mxu0 %v1883_v59  ;;  %v3717_v58 = vld [vmem:[%s6569_s20 + $0x1c0] sm:$0xff]  ;;  %v3718_v59 = vld [vmem:[%s6569_s20 + $0x1c8] sm:$0xff]  ;;  %v5916_v62 = vpack.c.bf16 %v3686_v57, %v3685_v56 }
 0x351   : > { %3617 = vmatprep.subr.mxu1 %v1885_v60  ;;  %v5914_v60 = vpack.c.bf16 %v3668_v52, %v3667_v51  ;;  %v5948_v3 = vpack.c.bf16 %v3718_v59, %v3717_v58  ;;  %v3773_v52 = vld [vmem:[%s6569_s20 + $0x380] sm:$0xff]  ;;  %v3726_v57 = vld [vmem:[%s6569_s20 + $0x208] sm:$0xff] }
 0x352   : > { %v3725_v56 = vld [vmem:[%s6569_s20 + $0x200] sm:$0xff] }
 0x353   : > { %3192 = vmatpush1.msra.mxu0 %v1882_v8  ;;  %v3688_v8 = vld [vmem:[%s6569_s20 + $0xd8] sm:$0xff]  ;;  %v3757_v58 = vld [vmem:[%s6569_s20 + $0x300] sm:$0xff] }
 0x354   : > { %3618 = vmatpush1.msra.mxu1 %v1884_v6  ;;  %3204 = vmatmul.mubr.f32.vlgmr.msra.gmra.mrb[2].mxu0 %v6198_v24  ;;  %v5918_v6 = vpack.c.bf16 %v3670_v1, %v3669_v0  ;;  %v5920_v13 = vpack.c.bf16 %v3688_v8, %v3687_v7  ;;  %v3775_v1 = vld [vmem:[%s6569_s20 + $0x390] sm:$0xff] }
 0x355   : > { %3630 = vmatmul.mubr.f32.vlgmr.msra.gmra.mrb[2].mxu1 %v6198_v24  ;;  %5901 = vmatprep.subr.bf16.mxu0 %v5900_v12  ;;  %v5950_v12 = vpack.c.bf16 %v3702_v4, %v3701_v2  ;;  %v5922_v24 = vpack.c.bf16 %v3672_v11, %v3671_v14  ;;  %v3776_v2 = vld [vmem:[%s6569_s20 + $0x398] sm:$0xff]  ;;  %v3727_v8 = vld [vmem:[%s6569_s20 + $0x210] sm:$0xff]  ;;  %v3745_v14 = vld [vmem:[%s6569_s20 + $0x2a0] sm:$0xff] }
 0x356   : > { %5933 = vmatprep.subr.bf16.mxu1 %v5932_v15  ;;  %5903 = vmatpush3.bf16.msra.mxu0 %v5902_v16  ;;  %v3703_v15 = vld [vmem:[%s6569_s20 + $0x150] sm:$0xff]  ;;  %v1890_v16 = vsub.s32 0, %v8132_v29  ;;  %v3746_v11 = vld [vmem:[%s6569_s20 + $0x2a8] sm:$0xff] }
 0x357   : > { %3853 = vmatprep.mubr.f32.mxu0 %v3653_v33  ;;  %5935 = vmatpush3.bf16.msra.mxu1 %v5934_v20  ;;  %v3690_v20 = vld [vmem:[%s6569_s20 + $0xe8] sm:$0xff] }
 0x358   : > { %3923 = vmatprep.mubr.f32.mxu1 %v3655_v35  ;;  %5905 = vmatprep.subr.bf16.mxu0 %v5904_v25  ;;  %v5954_v25 = vpack.c.bf16 %v3704_v18, %v3703_v15  ;;  %v5924_v26 = vpack.c.bf16 %v3690_v20, %v3689_v19  ;;  %v1891_v31 = vrot.slane %v8150_v45, %v1890_v16  ;;  %v3706_v33 = vld [vmem:[%s6569_s20 + $0x168] sm:$0xff]  ;;  %v3692_v35 = vld [vmem:[%s6569_s20 + $0xf8] sm:$0xff]  ;;  %v3777_v16 = vld [vmem:[%s6569_s20 + $0x3a0] sm:$0xff] }
 0x359   : > { %5937 = vmatprep.subr.bf16.mxu1 %v5936_v30  ;;  %v3705_v30 = vld [vmem:[%s6569_s20 + $0x160] sm:$0xff]  ;;  %v5970_v18 = vpack.c.bf16 %v3728_v9, %v3727_v8  ;;  %v5972_v20 = vpack.c.bf16 %v3746_v11, %v3745_v14  ;;  %v3738_v9 = vld [vmem:[%s6569_s20 + $0x268] sm:$0xff]  ;;  %v3755_v11 = vld [vmem:[%s6569_s20 + $0x2f0] sm:$0xff] }
 0x35a   : > { %5907 = vmatpush3.bf16.msra.mxu0 %v5906_v34  ;;  %v3691_v34 = vld [vmem:[%s6569_s20 + $0xf0] sm:$0xff]  ;;  %v5958_v40 = vpack.c.bf16 %v3706_v33, %v3705_v30  ;;  %v6028_v46 = vadd.f32 %v7816_v63, %v1891_v31  ;;  %v3780_v30 = vld [vmem:[%s6569_s20 + $0x3b8] sm:$0xff]  ;;  %v3737_v8 = vld [vmem:[%s6569_s20 + $0x260] sm:$0xff] }
 0x35b   : > { %5939 = vmatpush3.bf16.msra.mxu1 %v5938_v36  ;;  %5909 = vmatprep.subr.bf16.mxu0 %v5908_v37  ;;  %v1899_v36 = vrot.slane %v8150_v45, %v1898_v21  ;;  %v3723_v37 = vld [vmem:[%s6569_s20 + $0x1f0] sm:$0xff]  ;;  %v3729_v21 = vld [vmem:[%s6569_s20 + $0x220] sm:$0xff] }
 0x35c   : > { %5941 = vmatprep.subr.bf16.mxu1 %v5940_v41  ;;  %v5928_v41 = vpack.c.bf16 %v3692_v35, %v3691_v34  ;;  %v5960_v47 = vpack.c.bf16 %v3724_v38, %v3723_v37  ;;  %v3644_v59 = vmul.f32 0.01, %v6028_v46  ;;  %vm3636_vm4 = vcmp.ge.f32.partialorder %v6028_v46, 0.0  ;;  %v3731_v34 = vld [vmem:[%s6569_s20 + $0x230] sm:$0xff]  ;;  %v3732_v35 = vld [vmem:[%s6569_s20 + $0x238] sm:$0xff] }
 0x35d   : > { %v6030_v51 = vadd.f32 %v7821_v5, %v1899_v36  ;;  %v3758_v5 = vld [vmem:[%s6569_s20 + $0x308] sm:$0xff]  ;;  %v5974_v31 = vpack.c.bf16 %v3730_v22, %v3729_v21  ;;  %v3763_v36 = vld [vmem:[%s6569_s20 + $0x330] sm:$0xff]  ;;  %v6008_v37 = vpack.c.bf16 %v3780_v30, %v3779_v28  ;;  %v3764_v38 = vld [vmem:[%s6569_s20 + $0x338] sm:$0xff]  ;;  %v1910_v28 = vsub.s32 5, %v8132_v29 }
 0x35e   : > { %5911 = vmatpush3.bf16.msra.mxu0 %v5910_v48  ;;  %v3708_v48 = vld [vmem:[%s6569_s20 + $0x178] sm:$0xff]  ;;  %v5998_v4 = vpack.c.bf16 %v3758_v5, %v3757_v58  ;;  %v3735_v58 = vld [vmem:[%s6569_s20 + $0x250] sm:$0xff]  ;;  %v1918_v30 = vsub.s32 7, %v8132_v29 }
 0x35f   : > { %5943 = vmatpush3.bf16.msra.mxu1 %v5942_v49  ;;  %5913 = vmatprep.subr.bf16.mxu0 %v5912_v50  ;;  %v3741_v49 = vld [vmem:[%s6569_s20 + $0x280] sm:$0xff]  ;;  %v3742_v50 = vld [vmem:[%s6569_s20 + $0x288] sm:$0xff]  ;;  %v5962_v63 = vpack.c.bf16 %v3708_v48, %v3707_v44  ;;  %v3646_v0 = vmul.f32 0.01, %v6030_v51  ;;  %vm3638_vm5 = vcmp.ge.f32.partialorder %v6030_v51, 0.0  ;;  %v6010_v44 = vpack.c.bf16 %v3764_v38, %v3763_v36  ;;  %v3767_v5 = vld [vmem:[%s6569_s20 + $0x350] sm:$0xff] }
 0x360   : > { %5945 = vmatprep.subr.bf16.mxu1 %v5944_v54  ;;  %v5930_v54 = vpack.c.bf16 %v3676_v43, %v3675_v42  ;;  %v5964_v55 = vpack.c.bf16 %v3742_v50, %v3741_v49  ;;  %v3782_v42 = vld [vmem:[%s6569_s20 + $0x3c8] sm:$0xff]  ;;  %v5978_v43 = vpack.c.bf16 %v3732_v35, %v3731_v34  ;;  %v3765_v49 = vld [vmem:[%s6569_s20 + $0x340] sm:$0xff]  ;;  %v1919_v34 = vrot.slane %v8150_v45, %v1918_v30 }
 0x361   : > { %v3654_v15 = vsel %vm3638_vm5, %v6030_v51, %v3646_v0  ;;  %v3734_v48 = vld [vmem:[%s6569_s20 + $0x248] sm:$0xff] }
 0x362   : > { %5915 = vmatpush3.bf16.msra.mxu0 %v5914_v60  ;;  %v5996_v60 = vpack.c.bf16 %v3774_v53, %v3773_v52  ;;  %v3766_v51 = vld [vmem:[%s6569_s20 + $0x348] sm:$0xff]  ;;  %v3751_v52 = vld [vmem:[%s6569_s20 + $0x2d0] sm:$0xff]  ;;  %v3752_v53 = vld [vmem:[%s6569_s20 + $0x2d8] sm:$0xff] }
 0x363   : > { %5947 = vmatpush3.bf16.msra.mxu1 %v5946_v61  ;;  %5917 = vmatprep.subr.bf16.mxu0 %v5916_v62  ;;  %v3743_v61 = vld [vmem:[%s6569_s20 + $0x290] sm:$0xff]  ;;  %v3744_v62 = vld [vmem:[%s6569_s20 + $0x298] sm:$0xff] }
 0x364   : > { %5949 = vmatprep.subr.bf16.mxu1 %v5948_v3  ;;  %v5966_v3 = vpack.c.bf16 %v3726_v57, %v3725_v56  ;;  %v5968_v7 = vpack.c.bf16 %v3744_v62, %v3743_v61  ;;  %v6014_v56 = vpack.c.bf16 %v3766_v51, %v3765_v49  ;;  %v5984_v57 = vpack.c.bf16 %v3752_v53, %v3751_v52  ;;  %v3768_v61 = vld [vmem:[%s6569_s20 + $0x358] sm:$0xff] }
 0x365   : > { %v6018_v0 = vpack.c.bf16 %v3768_v61, %v3767_v5 }
 0x366   : > { %5919 = vmatpush3.bf16.msra.mxu0 %v5918_v6  ;;  %v3652_v6 = vsel %vm3636_vm4, %v6028_v46, %v3644_v59  ;;  %v3736_v59 = vld [vmem:[%s6569_s20 + $0x258] sm:$0xff] }
 0x367   : > { %5951 = vmatpush3.bf16.msra.mxu1 %v5950_v12  ;;  %5921 = vmatprep.subr.bf16.mxu0 %v5920_v13  ;;  %v6000_v12 = vpack.c.bf16 %v3776_v2, %v3775_v1  ;;  %v3760_v13 = vld [vmem:[%s6569_s20 + $0x318] sm:$0xff]  ;;  %v5986_v62 = vpack.c.bf16 %v3736_v59, %v3735_v58  ;;  %v3753_v1 = vld [vmem:[%s6569_s20 + $0x2e0] sm:$0xff]  ;;  %v3754_v2 = vld [vmem:[%s6569_s20 + $0x2e8] sm:$0xff] }
 0x368   : > { %5953 = vmatprep.subr.bf16.mxu1 %v5952_v17  ;;  %v3778_v17 = vld [vmem:[%s6569_s20 + $0x3a8] sm:$0xff]  ;;  %v6002_v19 = vpack.c.bf16 %v3760_v13, %v3759_v10 }
 0x369   : > { %v3770_v13 = vld [vmem:[%s6569_s20 + $0x368] sm:$0xff] }
 0x36a   : > { %5923 = vmatpush3.bf16.msra.mxu0 %v5922_v24  ;;  %v6004_v24 = vpack.c.bf16 %v3778_v17, %v3777_v16  ;;  %v3787_v16 = vld [vmem:[%s6569_s20 + $0x3f0] sm:$0xff] }
 0x36b   : > { %5955 = vmatpush3.bf16.msra.mxu1 %v5954_v25  ;;  %5925 = vmatprep.subr.bf16.mxu0 %v5924_v26  ;;  %v3762_v25 = vld [vmem:[%s6569_s20 + $0x328] sm:$0xff]  ;;  %v3747_v26 = vld [vmem:[%s6569_s20 + $0x2b0] sm:$0xff] }
 0x36c   : > { %5957 = vmatprep.subr.bf16.mxu1 %v5956_v32  ;;  %v6006_v32 = vpack.c.bf16 %v3762_v25, %v3761_v23  ;;  %v5976_v33 = vpack.c.bf16 %v3748_v27, %v3747_v26  ;;  %v3771_v23 = vld [vmem:[%s6569_s20 + $0x370] sm:$0xff]  ;;  %v1906_v26 = vsub.s32 4, %v8132_v29  ;;  %v1914_v27 = vsub.s32 6, %v8132_v29 }
 0x36e   : > { %5927 = vmatpush3.bf16.msra.mxu0 %v5926_v39  ;;  %v3749_v39 = vld [vmem:[%s6569_s20 + $0x2c0] sm:$0xff] }
 0x36f   : > { %5959 = vmatpush3.bf16.msra.mxu1 %v5958_v40  ;;  %5929 = vmatprep.subr.bf16.mxu0 %v5928_v41  ;;  %v3750_v40 = vld [vmem:[%s6569_s20 + $0x2c8] sm:$0xff]  ;;  %v3781_v41 = vld [vmem:[%s6569_s20 + $0x3c0] sm:$0xff] }
 0x370   : > { %5961 = vmatprep.subr.bf16.mxu1 %v5960_v47  ;;  %v5980_v46 = vpack.c.bf16 %v3750_v40, %v3749_v39  ;;  %v3733_v47 = vld [vmem:[%s6569_s20 + $0x240] sm:$0xff]  ;;  %v6012_v50 = vpack.c.bf16 %v3782_v42, %v3781_v41 }
 0x372   : > { %5931 = vmatpush3.bf16.msra.mxu0 %v5930_v54  ;;  %v3783_v54 = vld [vmem:[%s6569_s20 + $0x3d0] sm:$0xff] }
 0x373   : > { %5963 = vmatpush3.bf16.msra.mxu1 %v5962_v63  ;;  %5965 = vmatprep.subr.bf16.mxu0 %v5964_v55  ;;  %v3784_v63 = vld [vmem:[%s6569_s20 + $0x3d8] sm:$0xff]  ;;  %v5982_v55 = vpack.c.bf16 %v3734_v48, %v3733_v47 }
 0x374   : > { %5997 = vmatprep.subr.bf16.mxu1 %v5996_v60  ;;  %v6016_v60 = vpack.c.bf16 %v3784_v63, %v3783_v54 }
 0x375   : > { %3854 = vmatmul.mubr.f32.vlgmr.msra.gmra.mrb[4].mxu0 %v3652_v6  ;;  %v5990_v6 = vpack.c.bf16 %v3738_v9, %v3737_v8 }
 0x376   : > { %3924 = vmatmul.mubr.f32.vlgmr.msra.gmra.mrb[4].mxu1 %v3654_v15  ;;  %5967 = vmatpush3.bf16.msra.mxu0 %v5966_v3  ;;  %v3785_v3 = vld [vmem:[%s6569_s20 + $0x3e0] sm:$0xff]  ;;  %v3756_v15 = vld [vmem:[%s6569_s20 + $0x2f8] sm:$0xff] }
 0x377   : > { %5999 = vmatpush3.bf16.msra.mxu1 %v5998_v4  ;;  %5969 = vmatprep.subr.bf16.mxu0 %v5968_v7  ;;  %v5988_v4 = vpack.c.bf16 %v3754_v2, %v3753_v1  ;;  %v3786_v7 = vld [vmem:[%s6569_s20 + $0x3e8] sm:$0xff]  ;;  %v5992_v17 = vpack.c.bf16 %v3756_v15, %v3755_v11 }
 0x378   : > { %6001 = vmatprep.subr.bf16.mxu1 %v6000_v12  ;;  %v6020_v10 = vpack.c.bf16 %v3786_v7, %v3785_v3  ;;  %v3769_v12 = vld [vmem:[%s6569_s20 + $0x360] sm:$0xff] }
 0x379   : > { %v6022_v14 = vpack.c.bf16 %v3770_v13, %v3769_v12  ;;  %v4267_v3 = vld [vmem:[%s371_s13] ss:$0 sm:$0xff] (!%p4266_p0) }
 0x37a   : > { %5971 = vmatpush3.bf16.msra.mxu0 %v5970_v18  ;;  %v3788_v18 = vld [vmem:[%s6569_s20 + $0x3f8] sm:$0xff] }
 0x37b   : > { %6003 = vmatpush3.bf16.msra.mxu1 %v6002_v19  ;;  %5973 = vmatprep.subr.bf16.mxu0 %v5972_v20  ;;  %v3739_v19 = vld [vmem:[%s6569_s20 + $0x270] sm:$0xff]  ;;  %v3740_v20 = vld [vmem:[%s6569_s20 + $0x278] sm:$0xff]  ;;  %v6024_v21 = vpack.c.bf16 %v3788_v18, %v3787_v16 }
 0x37c   : > { %6005 = vmatprep.subr.bf16.mxu1 %v6004_v24  ;;  %v5994_v22 = vpack.c.bf16 %v3740_v20, %v3739_v19  ;;  %v3772_v24 = vld [vmem:[%s6569_s20 + $0x378] sm:$0xff] }
 0x37d   : > { %v6026_v25 = vpack.c.bf16 %v3772_v24, %v3771_v23 }
 0x37e   : > { %5975 = vmatpush3.bf16.msra.mxu0 %v5974_v31  ;;  %v1907_v31 = vrot.slane %v8150_v45, %v1906_v26 }
 0x37f   : > { %6007 = vmatpush3.bf16.msra.mxu1 %v6006_v32  ;;  %5977 = vmatprep.subr.bf16.mxu0 %v5976_v33  ;;  %v1915_v32 = vrot.slane %v8150_v45, %v1914_v27  ;;  %v1911_v33 = vrot.slane %v8150_v45, %v1910_v28 }
 0x380   : > { %6009 = vmatprep.subr.bf16.mxu1 %v6008_v37 }
 0x382   : > { %5979 = vmatpush3.bf16.msra.mxu0 %v5978_v43 }
 0x383   : > { %6011 = vmatpush3.bf16.msra.mxu1 %v6010_v44  ;;  %5981 = vmatprep.subr.bf16.mxu0 %v5980_v46 }
 0x384   : > { %6013 = vmatprep.subr.bf16.mxu1 %v6012_v50 }
 0x386   : > { %5983 = vmatpush3.bf16.msra.mxu0 %v5982_v55 }
 0x387   : > { %6015 = vmatpush3.bf16.msra.mxu1 %v6014_v56  ;;  %5985 = vmatprep.subr.bf16.mxu0 %v5984_v57 }
 0x388   : > { %6017 = vmatprep.subr.bf16.mxu1 %v6016_v60 }
 0x38a   : > { %5987 = vmatpush3.bf16.msra.mxu0 %v5986_v62  ;;  %v3660_v62 = vld [vmem:[#allocation2] sm:$0xff] }
 0x38b   : > { %6019 = vmatpush3.bf16.msra.mxu1 %v6018_v0  ;;  %5989 = vmatprep.subr.bf16.mxu0 %v5988_v4 }
 0x38c   : > { %6021 = vmatprep.subr.bf16.mxu1 %v6020_v10 }
 0x38e   : > { %5991 = vmatpush3.bf16.msra.mxu0 %v5990_v6 }
 0x38f   : > { %6023 = vmatpush3.bf16.msra.mxu1 %v6022_v14  ;;  %5993 = vmatprep.subr.bf16.mxu0 %v5992_v17 }
 0x390   : > { %6025 = vmatprep.subr.bf16.mxu1 %v6024_v21 }
 0x392   : > { %5995 = vmatpush3.bf16.msra.mxu0 %v5994_v22 }
 0x393   : > { %6027 = vmatpush3.bf16.msra.mxu1 %v6026_v25 }
 0x427   : > { %v3205_v35 = vpop.f32.mrb[2].mxu0 }
 0x428   : > { %v6032_v36 = vadd.f32 %v3205_v35, %v1907_v31  ;;  %v3631_v37 = vpop.f32.mrb[2].mxu1  ;;  %v3207_v38 = vpop.f32.mrb[3].mxu0 }
 0x429   : > { %v6034_v39 = vadd.f32 %v3631_v37, %v1915_v32  ;;  %v6033_v40 = vadd.f32 %v3207_v38, %v1911_v33  ;;  %v3633_v41 = vpop.f32.mrb[3].mxu1 }
 0x42a   : > { %v3648_v42 = vmul.f32 0.01, %v6032_v36  ;;  %v6035_v43 = vadd.f32 %v3633_v41, %v1919_v34  ;;  %vm3640_vm6 = vcmp.ge.f32.partialorder %v6032_v36, 0.0 }
 0x42b   : > { %v3650_v44 = vmul.f32 0.01, %v6034_v39  ;;  %v3649_v29 = vmul.f32 0.01, %v6033_v40  ;;  %vm3641_vm7 = vcmp.ge.f32.partialorder %v6033_v40, 0.0  ;;  %vm3642_vm8 = vcmp.ge.f32.partialorder %v6034_v39, 0.0 }
 0x42c   : > { %v3651_v46 = vmul.f32 0.01, %v6035_v43  ;;  %vm3643_vm9 = vcmp.ge.f32.partialorder %v6035_v43, 0.0  ;;  %v3656_v45 = vsel %vm3640_vm6, %v6032_v36, %v3648_v42 }
 0x42d   : > { %v3657_v47 = vsel %vm3641_vm7, %v6033_v40, %v3649_v29  ;;  %v3658_v49 = vsel %vm3642_vm8, %v6034_v39, %v3650_v44 }
 0x42e   : > { %3993 = vmatprep.mubr.f32.mxu0 %v3657_v47  ;;  %v3659_v48 = vsel %vm3643_vm9, %v6035_v43, %v3651_v46 }
 0x42f   : > { %4063 = vmatprep.mubr.f32.mxu1 %v3659_v48  ;;  %3994 = vmatmul.mubr.f32.vlgmr.msra.gmra.mrb[6].mxu0 %v3656_v45 }
 0x430   : > { %4064 = vmatmul.mubr.f32.vlgmr.msra.gmra.mrb[6].mxu1 %v3658_v49 }
 0x448   : > { %v4304_v50 = vpop.f32.mrb[4].mxu0 }
 0x449   : > { %v4339_v51 = vpop.f32.mrb[4].mxu1  ;;  %v4305_v52 = vpop.f32.mrb[5].mxu0 }
 0x44a   : > { %v4306_v53 = vadd.f32 %v4305_v52, %v4304_v50  ;;  %v4340_v54 = vpop.f32.mrb[5].mxu1 }
 0x44b   : > { %v4341_v63 = vadd.f32 %v4340_v54, %v4339_v51 }
 0x44d   : > { %v3926_v55 = vadd.f32 %v4341_v63, %v4306_v53 }
 0x502   : > { %v4374_v56 = vpop.f32.mrb[6].mxu0 }
 0x503   : > { %v4409_v57 = vpop.f32.mrb[6].mxu1  ;;  %v4375_v58 = vpop.f32.mrb[7].mxu0 }
 0x504   : > { %v4376_v59 = vadd.f32 %v4375_v58, %v4374_v56  ;;  %v4410_v60 = vpop.f32.mrb[7].mxu1 }
 0x505   : > { %v4411_v5 = vadd.f32 %v4410_v60, %v4409_v57 }
 0x506   : > { %v3996_v61 = vadd.f32 %v4376_v59, %v3926_v55  ;;  %4075 = sbr.rel (%p4266_p0) target bundleno = 1306 (0x51a), region = 52 }
 0x508   : > { %v4066_v0 = vadd.f32 %v4411_v5, %v3996_v61 }
 0x50a   : > { %v4069_v1 = vadd.f32 %v4066_v0, %v3660_v62 }
 0x50c   : > { %4071 = vst.msk [vmem:[#allocation2] sm:$0xff] %vm4070_vm10, %v4069_v1 }
 0x513   : > { %v4076_v2 = vld [vmem:[#allocation2] sm:$0xff] }
 0x514   : > { %v4084_v4 = vadd.f32 %v4267_v3, %v4076_v2 }
 0x516   : > { %vm4085_vm11 = vcmp.ge.f32.partialorder %v4084_v4, 0.0  ;;  %v4086_v7 = vmul.f32 0.01, %v4084_v4 }
 0x518   : > { %v4087_v8 = vsel %vm4085_vm11, %v4084_v4, %v4086_v7 }
 0x519   : > { %4088 = vst.msk [vmem:[%s343_s21] sm:$0xff] %vm4070_vm10, %v4087_v8 }
 0x51a PF: > { %s4269_s24 = sshll.u32 %s6339_s25, 7  ;;  %s4104_s10 = sshll.u32 %s343_s21, 4  ;;  %s4105_s10 = int_to_ptr.vmem [resolvable:$true] %s4104_s10 }
 0x51b   : > { %s8325_s26 = scalar_lea.hbm %s8390_s5, %s4269_s24  ;;  %s8419_s13 = sand.u32 1, %s6315_s19  }
 0x51c   : > { %s4090_s23 = scalar_lea.sflag [#allocation5], %s8419_s13  ;;  %s6229_s6 = scalar_lea.vmem %s4105_s10, 128 }
 0x51d   : > { %p6230_p1 = scmp.ne.s32.totalorder %s4105_s10, %s6229_s6  ;;  %p8420_p5 = scmp.ne.s32.totalorder %s8411_s15, 0 }
 0x51e   : > { %s6358_s12 = smov [#allocation6]  }
 0x51f   : > { %p6231_p8 = pnand %p6230_p1, %p8420_p5  ;;  %s6233_s8 = sshll.u32 %s6358_s12, 4  ;;  %s6234_s8 = int_to_ptr.vmem [resolvable:$false] %s6233_s8 }
 0x520   : > { %s6235_s11 = scalar_lea.vmem %s6234_s8, 256  ;;  %p6236_p11 = scmp.lt.s32.totalorder %s4105_s10, %s6234_s8 }
 0x521   : > { %p6232_p10 = pneg %p6231_p8  ;;  %p6237_p13 = scmp.lt.s32.totalorder %s6235_s11, %s6229_s6 }
 0x523   : > { %p6238_p3 = por %p6237_p13, %p6236_p11 }
 0x525   : > { %p6239_p6 = pnand %p6238_p3, %p6232_p10 }
 0x527   : > { %6242 = shalt.err (!%p6239_p6)
}
 0x528   : > { %s6243_s25 = scalar_lea.hbm %s8325_s26, 128  ;;  %s6247_s27 = scalar_lea.hbm %s8390_s5, 256 }
 0x529   : > { %p6244_p9 = scmp.ne.s32.totalorder %s8325_s26, %s6243_s25  ;;  %p6248_p7 = scmp.lt.u32.totalorder %s8325_s26, %s8390_s5 }
 0x52a   : > { %p6249_p4 = scmp.lt.u32.totalorder %s6247_s27, %s6243_s25  ;;  %p6251_p1 = scmp.lt.u32.totalorder %s6243_s25, %s8325_s26 }
 0x52b   : > { %p6245_p12 = pnand %p6244_p9, %p8420_p5 }
 0x52c   : > { %p6250_p0 = por %p6249_p4, %p6248_p7 }
 0x52d   : > { %p6246_p2 = pneg %p6245_p12 }
 0x52e   : > { %p6252_p8 = por %p6251_p1, %p6250_p0 }
 0x530   : > { %p6253_p10 = pnand %p6252_p8, %p6246_p2 }
 0x532   : > { %6256 = shalt.err (!%p6253_p10)
}
 0x533   : > { %6083 = dma.vmem_to_hbm [thread:$0]  (%p8420_p5), %s4105_s10, 128, %s8325_s26, %s4090_s23  }
 0x534 PF: > { %s8421_s17 = sld [smem:[#allocation18_spill]]  ;;  %p6094_p11 = scmp.ge.s32.totalorder %s6351_s28, 2 }
 0x535   : > { %s4116_s29 = sand.u32 1, %s6311_s18  }
 0x536   : > { %s4117_s30 = scalar_lea.sflag [#allocation5], %s4116_s29 }
 0x53a   : > { %p8422_p13 = scmp.ne.s32.totalorder %s8421_s17, 0 }
 0x53c   : > { %p6090_p3 = pnand %p6094_p11, %p8422_p13 }
 0x53e   : > { %6306 = dma.done.wait (!%p6090_p3), %s4117_s30, 128  }
 0x53f   : > { %6308 = vsyncadd (!%p6090_p3), %s4117_s30, 4294967168  ;;  %s21_s28 = sadd.s32 1, %s6351_s28   ;;  %s8423_s20 = sld [smem:[#allocation9_spill]] }
 0x540   : > { %p18_p6 = scmp.ge.s32.totalorder %s21_s28, 8   ;;  %s8424_s14 = sld [smem:[#allocation16_spill]] }
 0x541   : > { %s8425_s21 = sld [smem:[#allocation10_spill]]  ;;  %s8426_s22 = sld [smem:[#allocation11_spill]] }
 0x542   : > { %s8427_s23 = sld [smem:[#allocation17_spill]]  ;;  %s8428_s24 = sld [smem:[#allocation12_spill]] }
 0x543   : > { %s8429_s25 = sld [smem:[#allocation13_spill]]  ;;  %s8430_s26 = sld [smem:[#allocation14_spill]] }
 0x544   : > { %s8431_s27 = sld [smem:[#allocation15_spill]]  ;;  %s8432_s18 = smov %s6315_s19 }
 0x545   : > { %s8433_s19 = smov %s8423_s20  ;;  %20 = sbr.rel (!%p18_p6) target bundleno = 11 (0xb), region = 105 }
 0x546   : > { %s8434_s20 = smov %s8424_s14 }
 0x54c   :  { %4122 = vsyncpa [#allocation4], 1 }
 0x54d   :  { %4124 = vsyncpa [#allocation4 + $0x1], 1 }
 0x54e   :  { %4125 = vsyncpa [#allocation5], 1 }
 0x54f   :  { %4127 = vsyncpa [#allocation5 + $0x1], 1 }

</bundles_post_ra>
